<compile_context>
chip_gen: v7x
topology: tpu7x:2x2x1
jax: 0.10.0
libtpu: 0.0.40
codegen_flags: <defaults>
</compile_context>

<pallas_src>
import math

import jax
import jax.numpy as jnp
from jax import lax
from jax.experimental import pallas as pl
from jax.experimental.pallas import tpu as pltpu


def make_sae_topk_kernel(n_layers: int, k: int):
    """Ref order: x, pre_bias, (w_i, b_i)*n_layers, D_norm -> outputs S, X_recon.

    The wrapper folds the pre_bias subtraction into layer-0's bias and
    latent_bias into the last layer's bias, so the kernel only needs pre_bias
    for the decoder add.
    """

    def kernel(*refs):
        x_ref = refs[0]
        pre_bias_ref = refs[1]
        wbs = refs[2:2 + 2 * n_layers]
        d_ref = refs[2 + 2 * n_layers]
        s_out_ref = refs[3 + 2 * n_layers]
        xrec_ref = refs[4 + 2 * n_layers]

        # ---- encoder: Linear(+ReLU except last); MXU with f32 accumulation ----
        h = x_ref[...]                                      # (TB, M) f32
        for i in range(n_layers):
            w = wbs[2 * i][...]                             # (in, out) f32/bf16
            b = wbs[2 * i + 1][...]                         # (1, out) f32
            h = jnp.dot(h.astype(w.dtype), w,
                        preferred_element_type=jnp.float32) + b
            if i < n_layers - 1:
                h = jnp.maximum(h, 0.0)
        # h is now the pre-activation (latent_bias already folded in).

        # ---- exact top-k along last dim (scatter of ReLU'd top-k values) ----
        col = lax.broadcasted_iota(jnp.int32, h.shape, 1)
        big = jnp.int32(h.shape[-1])

        def topk_body(_, carry):
            work, s = carry
            m = jnp.max(work, axis=-1, keepdims=True)                 # row max
            idx = jnp.min(jnp.where(work == m, col, big),
                          axis=-1, keepdims=True)                     # first argmax
            onehot = col == idx
            # pre_act at the selected lane equals m, so postact = ReLU(m).
            s = jnp.where(onehot, jnp.maximum(m, 0.0), s)
            work = jnp.where(onehot, -jnp.inf, work)
            return work, s

        # fori_loop bounds live ranges at large k; fully unrolled for small k.
        _, s = lax.fori_loop(0, k, topk_body,
                             (h, jnp.zeros(h.shape, jnp.float32)),
                             unroll=True if k <= 8 else 4)
        # TODO(synk): for production F/k, emit a compressed (vals, idx) output
        # instead of the dense (TB, F) S to cut S writeback HBM traffic by F/k.
        s_out_ref[...] = s

        # ---- decoder: D already column-normalized by the wrapper ----
        # TODO(synk): at production F (tens of thousands) tile D along F via a
        # second "arbitrary" grid axis with a (TB, M) VMEM accumulator (and on
        # v7x consider fp8 D); the dense (F, M) block would not fit VMEM.
        d = d_ref[...]                                      # (F, M)
        xrec_ref[...] = (
            jnp.dot(s.astype(d.dtype), d, preferred_element_type=jnp.float32)
            + pre_bias_ref[...]
        )

    return kernel


def _pick_block_b(B, requested):
    assert B % 8 == 0, "batch must be a multiple of 8"
    block_b = min(requested, B)
    if B >= 16:
        # Keep >= 2 grid steps so dimension_semantics=("parallel",) can shard
        # across both TensorCores on v7x (and the pipeline stays useful).
        block_b = min(block_b, B // 2)
    block_b = max(8, (block_b // 8) * 8)
    while B % block_b != 0:
        block_b -= 8
    return block_b


def _estimate_vmem_bytes(block_b, M, F, hidden_dims, param_arrays,
                         single_buffer_params):
    f32 = 4
    # streamed tiles (X in, S + X_recon out), double-buffered by the pipeline
    io = 2 * (block_b * M + block_b * F + block_b * M) * f32
    pbuf = 1 if single_buffer_params else 2
    params = pbuf * sum(int(math.prod(a.shape)) * a.dtype.itemsize
                        for a in param_arrays)
    # live temporaries: top-k loop tensors + encoder hidden activations
    temps = 5 * block_b * F * f32 + sum(block_b * d * f32 for d in hidden_dims)
    return io + params + temps


def _vmem_limit_bytes(need):
    # Generation-aware scoped-VMEM budget: ~80% of physical VMEM
    # (128 MiB on v5e/v6e, 64 MiB on v7x), never below 32 MiB.
    try:
        info = pltpu.get_tpu_info()
        phys = int(getattr(info, "vmem_capacity_bytes", 64 * 1024 * 1024))
    except Exception:
        phys = 64 * 1024 * 1024
    cap = int(0.80 * phys)
    return int(min(max(2 * need, 32 * 1024 * 1024), cap))


def sae_topk_forward(X, pre_bias, weights_t, biases, latent_bias, D, k,
                     *, block_b=256, param_dtype=jnp.bfloat16):
    """X: (B, M) f32. weights_t[i]: (in, out). biases[i]: (out,). D: (F, M).

    param_dtype=jnp.bfloat16 (default) feeds the MXU bf16 operands with f32
    accumulation; pass None for a fully-f32 (bit-tight) path.
    """
    B, M = X.shape
    F = D.shape[0]
    n_layers = len(weights_t)
    assert k <= F
    block_b = _pick_block_b(B, block_b)
    grid = (B // block_b,)

    # --- hoisted, batch-invariant parameter prep (runs once per call) ---
    # Decoder column normalization (matches `self.D.data /= norm`).
    D_norm = D / jnp.sqrt(jnp.sum(D * D, axis=0, keepdims=True))
    # Fold pre_bias into layer-0's bias and latent_bias into the last bias.
    biases_f = [b.astype(jnp.float32) for b in biases]
    biases_f[0] = biases_f[0] - (pre_bias.astype(jnp.float32)
                                 @ weights_t[0].astype(jnp.float32))
    biases_f[-1] = biases_f[-1] + latent_bias.astype(jnp.float32)

    if param_dtype is not None:          # bf16 (or fp8 on v7x) MXU operands
        weights_c = [w.astype(param_dtype) for w in weights_t]
        D_c = D_norm.astype(param_dtype)
    else:
        weights_c = [w.astype(jnp.float32) for w in weights_t]
        D_c = D_norm.astype(jnp.float32)

    pre_bias2 = pre_bias.reshape(1, M).astype(jnp.float32)

    param_inputs = [pre_bias2]
    for w, b in zip(weights_c, biases_f):
        param_inputs += [w, b.reshape(1, -1)]
    param_inputs.append(D_c)

    out_shape = (jax.ShapeDtypeStruct((B, F), jnp.float32),   # S
                 jax.ShapeDtypeStruct((B, M), jnp.float32))   # X_recon
    out_specs = (pl.BlockSpec((block_b, F), lambda i: (i, 0)),
                 pl.BlockSpec((block_b, M), lambda i: (i, 0)))

    hidden_dims = [w.shape[1] for w in weights_t]
    kernel = make_sae_topk_kernel(n_layers, k)

    def build_and_call(single_buffer_params):
        # Constant (0,0)-indexed parameter blocks never change across the grid;
        # single-buffer them to halve their VMEM residency (decisive on v7x).
        pkw = ({"pipeline_mode": pl.Buffered(1)}
               if single_buffer_params else {})
        in_specs = [pl.BlockSpec((block_b, M), lambda i: (i, 0))]       # X (streamed)
        in_specs.append(pl.BlockSpec((1, M), lambda i: (0, 0), **pkw))  # pre_bias
        for w in weights_c:
            in_specs.append(pl.BlockSpec(w.shape, lambda i: (0, 0), **pkw))           # W_i
            in_specs.append(pl.BlockSpec((1, w.shape[1]), lambda i: (0, 0), **pkw))   # b_i
        in_specs.append(pl.BlockSpec((F, M), lambda i: (0, 0), **pkw))  # D_norm

        need = _estimate_vmem_bytes(block_b, M, F, hidden_dims, param_inputs,
                                    single_buffer_params)
        fn = pl.pallas_call(
            kernel,
            out_shape=out_shape,
            grid_spec=pltpu.PrefetchScalarGridSpec(
                num_scalar_prefetch=0,
                grid=grid,
                in_specs=in_specs,
                out_specs=out_specs,
            ),
            compiler_params=pltpu.CompilerParams(
                dimension_semantics=("parallel",),
                vmem_limit_bytes=_vmem_limit_bytes(need),
            ),
        )
        return fn(X, *param_inputs)

    try:
        return build_and_call(single_buffer_params=True)
    except Exception:
        # Fallback for Pallas builds without BlockSpec pipeline_mode support.
        return build_and_call(single_buffer_params=False)


def reference_forward(X, pre_bias, weights_t, biases, latent_bias, D, k):
    """Pure-JAX reference mirroring the PyTorch module (learn_D=True)."""
    h = X - pre_bias
    n = len(weights_t)
    for i, (wt, b) in enumerate(zip(weights_t, biases)):
        h = h @ wt + b
        if i < n - 1:
            h = jnp.maximum(h, 0.0)
    pre_act = h + latent_bias
    vals, inds = lax.top_k(pre_act, k)
    vals = jnp.maximum(vals, 0.0)
    B = X.shape[0]
    S = jnp.zeros_like(pre_act).at[jnp.arange(B)[:, None], inds].set(vals)
    D_norm = D / jnp.linalg.norm(D, axis=0, keepdims=True)
    X_recon = S @ D_norm + pre_bias
    return S, X_recon


if __name__ == "__main__":
    # Small but lane-aligned shapes (all feature dims multiples of 128); the
    # batch is tiled so grid=(2,) exercises the pipelined / parallel path.
    B, M = 64, 128
    projections_up = [256, 384]      # encoder: Linear(128->256)+ReLU, Linear(256->384)
    F = projections_up[-1]
    k = 4

    key = jax.random.PRNGKey(0)
    keys = jax.random.split(key, 2 * len(projections_up) + 4)

    # deterministic parameter init (PyTorch-Linear-style uniform bounds)
    weights_t, biases = [], []
    in_dim = M
    ki = 0
    for out_dim in projections_up:
        bound = 1.0 / float(in_dim) ** 0.5
        w = jax.random.uniform(keys[ki], (out_dim, in_dim), jnp.float32, -bound, bound)
        b = jax.random.uniform(keys[ki + 1], (out_dim,), jnp.float32, -bound, bound)
        weights_t.append(w.T)                       # (in, out) for `h @ W`
        biases.append(b)
        in_dim = out_dim
        ki += 2

    D = jax.random.normal(keys[ki], (F, M), jnp.float32)           # learn_D=True
    latent_bias = 0.01 * jax.random.normal(keys[ki + 1], (F,), jnp.float32)
    pre_bias = 0.01 * jax.random.normal(keys[ki + 2], (M,), jnp.float32)
    X = jax.random.normal(keys[ki + 3], (B, M), jnp.float32)

    S_ref, X_recon_ref = reference_forward(X, pre_bias, weights_t, biases,
                                           latent_bias, D, k)

    # --- full-f32 path: tight numerical check against the reference ---
    S, X_recon = sae_topk_forward(X, pre_bias, weights_t, biases, latent_bias,
                                  D, k, param_dtype=None)
    jax.block_until_ready((S, X_recon))
    assert int(jnp.max(jnp.sum(S != 0, axis=-1))) <= k
    assert jnp.allclose(S, S_ref, atol=1e-4, rtol=1e-4), "S mismatch (f32)"
    assert jnp.allclose(X_recon, X_recon_ref, atol=1e-4, rtol=1e-4), "X_recon mismatch (f32)"

    # --- default bf16-operand path (f32 accumulation): loose sanity check ---
    S_bf, X_recon_bf = sae_topk_forward(X, pre_bias, weights_t, biases,
                                        latent_bias, D, k)
    jax.block_until_ready((S_bf, X_recon_bf))
    assert int(jnp.max(jnp.sum(S_bf != 0, axis=-1))) <= k
    assert bool(jnp.all(jnp.isfinite(X_recon_bf)))
    assert float(jnp.mean(jnp.abs(X_recon_bf - X_recon_ref))) < 0.1, "bf16 X_recon far off"

    print("KERNEL_OK")
</pallas_src>

<mosaic_0001>
module attributes {stable_mosaic.version = 11 : i64} {
  func.func @kernel(%arg0: i32, %arg1: memref<32x128xf32, #tpu.memory_space<vmem>>, %arg2: memref<1x128xf32, #tpu.memory_space<vmem>>, %arg3: memref<128x256xf32, #tpu.memory_space<vmem>>, %arg4: memref<1x256xf32, #tpu.memory_space<vmem>>, %arg5: memref<256x384xf32, #tpu.memory_space<vmem>>, %arg6: memref<1x384xf32, #tpu.memory_space<vmem>>, %arg7: memref<384x128xf32, #tpu.memory_space<vmem>>, %arg8: memref<32x384xf32, #tpu.memory_space<vmem>>, %arg9: memref<32x128xf32, #tpu.memory_space<vmem>>) attributes {dimension_semantics = [#tpu.dimension_semantics<parallel>], iteration_bounds = array<i64: 2>, scalar_prefetch = 0 : i64, scratch_operands = 0 : i64, tpu.core_type = #tpu.core_type<tc>, window_params = [{transform_indices = @transform_0, window_bounds = array<i64: 32, 128>}, {pipeline_mode = #tpu.pipeline_mode<synchronous>, transform_indices = @transform_1, window_bounds = array<i64: 1, 128>}, {pipeline_mode = #tpu.pipeline_mode<synchronous>, transform_indices = @transform_2, window_bounds = array<i64: 128, 256>}, {pipeline_mode = #tpu.pipeline_mode<synchronous>, transform_indices = @transform_3, window_bounds = array<i64: 1, 256>}, {pipeline_mode = #tpu.pipeline_mode<synchronous>, transform_indices = @transform_4, window_bounds = array<i64: 256, 384>}, {pipeline_mode = #tpu.pipeline_mode<synchronous>, transform_indices = @transform_5, window_bounds = array<i64: 1, 384>}, {pipeline_mode = #tpu.pipeline_mode<synchronous>, transform_indices = @transform_6, window_bounds = array<i64: 384, 128>}, {transform_indices = @transform_7, window_bounds = array<i64: 32, 384>}, {transform_indices = @transform_8, window_bounds = array<i64: 32, 128>}]} {
    %c0 = arith.constant 0 : index
    %c0_0 = arith.constant 0 : index
    %0 = vector.load %arg1[%c0, %c0_0] : memref<32x128xf32, #tpu.memory_space<vmem>>, vector<32x128xf32>
    %c0_1 = arith.constant 0 : index
    %c0_2 = arith.constant 0 : index
    %1 = vector.load %arg3[%c0_1, %c0_2] : memref<128x256xf32, #tpu.memory_space<vmem>>, vector<128x256xf32>
    %c0_3 = arith.constant 0 : index
    %c0_4 = arith.constant 0 : index
    %2 = vector.load %arg4[%c0_3, %c0_4] : memref<1x256xf32, #tpu.memory_space<vmem>>, vector<1x256xf32>
    %cst = arith.constant dense<0.000000e+00> : vector<32x256xf32>
    %3 = tpu.matmul %0, %1, %cst {dimension_numbers = #tpu.dot_dimension_numbers<[1], [0], [0], [1], [0, 0, 1, 1], [], []>} : vector<32x128xf32>, vector<128x256xf32>, vector<32x256xf32> -> vector<32x256xf32>
    %4 = vector.broadcast %2 : vector<1x256xf32> to vector<32x256xf32>
    %5 = arith.addf %3, %4 : vector<32x256xf32>
    %cst_5 = arith.constant 0.000000e+00 : f32
    %6 = vector.broadcast %cst_5 : f32 to vector<32x256xf32>
    %7 = arith.maximumf %5, %6 : vector<32x256xf32>
    %c0_6 = arith.constant 0 : index
    %c0_7 = arith.constant 0 : index
    %8 = vector.load %arg5[%c0_6, %c0_7] : memref<256x384xf32, #tpu.memory_space<vmem>>, vector<256x384xf32>
    %c0_8 = arith.constant 0 : index
    %c0_9 = arith.constant 0 : index
    %9 = vector.load %arg6[%c0_8, %c0_9] : memref<1x384xf32, #tpu.memory_space<vmem>>, vector<1x384xf32>
    %cst_10 = arith.constant dense<0.000000e+00> : vector<32x384xf32>
    %10 = tpu.matmul %7, %8, %cst_10 {dimension_numbers = #tpu.dot_dimension_numbers<[1], [0], [0], [1], [0, 0, 1, 1], [], []>} : vector<32x256xf32>, vector<256x384xf32>, vector<32x384xf32> -> vector<32x384xf32>
    %11 = vector.broadcast %9 : vector<1x384xf32> to vector<32x384xf32>
    %12 = arith.addf %10, %11 : vector<32x384xf32>
    %13 = tpu.iota {dimensions = array<i32: 1>} : vector<32x384xi32>
    %cst_11 = arith.constant 0.000000e+00 : f32
    %14 = vector.broadcast %cst_11 : f32 to vector<32x384xf32>
    %c384_i32 = arith.constant 384 : i32
    %c0_i32 = arith.constant 0 : i32
    %cst_12 = arith.constant dense<0xFF800000> : vector<32xf32>
    %15 = vector.multi_reduction <maximumf>, %12, %cst_12 [1] : vector<32x384xf32> to vector<32xf32>
    %16 = vector.shape_cast %15 : vector<32xf32> to vector<32x1xf32>
    %17 = vector.broadcast %16 : vector<32x1xf32> to vector<32x384xf32>
    %18 = arith.cmpf oeq, %12, %17 : vector<32x384xf32>
    %19 = vector.broadcast %c384_i32 : i32 to vector<32x384xi32>
    %20 = arith.select %18, %13, %19 : vector<32x384xi1>, vector<32x384xi32>
    %cst_13 = arith.constant dense<2147483647> : vector<32xi32>
    %21 = vector.multi_reduction <minsi>, %20, %cst_13 [1] : vector<32x384xi32> to vector<32xi32>
    %22 = vector.shape_cast %21 : vector<32xi32> to vector<32x1xi32>
    %23 = vector.broadcast %22 : vector<32x1xi32> to vector<32x384xi32>
    %24 = arith.cmpi eq, %13, %23 : vector<32x384xi32>
    %cst_14 = arith.constant 0.000000e+00 : f32
    %25 = vector.broadcast %cst_14 : f32 to vector<32x1xf32>
    %26 = arith.maximumf %16, %25 : vector<32x1xf32>
    %27 = vector.shape_cast %26 : vector<32x1xf32> to vector<32x1xf32>
    %28 = vector.broadcast %27 : vector<32x1xf32> to vector<32x384xf32>
    %29 = arith.select %24, %28, %14 : vector<32x384xi1>, vector<32x384xf32>
    %cst_15 = arith.constant 0xFF800000 : f32
    %30 = vector.broadcast %cst_15 : f32 to vector<32x384xf32>
    %31 = arith.select %24, %30, %12 : vector<32x384xi1>, vector<32x384xf32>
    %c1_i32 = arith.constant 1 : i32
    %cst_16 = arith.constant dense<0xFF800000> : vector<32xf32>
    %32 = vector.multi_reduction <maximumf>, %31, %cst_16 [1] : vector<32x384xf32> to vector<32xf32>
    %33 = vector.shape_cast %32 : vector<32xf32> to vector<32x1xf32>
    %34 = vector.broadcast %33 : vector<32x1xf32> to vector<32x384xf32>
    %35 = arith.cmpf oeq, %31, %34 : vector<32x384xf32>
    %36 = vector.broadcast %c384_i32 : i32 to vector<32x384xi32>
    %37 = arith.select %35, %13, %36 : vector<32x384xi1>, vector<32x384xi32>
    %cst_17 = arith.constant dense<2147483647> : vector<32xi32>
    %38 = vector.multi_reduction <minsi>, %37, %cst_17 [1] : vector<32x384xi32> to vector<32xi32>
    %39 = vector.shape_cast %38 : vector<32xi32> to vector<32x1xi32>
    %40 = vector.broadcast %39 : vector<32x1xi32> to vector<32x384xi32>
    %41 = arith.cmpi eq, %13, %40 : vector<32x384xi32>
    %cst_18 = arith.constant 0.000000e+00 : f32
    %42 = vector.broadcast %cst_18 : f32 to vector<32x1xf32>
    %43 = arith.maximumf %33, %42 : vector<32x1xf32>
    %44 = vector.shape_cast %43 : vector<32x1xf32> to vector<32x1xf32>
    %45 = vector.broadcast %44 : vector<32x1xf32> to vector<32x384xf32>
    %46 = arith.select %41, %45, %29 : vector<32x384xi1>, vector<32x384xf32>
    %cst_19 = arith.constant 0xFF800000 : f32
    %47 = vector.broadcast %cst_19 : f32 to vector<32x384xf32>
    %48 = arith.select %41, %47, %31 : vector<32x384xi1>, vector<32x384xf32>
    %c2_i32 = arith.constant 2 : i32
    %cst_20 = arith.constant dense<0xFF800000> : vector<32xf32>
    %49 = vector.multi_reduction <maximumf>, %48, %cst_20 [1] : vector<32x384xf32> to vector<32xf32>
    %50 = vector.shape_cast %49 : vector<32xf32> to vector<32x1xf32>
    %51 = vector.broadcast %50 : vector<32x1xf32> to vector<32x384xf32>
    %52 = arith.cmpf oeq, %48, %51 : vector<32x384xf32>
    %53 = vector.broadcast %c384_i32 : i32 to vector<32x384xi32>
    %54 = arith.select %52, %13, %53 : vector<32x384xi1>, vector<32x384xi32>
    %cst_21 = arith.constant dense<2147483647> : vector<32xi32>
    %55 = vector.multi_reduction <minsi>, %54, %cst_21 [1] : vector<32x384xi32> to vector<32xi32>
    %56 = vector.shape_cast %55 : vector<32xi32> to vector<32x1xi32>
    %57 = vector.broadcast %56 : vector<32x1xi32> to vector<32x384xi32>
    %58 = arith.cmpi eq, %13, %57 : vector<32x384xi32>
    %cst_22 = arith.constant 0.000000e+00 : f32
    %59 = vector.broadcast %cst_22 : f32 to vector<32x1xf32>
    %60 = arith.maximumf %50, %59 : vector<32x1xf32>
    %61 = vector.shape_cast %60 : vector<32x1xf32> to vector<32x1xf32>
    %62 = vector.broadcast %61 : vector<32x1xf32> to vector<32x384xf32>
    %63 = arith.select %58, %62, %46 : vector<32x384xi1>, vector<32x384xf32>
    %cst_23 = arith.constant 0xFF800000 : f32
    %64 = vector.broadcast %cst_23 : f32 to vector<32x384xf32>
    %65 = arith.select %58, %64, %48 : vector<32x384xi1>, vector<32x384xf32>
    %c3_i32 = arith.constant 3 : i32
    %cst_24 = arith.constant dense<0xFF800000> : vector<32xf32>
    %66 = vector.multi_reduction <maximumf>, %65, %cst_24 [1] : vector<32x384xf32> to vector<32xf32>
    %67 = vector.shape_cast %66 : vector<32xf32> to vector<32x1xf32>
    %68 = vector.broadcast %67 : vector<32x1xf32> to vector<32x384xf32>
    %69 = arith.cmpf oeq, %65, %68 : vector<32x384xf32>
    %70 = vector.broadcast %c384_i32 : i32 to vector<32x384xi32>
    %71 = arith.select %69, %13, %70 : vector<32x384xi1>, vector<32x384xi32>
    %cst_25 = arith.constant dense<2147483647> : vector<32xi32>
    %72 = vector.multi_reduction <minsi>, %71, %cst_25 [1] : vector<32x384xi32> to vector<32xi32>
    %73 = vector.shape_cast %72 : vector<32xi32> to vector<32x1xi32>
    %74 = vector.broadcast %73 : vector<32x1xi32> to vector<32x384xi32>
    %75 = arith.cmpi eq, %13, %74 : vector<32x384xi32>
    %cst_26 = arith.constant 0.000000e+00 : f32
    %76 = vector.broadcast %cst_26 : f32 to vector<32x1xf32>
    %77 = arith.maximumf %67, %76 : vector<32x1xf32>
    %78 = vector.shape_cast %77 : vector<32x1xf32> to vector<32x1xf32>
    %79 = vector.broadcast %78 : vector<32x1xf32> to vector<32x384xf32>
    %80 = arith.select %75, %79, %63 : vector<32x384xi1>, vector<32x384xf32>
    %cst_27 = arith.constant 0xFF800000 : f32
    %81 = vector.broadcast %cst_27 : f32 to vector<32x384xf32>
    %82 = arith.select %75, %81, %65 : vector<32x384xi1>, vector<32x384xf32>
    %c0_28 = arith.constant 0 : index
    %c0_29 = arith.constant 0 : index
    %83 = vector.load %arg8[%c0_28, %c0_29] : memref<32x384xf32, #tpu.memory_space<vmem>>, vector<32x384xf32>
    tpu.vector_store %arg8[%c0_28, %c0_29], %80 {strides = array<i32>} : memref<32x384xf32, #tpu.memory_space<vmem>>, vector<32x384xf32>,
    %c0_30 = arith.constant 0 : index
    %c0_31 = arith.constant 0 : index
    %84 = vector.load %arg7[%c0_30, %c0_31] : memref<384x128xf32, #tpu.memory_space<vmem>>, vector<384x128xf32>
    %cst_32 = arith.constant dense<0.000000e+00> : vector<32x128xf32>
    %85 = tpu.matmul %80, %84, %cst_32 {dimension_numbers = #tpu.dot_dimension_numbers<[1], [0], [0], [1], [0, 0, 1, 1], [], []>} : vector<32x384xf32>, vector<384x128xf32>, vector<32x128xf32> -> vector<32x128xf32>
    %c0_33 = arith.constant 0 : index
    %c0_34 = arith.constant 0 : index
    %86 = vector.load %arg2[%c0_33, %c0_34] : memref<1x128xf32, #tpu.memory_space<vmem>>, vector<1x128xf32>
    %87 = vector.broadcast %86 : vector<1x128xf32> to vector<32x128xf32>
    %88 = arith.addf %85, %87 : vector<32x128xf32>
    %c0_35 = arith.constant 0 : index
    %c0_36 = arith.constant 0 : index
    %89 = vector.load %arg9[%c0_35, %c0_36] : memref<32x128xf32, #tpu.memory_space<vmem>>, vector<32x128xf32>
    tpu.vector_store %arg9[%c0_35, %c0_36], %88 {strides = array<i32>} : memref<32x128xf32, #tpu.memory_space<vmem>>, vector<32x128xf32>,
    return
  }
  func.func @transform_0(%arg0: i32) -> (i32, i32) {
    %c0_i32 = arith.constant 0 : i32
    %c0_i32_0 = arith.constant 0 : i32
    return %arg0, %c0_i32 : i32, i32
  }
  func.func @transform_1(%arg0: i32) -> (i32, i32) {
    %c0_i32 = arith.constant 0 : i32
    %c0_i32_0 = arith.constant 0 : i32
    %c0_i32_1 = arith.constant 0 : i32
    return %c0_i32, %c0_i32_0 : i32, i32
  }
  func.func @transform_2(%arg0: i32) -> (i32, i32) {
    %c0_i32 = arith.constant 0 : i32
    %c0_i32_0 = arith.constant 0 : i32
    %c0_i32_1 = arith.constant 0 : i32
    return %c0_i32, %c0_i32_0 : i32, i32
  }
  func.func @transform_3(%arg0: i32) -> (i32, i32) {
    %c0_i32 = arith.constant 0 : i32
    %c0_i32_0 = arith.constant 0 : i32
    %c0_i32_1 = arith.constant 0 : i32
    return %c0_i32, %c0_i32_0 : i32, i32
  }
  func.func @transform_4(%arg0: i32) -> (i32, i32) {
    %c0_i32 = arith.constant 0 : i32
    %c0_i32_0 = arith.constant 0 : i32
    %c0_i32_1 = arith.constant 0 : i32
    return %c0_i32, %c0_i32_0 : i32, i32
  }
  func.func @transform_5(%arg0: i32) -> (i32, i32) {
    %c0_i32 = arith.constant 0 : i32
    %c0_i32_0 = arith.constant 0 : i32
    %c0_i32_1 = arith.constant 0 : i32
    return %c0_i32, %c0_i32_0 : i32, i32
  }
  func.func @transform_6(%arg0: i32) -> (i32, i32) {
    %c0_i32 = arith.constant 0 : i32
    %c0_i32_0 = arith.constant 0 : i32
    %c0_i32_1 = arith.constant 0 : i32
    return %c0_i32, %c0_i32_0 : i32, i32
  }
  func.func @transform_7(%arg0: i32) -> (i32, i32) {
    %c0_i32 = arith.constant 0 : i32
    %c0_i32_0 = arith.constant 0 : i32
    return %arg0, %c0_i32 : i32, i32
  }
  func.func @transform_8(%arg0: i32) -> (i32, i32) {
    %c0_i32 = arith.constant 0 : i32
    %c0_i32_0 = arith.constant 0 : i32
    return %arg0, %c0_i32 : i32, i32
  }
}

module attributes {stable_mosaic.version = 11 : i64} {
  func.func @kernel(%arg0: i32, %arg1: memref<32x128xf32, #tpu.memory_space<vmem>>, %arg2: memref<1x128xf32, #tpu.memory_space<vmem>>, %arg3: memref<128x256xf32, #tpu.memory_space<vmem>>, %arg4: memref<1x256xf32, #tpu.memory_space<vmem>>, %arg5: memref<256x384xf32, #tpu.memory_space<vmem>>, %arg6: memref<1x384xf32, #tpu.memory_space<vmem>>, %arg7: memref<384x128xf32, #tpu.memory_space<vmem>>, %arg8: memref<32x384xf32, #tpu.memory_space<vmem>>, %arg9: memref<32x128xf32, #tpu.memory_space<vmem>>) attributes {dimension_semantics = [#tpu.dimension_semantics<parallel>], iteration_bounds = array<i64: 2>, scalar_prefetch = 0 : i64, scratch_operands = 0 : i64, tpu.core_type = #tpu.core_type<tc>, window_params = [{transform_indices = @transform_0, window_bounds = array<i64: 32, 128>}, {pipeline_mode = #tpu.pipeline_mode<synchronous>, transform_indices = @transform_1, window_bounds = array<i64: 1, 128>}, {pipeline_mode = #tpu.pipeline_mode<synchronous>, transform_indices = @transform_2, window_bounds = array<i64: 128, 256>}, {pipeline_mode = #tpu.pipeline_mode<synchronous>, transform_indices = @transform_3, window_bounds = array<i64: 1, 256>}, {pipeline_mode = #tpu.pipeline_mode<synchronous>, transform_indices = @transform_4, window_bounds = array<i64: 256, 384>}, {pipeline_mode = #tpu.pipeline_mode<synchronous>, transform_indices = @transform_5, window_bounds = array<i64: 1, 384>}, {pipeline_mode = #tpu.pipeline_mode<synchronous>, transform_indices = @transform_6, window_bounds = array<i64: 384, 128>}, {transform_indices = @transform_7, window_bounds = array<i64: 32, 384>}, {transform_indices = @transform_8, window_bounds = array<i64: 32, 128>}]} {
    %c0 = arith.constant 0 : index
    %c0_0 = arith.constant 0 : index
    %0 = vector.load %arg1[%c0, %c0_0] : memref<32x128xf32, #tpu.memory_space<vmem>>, vector<32x128xf32>
    %c0_1 = arith.constant 0 : index
    %c0_2 = arith.constant 0 : index
    %1 = vector.load %arg3[%c0_1, %c0_2] : memref<128x256xf32, #tpu.memory_space<vmem>>, vector<128x256xf32>
    %c0_3 = arith.constant 0 : index
    %c0_4 = arith.constant 0 : index
    %2 = vector.load %arg4[%c0_3, %c0_4] : memref<1x256xf32, #tpu.memory_space<vmem>>, vector<1x256xf32>
    %cst = arith.constant dense<0.000000e+00> : vector<32x256xf32>
    %3 = tpu.matmul %0, %1, %cst {dimension_numbers = #tpu.dot_dimension_numbers<[1], [0], [0], [1], [0, 0, 1, 1], [], []>} : vector<32x128xf32>, vector<128x256xf32>, vector<32x256xf32> -> vector<32x256xf32>
    %4 = vector.broadcast %2 : vector<1x256xf32> to vector<32x256xf32>
    %5 = arith.addf %3, %4 : vector<32x256xf32>
    %cst_5 = arith.constant 0.000000e+00 : f32
    %6 = vector.broadcast %cst_5 : f32 to vector<32x256xf32>
    %7 = arith.maximumf %5, %6 : vector<32x256xf32>
    %c0_6 = arith.constant 0 : index
    %c0_7 = arith.constant 0 : index
    %8 = vector.load %arg5[%c0_6, %c0_7] : memref<256x384xf32, #tpu.memory_space<vmem>>, vector<256x384xf32>
    %c0_8 = arith.constant 0 : index
    %c0_9 = arith.constant 0 : index
    %9 = vector.load %arg6[%c0_8, %c0_9] : memref<1x384xf32, #tpu.memory_space<vmem>>, vector<1x384xf32>
    %cst_10 = arith.constant dense<0.000000e+00> : vector<32x384xf32>
    %10 = tpu.matmul %7, %8, %cst_10 {dimension_numbers = #tpu.dot_dimension_numbers<[1], [0], [0], [1], [0, 0, 1, 1], [], []>} : vector<32x256xf32>, vector<256x384xf32>, vector<32x384xf32> -> vector<32x384xf32>
    %11 = vector.broadcast %9 : vector<1x384xf32> to vector<32x384xf32>
    %12 = arith.addf %10, %11 : vector<32x384xf32>
    %13 = tpu.iota {dimensions = array<i32: 1>} : vector<32x384xi32>
    %cst_11 = arith.constant 0.000000e+00 : f32
    %14 = vector.broadcast %cst_11 : f32 to vector<32x384xf32>
    %c384_i32 = arith.constant 384 : i32
    %c0_i32 = arith.constant 0 : i32
    %cst_12 = arith.constant dense<0xFF800000> : vector<32xf32>
    %15 = vector.multi_reduction <maximumf>, %12, %cst_12 [1] : vector<32x384xf32> to vector<32xf32>
    %16 = vector.shape_cast %15 : vector<32xf32> to vector<32x1xf32>
    %17 = vector.broadcast %16 : vector<32x1xf32> to vector<32x384xf32>
    %18 = arith.cmpf oeq, %12, %17 : vector<32x384xf32>
    %19 = vector.broadcast %c384_i32 : i32 to vector<32x384xi32>
    %20 = arith.select %18, %13, %19 : vector<32x384xi1>, vector<32x384xi32>
    %cst_13 = arith.constant dense<2147483647> : vector<32xi32>
    %21 = vector.multi_reduction <minsi>, %20, %cst_13 [1] : vector<32x384xi32> to vector<32xi32>
    %22 = vector.shape_cast %21 : vector<32xi32> to vector<32x1xi32>
    %23 = vector.broadcast %22 : vector<32x1xi32> to vector<32x384xi32>
    %24 = arith.cmpi eq, %13, %23 : vector<32x384xi32>
    %cst_14 = arith.constant 0.000000e+00 : f32
    %25 = vector.broadcast %cst_14 : f32 to vector<32x1xf32>
    %26 = arith.maximumf %16, %25 : vector<32x1xf32>
    %27 = vector.shape_cast %26 : vector<32x1xf32> to vector<32x1xf32>
    %28 = vector.broadcast %27 : vector<32x1xf32> to vector<32x384xf32>
    %29 = arith.select %24, %28, %14 : vector<32x384xi1>, vector<32x384xf32>
    %cst_15 = arith.constant 0xFF800000 : f32
    %30 = vector.broadcast %cst_15 : f32 to vector<32x384xf32>
    %31 = arith.select %24, %30, %12 : vector<32x384xi1>, vector<32x384xf32>
    %c1_i32 = arith.constant 1 : i32
    %cst_16 = arith.constant dense<0xFF800000> : vector<32xf32>
    %32 = vector.multi_reduction <maximumf>, %31, %cst_16 [1] : vector<32x384xf32> to vector<32xf32>
    %33 = vector.shape_cast %32 : vector<32xf32> to vector<32x1xf32>
    %34 = vector.broadcast %33 : vector<32x1xf32> to vector<32x384xf32>
    %35 = arith.cmpf oeq, %31, %34 : vector<32x384xf32>
    %36 = vector.broadcast %c384_i32 : i32 to vector<32x384xi32>
    %37 = arith.select %35, %13, %36 : vector<32x384xi1>, vector<32x384xi32>
    %cst_17 = arith.constant dense<2147483647> : vector<32xi32>
    %38 = vector.multi_reduction <minsi>, %37, %cst_17 [1] : vector<32x384xi32> to vector<32xi32>
    %39 = vector.shape_cast %38 : vector<32xi32> to vector<32x1xi32>
    %40 = vector.broadcast %39 : vector<32x1xi32> to vector<32x384xi32>
    %41 = arith.cmpi eq, %13, %40 : vector<32x384xi32>
    %cst_18 = arith.constant 0.000000e+00 : f32
    %42 = vector.broadcast %cst_18 : f32 to vector<32x1xf32>
    %43 = arith.maximumf %33, %42 : vector<32x1xf32>
    %44 = vector.shape_cast %43 : vector<32x1xf32> to vector<32x1xf32>
    %45 = vector.broadcast %44 : vector<32x1xf32> to vector<32x384xf32>
    %46 = arith.select %41, %45, %29 : vector<32x384xi1>, vector<32x384xf32>
    %cst_19 = arith.constant 0xFF800000 : f32
    %47 = vector.broadcast %cst_19 : f32 to vector<32x384xf32>
    %48 = arith.select %41, %47, %31 : vector<32x384xi1>, vector<32x384xf32>
    %c2_i32 = arith.constant 2 : i32
    %cst_20 = arith.constant dense<0xFF800000> : vector<32xf32>
    %49 = vector.multi_reduction <maximumf>, %48, %cst_20 [1] : vector<32x384xf32> to vector<32xf32>
    %50 = vector.shape_cast %49 : vector<32xf32> to vector<32x1xf32>
    %51 = vector.broadcast %50 : vector<32x1xf32> to vector<32x384xf32>
    %52 = arith.cmpf oeq, %48, %51 : vector<32x384xf32>
    %53 = vector.broadcast %c384_i32 : i32 to vector<32x384xi32>
    %54 = arith.select %52, %13, %53 : vector<32x384xi1>, vector<32x384xi32>
    %cst_21 = arith.constant dense<2147483647> : vector<32xi32>
    %55 = vector.multi_reduction <minsi>, %54, %cst_21 [1] : vector<32x384xi32> to vector<32xi32>
    %56 = vector.shape_cast %55 : vector<32xi32> to vector<32x1xi32>
    %57 = vector.broadcast %56 : vector<32x1xi32> to vector<32x384xi32>
    %58 = arith.cmpi eq, %13, %57 : vector<32x384xi32>
    %cst_22 = arith.constant 0.000000e+00 : f32
    %59 = vector.broadcast %cst_22 : f32 to vector<32x1xf32>
    %60 = arith.maximumf %50, %59 : vector<32x1xf32>
    %61 = vector.shape_cast %60 : vector<32x1xf32> to vector<32x1xf32>
    %62 = vector.broadcast %61 : vector<32x1xf32> to vector<32x384xf32>
    %63 = arith.select %58, %62, %46 : vector<32x384xi1>, vector<32x384xf32>
    %cst_23 = arith.constant 0xFF800000 : f32
    %64 = vector.broadcast %cst_23 : f32 to vector<32x384xf32>
    %65 = arith.select %58, %64, %48 : vector<32x384xi1>, vector<32x384xf32>
    %c3_i32 = arith.constant 3 : i32
    %cst_24 = arith.constant dense<0xFF800000> : vector<32xf32>
    %66 = vector.multi_reduction <maximumf>, %65, %cst_24 [1] : vector<32x384xf32> to vector<32xf32>
    %67 = vector.shape_cast %66 : vector<32xf32> to vector<32x1xf32>
    %68 = vector.broadcast %67 : vector<32x1xf32> to vector<32x384xf32>
    %69 = arith.cmpf oeq, %65, %68 : vector<32x384xf32>
    %70 = vector.broadcast %c384_i32 : i32 to vector<32x384xi32>
    %71 = arith.select %69, %13, %70 : vector<32x384xi1>, vector<32x384xi32>
    %cst_25 = arith.constant dense<2147483647> : vector<32xi32>
    %72 = vector.multi_reduction <minsi>, %71, %cst_25 [1] : vector<32x384xi32> to vector<32xi32>
    %73 = vector.shape_cast %72 : vector<32xi32> to vector<32x1xi32>
    %74 = vector.broadcast %73 : vector<32x1xi32> to vector<32x384xi32>
    %75 = arith.cmpi eq, %13, %74 : vector<32x384xi32>
    %cst_26 = arith.constant 0.000000e+00 : f32
    %76 = vector.broadcast %cst_26 : f32 to vector<32x1xf32>
    %77 = arith.maximumf %67, %76 : vector<32x1xf32>
    %78 = vector.shape_cast %77 : vector<32x1xf32> to vector<32x1xf32>
    %79 = vector.broadcast %78 : vector<32x1xf32> to vector<32x384xf32>
    %80 = arith.select %75, %79, %63 : vector<32x384xi1>, vector<32x384xf32>
    %cst_27 = arith.constant 0xFF800000 : f32
    %81 = vector.broadcast %cst_27 : f32 to vector<32x384xf32>
    %82 = arith.select %75, %81, %65 : vector<32x384xi1>, vector<32x384xf32>
    %c0_28 = arith.constant 0 : index
    %c0_29 = arith.constant 0 : index
    %83 = vector.load %arg8[%c0_28, %c0_29] : memref<32x384xf32, #tpu.memory_space<vmem>>, vector<32x384xf32>
    tpu.vector_store %arg8[%c0_28, %c0_29], %80 {strides = array<i32>} : memref<32x384xf32, #tpu.memory_space<vmem>>, vector<32x384xf32>,
    %c0_30 = arith.constant 0 : index
    %c0_31 = arith.constant 0 : index
    %84 = vector.load %arg7[%c0_30, %c0_31] : memref<384x128xf32, #tpu.memory_space<vmem>>, vector<384x128xf32>
    %cst_32 = arith.constant dense<0.000000e+00> : vector<32x128xf32>
    %85 = tpu.matmul %80, %84, %cst_32 {dimension_numbers = #tpu.dot_dimension_numbers<[1], [0], [0], [1], [0, 0, 1, 1], [], []>} : vector<32x384xf32>, vector<384x128xf32>, vector<32x128xf32> -> vector<32x128xf32>
    %c0_33 = arith.constant 0 : index
    %c0_34 = arith.constant 0 : index
    %86 = vector.load %arg2[%c0_33, %c0_34] : memref<1x128xf32, #tpu.memory_space<vmem>>, vector<1x128xf32>
    %87 = vector.broadcast %86 : vector<1x128xf32> to vector<32x128xf32>
    %88 = arith.addf %85, %87 : vector<32x128xf32>
    %c0_35 = arith.constant 0 : index
    %c0_36 = arith.constant 0 : index
    %89 = vector.load %arg9[%c0_35, %c0_36] : memref<32x128xf32, #tpu.memory_space<vmem>>, vector<32x128xf32>
    tpu.vector_store %arg9[%c0_35, %c0_36], %88 {strides = array<i32>} : memref<32x128xf32, #tpu.memory_space<vmem>>, vector<32x128xf32>,
    return
  }
  func.func @transform_0(%arg0: i32) -> (i32, i32) {
    %c0_i32 = arith.constant 0 : i32
    %c0_i32_0 = arith.constant 0 : i32
    return %arg0, %c0_i32 : i32, i32
  }
  func.func @transform_1(%arg0: i32) -> (i32, i32) {
    %c0_i32 = arith.constant 0 : i32
    %c0_i32_0 = arith.constant 0 : i32
    %c0_i32_1 = arith.constant 0 : i32
    return %c0_i32, %c0_i32_0 : i32, i32
  }
  func.func @transform_2(%arg0: i32) -> (i32, i32) {
    %c0_i32 = arith.constant 0 : i32
    %c0_i32_0 = arith.constant 0 : i32
    %c0_i32_1 = arith.constant 0 : i32
    return %c0_i32, %c0_i32_0 : i32, i32
  }
  func.func @transform_3(%arg0: i32) -> (i32, i32) {
    %c0_i32 = arith.constant 0 : i32
    %c0_i32_0 = arith.constant 0 : i32
    %c0_i32_1 = arith.constant 0 : i32
    return %c0_i32, %c0_i32_0 : i32, i32
  }
  func.func @transform_4(%arg0: i32) -> (i32, i32) {
    %c0_i32 = arith.constant 0 : i32
    %c0_i32_0 = arith.constant 0 : i32
    %c0_i32_1 = arith.constant 0 : i32
    return %c0_i32, %c0_i32_0 : i32, i32
  }
  func.func @transform_5(%arg0: i32) -> (i32, i32) {
    %c0_i32 = arith.constant 0 : i32
    %c0_i32_0 = arith.constant 0 : i32
    %c0_i32_1 = arith.constant 0 : i32
    return %c0_i32, %c0_i32_0 : i32, i32
  }
  func.func @transform_6(%arg0: i32) -> (i32, i32) {
    %c0_i32 = arith.constant 0 : i32
    %c0_i32_0 = arith.constant 0 : i32
    %c0_i32_1 = arith.constant 0 : i32
    return %c0_i32, %c0_i32_0 : i32, i32
  }
  func.func @transform_7(%arg0: i32) -> (i32, i32) {
    %c0_i32 = arith.constant 0 : i32
    %c0_i32_0 = arith.constant 0 : i32
    return %arg0, %c0_i32 : i32, i32
  }
  func.func @transform_8(%arg0: i32) -> (i32, i32) {
    %c0_i32 = arith.constant 0 : i32
    %c0_i32_0 = arith.constant 0 : i32
    return %arg0, %c0_i32 : i32, i32
  }
}

</mosaic_0001>

<bundles_post_ra>
// kernel: tpu_custom_call.1
= control target key start
LH: loop header
LB: loop body
LE: loop exit
PB: predicated region body
PF: predicated region fallthrough
CT: control target
= control target key end

     0   :  { %s3471_s0 = inlined_call_operand.hbm [shape: f32[64,128], index: 0, kind: input, shape index: {}]   ;;  %s3472_s1 = inlined_call_operand.vmem [shape: f32[1,128], index: 1, kind: input, shape index: {}]   ;;  %s3473_s2 = inlined_call_operand.hbm [shape: f32[128,256], index: 2, kind: input, shape index: {}]   ;;  %s3474_s3 = inlined_call_operand.vmem [shape: f32[1,256], index: 3, kind: input, shape index: {}]   ;;  %s3475_s4 = inlined_call_operand.hbm [shape: f32[256,384], index: 4, kind: input, shape index: {}]   ;;  %s3476_s5 = inlined_call_operand.vmem [shape: f32[1,384], index: 5, kind: input, shape index: {}]   ;;  %s3477_s6 = inlined_call_operand.hbm [shape: f32[384,128], index: 6, kind: input, shape index: {}]   ;;  %s3478_s7 = inlined_call_operand.hbm [shape: f32[64,384], index: 7, kind: output, shape index: {0}]   ;;  %s3479_s8 = inlined_call_operand.hbm [shape: f32[64,128], index: 8, kind: output, shape index: {1}]  }
   0x1   :  { %3484 = sst [smem:[#allocation19_spill]] %s3473_s2 }
   0x2   :  { %14 = vsyncpa [#allocation3], 0 }
   0x3   :  { %16 = vsyncpa [#allocation3 + $0x1], 0 }
   0x4   :  { %17 = vsyncpa [#allocation6], 0 }
   0x5   :  { %18 = vsyncpa [#allocation9], 0 }
   0x6   :  { %19 = vsyncpa [#allocation4], 0 }
   0x7   :  { %21 = vsyncpa [#allocation4 + $0x1], 0 }
   0x8   :  { %22 = vsyncpa [#allocation12], 0 }
   0x9   :  { %24 = vsyncpa [#allocation12 + $0x1], 0  ;;  %s2568_s27 = smov 0   ;;  %s2570_s28 = smov 0  }
   0xa   :  { %s2572_s29 = smov 0   ;;  %s2574_s30 = smov 0  }
   0xb LB: > { %s2589_s9 = sadd.s32 4294967295, %s2504_s30   ;;  %s1825_s10 = sadd.s32 4294967294, %s2504_s30   ;;  %s2504_s30 = sphi %s2574_s30, %s3507_s30   ;;  %s2500_s29 = sphi %s2572_s29, %s3506_s29   ;;  %s2496_s28 = sphi %s2570_s28, %s3505_s28   ;;  %s2492_s27 = sphi %s2568_s27, %s3504_s27  }
   0xc   : > { %p50_p0 = scmp.ne.s32.totalorder %s2496_s28, %s2492_s27  ;;  %p3480_p1 = scmp.eq.s32.totalorder %s2589_s9, 0 }
   0xd   : > { %p206_p3 = scmp.eq.s32.totalorder %s1825_s10, 1  ;;  %p1826_p5 = scmp.ge.s32.totalorder %s2504_s30, 1 }
   0xe   : > { %p2598_p4 = por %p3480_p1, %p50_p0  ;;  %p239_p7 = scmp.lt.s32.totalorder %s2504_s30, 3 }
   0xf   : > { %p2603_p6 = por %p206_p3, %p50_p0  ;;  %s2506_s14 = smov [#allocation5]  }
  0x10   : > { %s3485_s11 = scalar_select %p2598_p4, 1, 0 }
  0x11   : > { %s3486_s12 = scalar_select %p2603_p6, 1, 0 }
  0x12   : > { %p2608_p8 = pnand %p1826_p5, %p239_p7  ;;  %s254_s15 = sshll.u32 %s2506_s14, 4  ;;  %s2612_s15 = int_to_ptr.vmem [resolvable:$true] %s254_s15 }
  0x13   : > { %3487 = sst [smem:[#allocation18_spill]] %s3486_s12  ;;  %s2507_s17 = smov [#allocation7]  }
  0x14   : > { %s3488_s13 = scalar_select %p2608_p8, 1, 0 }
  0x15   : > { %p2209_p9 = pneg %p2608_p8  ;;  %s270_s18 = sshll.u32 %s2507_s17, 4  ;;  %s2623_s18 = int_to_ptr.vmem [resolvable:$true] %s270_s18 }
  0x16   : > { %s3490_s2 = sld [smem:[#allocation19_spill]] }
  0x17   : > { %p2619_p11 = pnand %p2209_p9, %p3480_p1 }
  0x19   : > { %p2633_p13 = pneg %p2619_p11 }
  0x1c   : > { %s2284_s21 = scalar_lea.hbm %s3490_s2, 4096 }
  0x1d   : > { %p2285_p12 = scmp.ne.s32.totalorder %s3490_s2, %s2284_s21  ;;  %p2291_p5 = scmp.lt.u32.totalorder %s2284_s21, %s3490_s2 }
  0x1f   : > { %p2287_p0 = pnand %p2633_p13, %p2285_p12 }
  0x21   : > { %p2288_p3 = pneg %p2287_p0 }
  0x23   : > { %p2293_p7 = pnand %p2291_p5, %p2288_p3 }
  0x25   : > { %2296 = shalt.err (!%p2293_p7)
}
  0x26   : > { %s2297_s10 = scalar_lea.vmem %s2612_s15, 4096  ;;  %p2305_p2 = scmp.lt.s32.totalorder %s2612_s15, %s2612_s15 }
  0x27   : > { %p2298_p9 = scmp.ne.s32.totalorder %s2612_s15, %s2297_s10  ;;  %p2306_p6 = scmp.lt.s32.totalorder %s2297_s10, %s2297_s10 }
  0x29   : > { %p2300_p10 = pnand %p2298_p9, %p2633_p13  ;;  %p2307_p12 = por %p2306_p6, %p2305_p2 }
  0x2b   : > { %p2301_p1 = pneg %p2300_p10 }
  0x2d   : > { %p2308_p0 = pnand %p2307_p12, %p2301_p1 }
  0x2f   : > { %2311 = shalt.err (!%p2308_p0)
}
  0x30   : > { %s2508_s14 = smov 256   ;;  %s2509_s17 = smov 16  }
  0x31   : > { %2212 = dma.hbm_to_vmem [thread:$0]  (!%p2619_p11), %s3490_s2, 4096, %s2612_s15, [#allocation6], %s2508_s14, %s2508_s14, %s2509_s17  }
  0x32   : > { %s2312_s23 = scalar_lea.hbm %s3475_s4, 12288 }
  0x33   : > { %p2313_p2 = scmp.ne.s32.totalorder %s3475_s4, %s2312_s23  ;;  %p2319_p10 = scmp.lt.u32.totalorder %s2312_s23, %s3475_s4 }
  0x35   : > { %p2315_p1 = pnand %p2313_p2, %p2633_p13 }
  0x37   : > { %p2316_p6 = pneg %p2315_p1 }
  0x39   : > { %p2321_p3 = pnand %p2319_p10, %p2316_p6 }
  0x3b   : > { %2324 = shalt.err (!%p2321_p3)
}
  0x3c   : > { %s2325_s15 = scalar_lea.vmem %s2623_s18, 12288  ;;  %p2333_p12 = scmp.lt.s32.totalorder %s2623_s18, %s2623_s18 }
  0x3d   : > { %p2326_p5 = scmp.ne.s32.totalorder %s2623_s18, %s2325_s15  ;;  %p2334_p0 = scmp.lt.s32.totalorder %s2325_s15, %s2325_s15 }
  0x3f   : > { %p2328_p7 = pnand %p2326_p5, %p2633_p13  ;;  %p2335_p2 = por %p2334_p0, %p2333_p12 }
  0x41   : > { %p2329_p9 = pneg %p2328_p7 }
  0x43   : > { %p2336_p1 = pnand %p2335_p2, %p2329_p9 }
  0x45   : > { %2339 = shalt.err (!%p2336_p1)
}
  0x46   : > { %s2510_s14 = smov 384   ;;  %s2511_s12 = smov 24  }
  0x47   : > { %2215 = dma.hbm_to_vmem [thread:$0]  (!%p2619_p11), %s3475_s4, 12288, %s2623_s18, [#allocation6], %s2510_s14, %s2510_s14, %s2511_s12  }
  0x48   : > { %s2512_s20 = smov [#allocation8]   ;;  %s2340_s25 = scalar_lea.hbm %s3477_s6, 6144 }
  0x49   : > { %s286_s21 = sshll.u32 %s2512_s20, 4  ;;  %p2341_p6 = scmp.ne.s32.totalorder %s3477_s6, %s2340_s25  ;;  %s287_s21 = int_to_ptr.vmem [resolvable:$true] %s286_s21 }
  0x4a   : > { %p2347_p5 = scmp.lt.u32.totalorder %s2340_s25, %s3477_s6 }
  0x4b   : > { %p2343_p10 = pnand %p2341_p6, %p2633_p13 }
  0x4d   : > { %p2344_p3 = pneg %p2343_p10 }
  0x4f   : > { %p2349_p7 = pnand %p2347_p5, %p2344_p3 }
  0x51   : > { %2352 = shalt.err (!%p2349_p7)
}
  0x52   : > { %s2353_s18 = scalar_lea.vmem %s287_s21, 6144  ;;  %p2361_p2 = scmp.lt.s32.totalorder %s287_s21, %s287_s21 }
  0x53   : > { %p2354_p9 = scmp.ne.s32.totalorder %s287_s21, %s2353_s18  ;;  %p2362_p1 = scmp.lt.s32.totalorder %s2353_s18, %s2353_s18 }
  0x55   : > { %p2356_p12 = pnand %p2354_p9, %p2633_p13  ;;  %p2363_p4 = por %p2362_p1, %p2361_p2 }
  0x57   : > { %p2357_p0 = pneg %p2356_p12 }
  0x59   : > { %p2364_p8 = pnand %p2363_p4, %p2357_p0 }
  0x5b   : > { %2367 = shalt.err (!%p2364_p8)
}
  0x5c   : > { %s2513_s14 = smov 128   ;;  %s2514_s2 = smov 8  }
  0x5d   : > { %2218 = dma.hbm_to_vmem [thread:$0]  (!%p2619_p11), %s3477_s6, 6144, %s287_s21, [#allocation9], %s2513_s14, %s2513_s14, %s2514_s2  }
  0x5e   : > { %s2699_s17 = sadd.s32 1, %s2504_s30   ;;  %s37_s20 = sadd.s32 1, %s2500_s29 }
  0x5f   : > { %s34_s19 = ssub.s32 %s2504_s30, %s2699_s17  ;;  %p44_p8 = scmp.ne.s32.totalorder %s2500_s29, %s2496_s28 }
  0x60   : > { %p35_p4 = scmp.eq.s32.totalorder %s34_s19, 0  ;;  %p45_p13 = scmp.eq.s32.totalorder %s2504_s30, 0 }
  0x61   : > { %p2233_p6 = scmp.lt.s32.totalorder %s2504_s30, 2  ;;  %p3492_p3 = scmp.eq.s32.totalorder %s2589_s9, 1 }
  0x62   : > { %s2709_s22 = scalar_select %p35_p4, %s2500_s29, %s37_s20  }
  0x63   : > { %p46_p10 = por %p45_p13, %p44_p8  ;;  %p2713_p5 = por %p3492_p3, %p44_p8 }
  0x64   : > { %s300_s23 = sand.u32 1, %s2500_s29   ;;  %s1849_s25 = sshll.u32 %s2504_s30, 9 }
  0x65   : > { %s1831_s21 = sshll.u32 %s300_s23, 5  ;;  %s2722_s15 = scalar_lea.hbm %s3471_s0, %s1849_s25 }
  0x66   : > { %s304_s18 = scalar_lea.vmem [#allocation2], %s1831_s21  ;;  %p2724_p11 = pnand %p2233_p6, %p46_p10 }
  0x67   : > { %s311_s24 = sshll.u32 %s304_s18, 4  ;;  %s2730_s19 = scalar_lea.sflag [#allocation3], %s300_s23  ;;  %s2728_s24 = int_to_ptr.vmem [resolvable:$true] %s311_s24 }
  0x68   : > { %s2368_s20 = scalar_lea.hbm %s2722_s15, 512  ;;  %p2370_p9 = pneg %p2724_p11 }
  0x69   : > { %p2369_p7 = scmp.ne.s32.totalorder %s2722_s15, %s2368_s20  ;;  %s2373_s26 = scalar_lea.hbm %s3471_s0, 1024 }
  0x6a   : > { %p2374_p2 = scmp.lt.u32.totalorder %s2722_s15, %s3471_s0  ;;  %p2375_p1 = scmp.lt.u32.totalorder %s2373_s26, %s2368_s20 }
  0x6b   : > { %p2371_p12 = pnand %p2370_p9, %p2369_p7  ;;  %p2377_p8 = scmp.lt.u32.totalorder %s2368_s20, %s2722_s15 }
  0x6c   : > { %p2376_p4 = por %p2375_p1, %p2374_p2 }
  0x6d   : > { %p2372_p0 = pneg %p2371_p12 }
  0x6e   : > { %p2378_p13 = por %p2377_p8, %p2376_p4 }
  0x70   : > { %p2379_p6 = pnand %p2378_p13, %p2372_p0 }
  0x72   : > { %2382 = shalt.err (!%p2379_p6)
}
  0x73   : > { %s2383_s23 = scalar_lea.vmem %s2728_s24, 512  ;;  %s2515_s25 = smov [#allocation2]  }
  0x74   : > { %p2384_p10 = scmp.ne.s32.totalorder %s2728_s24, %s2383_s23  ;;  %s2388_s21 = sshll.u32 %s2515_s25, 4  ;;  %s2389_s21 = int_to_ptr.vmem [resolvable:$false] %s2388_s21 }
  0x75   : > { %s2390_s10 = scalar_lea.vmem %s2389_s21, 1024  ;;  %p2391_p12 = scmp.lt.s32.totalorder %s2728_s24, %s2389_s21 }
  0x76   : > { %p2386_p3 = pnand %p2384_p10, %p2370_p9  ;;  %p2392_p2 = scmp.lt.s32.totalorder %s2390_s10, %s2383_s23 }
  0x78   : > { %p2387_p7 = pneg %p2386_p3  ;;  %p2393_p1 = por %p2392_p2, %p2391_p12 }
  0x7a   : > { %p2394_p4 = pnand %p2393_p1, %p2387_p7 }
  0x7c   : > { %2397 = shalt.err (!%p2394_p4)
}
  0x7d   : > { %2222 = dma.hbm_to_vmem [thread:$0]  (!%p2724_p11), %s2722_s15, 512, %s2728_s24, %s2730_s19, %s2513_s14, %s2513_s14, %s2514_s2  }
  0x7e   : > { %p3495_p9 = scmp.ne.s32.totalorder %s3488_s13, 0 }
  0x7f   : > { %s2764_s20 = sand.u32 (!%p3495_p9), 1, %s2496_s28   ;;  %p3496_p0 = scmp.ne.s32.totalorder (!%p3495_p9), %s3485_s11, 0 }
  0x80   : > { %323 = sbr.rel (%p3495_p9) target bundleno = 2653 (0xa5d), region = 48  ;;  %s1835_s26 = sshll.u32 (!%p3495_p9), %s2764_s20, 5 }
  0x81   : > { %s326_s18 = scalar_lea.sflag (!%p3495_p9), [#allocation3], %s2764_s20  ;;  %s2770_s12 = scalar_lea.vmem (!%p3495_p9), [#allocation2], %s1835_s26 }
  0x87   : > { %2471 = dma.done.wait (%p3496_p0), %s326_s18, 512  }
  0x88   : > { %2473 = vsyncadd (%p3496_p0), %s326_s18, 4294966784  ;;  %p3497_p11 = scmp.eq.s32.totalorder %s2589_s9, 0 }
  0x8a   : > { %2475 = dma.done.wait (%p3497_p11), [#allocation6], 16384   ;;  %p3498_p8 = pmov %p3497_p11 }
  0x8c   : > { %2477 = vsyncadd (%p3498_p8), [#allocation6], 4294950912  ;;  %p3499_p13 = pmov %p3498_p8 }
  0x8d   : > { %p3500_p6 = pmov %p3498_p8 }
  0x8e   : > { %2479 = dma.done.wait (%p3499_p13), [#allocation9], 6144  }
  0x8f   : > { %2481 = vsyncadd (%p3500_p6), [#allocation9], 4294961152  ;;  %v2516_v0 = vmov 0.0   ;;  %v387_v1 = vld [vmem:[#allocation5 + $0x8] sm:$0xff]  ;;  %v389_v2 = vld [vmem:[#allocation5 + $0x18] sm:$0xff]  ;;  %s2189_s15 = smul.u32 96, %s2764_s20 }
  0x90   : > { %494 = vmatprep.mubr.f32.mxu0 %v2516_v0  ;;  %v386_v3 = vld [vmem:[#allocation5] sm:$0xff]  ;;  %v1997_v4 = vpack.c.bf16 %v389_v2, %v387_v1  ;;  %v388_v5 = vld [vmem:[#allocation5 + $0x10] sm:$0xff]  ;;  %v391_v6 = vld [vmem:[#allocation5 + $0x28] sm:$0xff]  ;;  %s2190_s19 = smul.u32 1536, %s2589_s9  ;;  %s1656_s18 = scalar_lea.sflag [#allocation4], %s2764_s20 }
  0x91   : > { %v393_v7 = vld [vmem:[#allocation5 + $0x38] sm:$0xff]  ;;  %v1999_v8 = vpack.c.bf16 %v388_v5, %v386_v3  ;;  %v390_v10 = vld [vmem:[#allocation5 + $0x20] sm:$0xff]  ;;  %v392_v11 = vld [vmem:[#allocation5 + $0x30] sm:$0xff]  ;;  %s3348_s24 = scalar_lea.vmem [#allocation10], %s2189_s15  ;;  %s2517_s11 = smov [#allocation10]  }
  0x92   : > { %v2001_v9 = vpack.c.bf16 %v393_v7, %v391_v6  ;;  %v395_v12 = vld [vmem:[#allocation5 + $0x48] sm:$0xff]  ;;  %1998 = vmatprep.subr.bf16.mxu0 %v1997_v4  ;;  %v397_v13 = vld [vmem:[#allocation5 + $0x58] sm:$0xff]  ;;  %v2003_v14 = vpack.c.bf16 %v392_v11, %v390_v10  ;;  %v394_v16 = vld [vmem:[#allocation5 + $0x40] sm:$0xff]  ;;  %s1675_s23 = sshll.u32 %s3348_s24, 4  ;;  %s3388_s10 = scalar_lea.hbm %s3478_s7, %s2190_s19  ;;  %s3390_s23 = int_to_ptr.vmem [resolvable:$true] %s1675_s23 }
  0x93   : > { %2000 = vmatpush1.bf16.msra.mxu0 %v1999_v8  ;;  %v2005_v15 = vpack.c.bf16 %v397_v13, %v395_v12  ;;  %v396_v17 = vld [vmem:[#allocation5 + $0x50] sm:$0xff]  ;;  %v399_v18 = vld [vmem:[#allocation5 + $0x68] sm:$0xff]  ;;  %v401_v19 = vld [vmem:[#allocation5 + $0x78] sm:$0xff]  ;;  %s2402_s13 = sshll.u32 %s2517_s11, 4  ;;  %s2403_s13 = int_to_ptr.vmem [resolvable:$false] %s2402_s13 }
  0x94   : > { %2002 = vmatprep.subr.bf16.mxu0 %v2001_v9  ;;  %v2007_v20 = vpack.c.bf16 %v396_v17, %v394_v16  ;;  %v2009_v21 = vpack.c.bf16 %v401_v19, %v399_v18  ;;  %v398_v22 = vld [vmem:[#allocation5 + $0x60] sm:$0xff]  ;;  %v400_v23 = vld [vmem:[#allocation5 + $0x70] sm:$0xff]  ;;  %v403_v24 = vld [vmem:[#allocation5 + $0x88] sm:$0xff]  ;;  %s2404_s14 = scalar_lea.vmem %s2403_s13, 3072  ;;  %p2405_p12 = scmp.lt.s32.totalorder %s3390_s23, %s2403_s13 }
  0x95   : > { %v405_v25 = vld [vmem:[#allocation5 + $0x98] sm:$0xff]  ;;  %v402_v26 = vld [vmem:[#allocation5 + $0x80] sm:$0xff]  ;;  %v404_v27 = vld [vmem:[#allocation5 + $0x90] sm:$0xff]  ;;  %v2011_v28 = vpack.c.bf16 %v400_v23, %v398_v22 }
  0x96   : > { %v407_v29 = vld [vmem:[#allocation5 + $0xa8] sm:$0xff]  ;;  %v409_v30 = vld [vmem:[#allocation5 + $0xb8] sm:$0xff]  ;;  %v531_v32 = vld [vmem:[#allocation7 + $0x20] sm:$0xff]  ;;  %v2013_v34 = vpack.c.bf16 %v405_v25, %v403_v24  ;;  %v2015_v45 = vpack.c.bf16 %v404_v27, %v402_v26 }
  0x97   : > { %2004 = vmatpush1.bf16.msra.mxu0 %v2003_v14  ;;  %v528_v31 = vld [vmem:[#allocation7 + $0x8] sm:$0xff]  ;;  %v527_v33 = vld [vmem:[#allocation7] sm:$0xff]  ;;  %v530_v36 = vld [vmem:[#allocation7 + $0x18] sm:$0xff]  ;;  %v2017_v49 = vpack.c.bf16 %v409_v30, %v407_v29 }
  0x98   : > { %2006 = vmatprep.subr.bf16.mxu0 %v2005_v15  ;;  %v2029_v35 = vpack.c.bf16 %v531_v32, %v528_v31  ;;  %v534_v37 = vld [vmem:[#allocation7 + $0x38] sm:$0xff]  ;;  %v537_v38 = vld [vmem:[#allocation7 + $0x50] sm:$0xff]  ;;  %v2031_v39 = vpack.c.bf16 %v530_v36, %v527_v33  ;;  %v536_v42 = vld [vmem:[#allocation7 + $0x48] sm:$0xff] }
  0x99   : > { %v2033_v40 = vpack.c.bf16 %v537_v38, %v534_v37  ;;  %v533_v41 = vld [vmem:[#allocation7 + $0x30] sm:$0xff]  ;;  %v540_v43 = vld [vmem:[#allocation7 + $0x68] sm:$0xff]  ;;  %v543_v44 = vld [vmem:[#allocation7 + $0x80] sm:$0xff] }
  0x9a   : > { %2030 = vmatprep.subr.bf16.mxu1 %v2029_v35  ;;  %v406_v46 = vld [vmem:[#allocation5 + $0xa0] sm:$0xff]  ;;  %v408_v47 = vld [vmem:[#allocation5 + $0xb0] sm:$0xff]  ;;  %v2035_v48 = vpack.c.bf16 %v536_v42, %v533_v41  ;;  %v411_v50 = vld [vmem:[#allocation5 + $0xc8] sm:$0xff]  ;;  %v2037_v51 = vpack.c.bf16 %v543_v44, %v540_v43 }
  0x9b   : > { %2008 = vmatpush1.bf16.msra.mxu0 %v2007_v20  ;;  %2032 = vmatpush1.bf16.msra.mxu1 %v2031_v39  ;;  %v539_v52 = vld [vmem:[#allocation7 + $0x60] sm:$0xff]  ;;  %v542_v53 = vld [vmem:[#allocation7 + $0x78] sm:$0xff]  ;;  %v549_v56 = vld [vmem:[#allocation7 + $0xb0] sm:$0xff]  ;;  %v2019_v57 = vpack.c.bf16 %v408_v47, %v406_v46 }
  0x9c   : > { %2010 = vmatprep.subr.bf16.mxu0 %v2009_v21  ;;  %2034 = vmatprep.subr.bf16.mxu1 %v2033_v40  ;;  %v413_v54 = vld [vmem:[#allocation5 + $0xd8] sm:$0xff]  ;;  %v410_v58 = vld [vmem:[#allocation5 + $0xc0] sm:$0xff]  ;;  %v412_v59 = vld [vmem:[#allocation5 + $0xd0] sm:$0xff]  ;;  %v2039_v60 = vpack.c.bf16 %v542_v53, %v539_v52 }
  0x9d   : > { %v546_v55 = vld [vmem:[#allocation7 + $0x98] sm:$0xff]  ;;  %v2021_v61 = vpack.c.bf16 %v413_v54, %v411_v50  ;;  %v415_v62 = vld [vmem:[#allocation5 + $0xe8] sm:$0xff]  ;;  %v545_v1 = vld [vmem:[#allocation7 + $0x90] sm:$0xff]  ;;  %v2023_v6 = vpack.c.bf16 %v412_v59, %v410_v58 }
  0x9e   : > { %v2041_v63 = vpack.c.bf16 %v549_v56, %v546_v55  ;;  %v548_v2 = vld [vmem:[#allocation7 + $0xa8] sm:$0xff]  ;;  %v417_v3 = vld [vmem:[#allocation5 + $0xf8] sm:$0xff]  ;;  %v555_v5 = vld [vmem:[#allocation7 + $0xe0] sm:$0xff] }
  0x9f   : > { %2012 = vmatpush1.bf16.msra.mxu0 %v2011_v28  ;;  %2036 = vmatpush1.bf16.msra.mxu1 %v2035_v48  ;;  %v552_v4 = vld [vmem:[#allocation7 + $0xc8] sm:$0xff]  ;;  %v414_v7 = vld [vmem:[#allocation5 + $0xe0] sm:$0xff]  ;;  %v416_v8 = vld [vmem:[#allocation5 + $0xf0] sm:$0xff]  ;;  %v2043_v9 = vpack.c.bf16 %v548_v2, %v545_v1  ;;  %v2025_v10 = vpack.c.bf16 %v417_v3, %v415_v62 }
  0xa0   : > { %2014 = vmatprep.subr.bf16.mxu0 %v2013_v34  ;;  %2038 = vmatprep.subr.bf16.mxu1 %v2037_v51  ;;  %v2045_v11 = vpack.c.bf16 %v555_v5, %v552_v4  ;;  %v551_v12 = vld [vmem:[#allocation7 + $0xc0] sm:$0xff]  ;;  %v554_v13 = vld [vmem:[#allocation7 + $0xd8] sm:$0xff]  ;;  %v561_v15 = vld [vmem:[#allocation7 + $0x110] sm:$0xff]  ;;  %v2027_v18 = vpack.c.bf16 %v416_v8, %v414_v7 }
  0xa1   : > { %v558_v14 = vld [vmem:[#allocation7 + $0xf8] sm:$0xff]  ;;  %v577_v16 = vld [vmem:[#allocation7 + $0x190] sm:$0xff]  ;;  %v580_v17 = vld [vmem:[#allocation7 + $0x1a8] sm:$0xff]  ;;  %v2047_v19 = vpack.c.bf16 %v554_v13, %v551_v12 }
  0xa2   : > { %v2049_v20 = vpack.c.bf16 %v561_v15, %v558_v14  ;;  %v557_v21 = vld [vmem:[#allocation7 + $0xf0] sm:$0xff]  ;;  %v560_v22 = vld [vmem:[#allocation7 + $0x108] sm:$0xff]  ;;  %v2093_v24 = vpack.c.bf16 %v580_v17, %v577_v16  ;;  %v567_v25 = vld [vmem:[#allocation7 + $0x140] sm:$0xff] }
  0xa3   : > { %2016 = vmatpush1.bf16.msra.mxu0 %v2015_v45  ;;  %2040 = vmatpush1.bf16.msra.mxu1 %v2039_v60  ;;  %v564_v23 = vld [vmem:[#allocation7 + $0x128] sm:$0xff]  ;;  %v529_v26 = vld [vmem:[#allocation7 + $0x10] sm:$0xff]  ;;  %v583_v28 = vld [vmem:[#allocation7 + $0x1c0] sm:$0xff]  ;;  %v2051_v31 = vpack.c.bf16 %v560_v22, %v557_v21 }
  0xa4   : > { %2018 = vmatprep.subr.bf16.mxu0 %v2017_v49  ;;  %2042 = vmatprep.subr.bf16.mxu1 %v2041_v63  ;;  %v532_v27 = vld [vmem:[#allocation7 + $0x28] sm:$0xff]  ;;  %v586_v29 = vld [vmem:[#allocation7 + $0x1d8] sm:$0xff]  ;;  %v382_v30 = vld [vmem:[%s2770_s12] sm:$0xff]  ;;  %v2053_v32 = vpack.c.bf16 %v567_v25, %v564_v23 }
  0xa5   : > { %v563_v33 = vld [vmem:[#allocation7 + $0x120] sm:$0xff]  ;;  %v566_v34 = vld [vmem:[#allocation7 + $0x138] sm:$0xff]  ;;  %v2095_v36 = vpack.c.bf16 %v532_v27, %v529_v26  ;;  %v573_v37 = vld [vmem:[#allocation7 + $0x170] sm:$0xff]  ;;  %v2097_v38 = vpack.c.bf16 %v586_v29, %v583_v28 }
  0xa6   : > { %v570_v35 = vld [vmem:[#allocation7 + $0x158] sm:$0xff]  ;;  %v535_v39 = vld [vmem:[#allocation7 + $0x40] sm:$0xff]  ;;  %v589_v41 = vld [vmem:[#allocation7 + $0x1f0] sm:$0xff]  ;;  %v2055_v44 = vpack.c.bf16 %v566_v34, %v563_v33 }
  0xa7   : > { %2020 = vmatpush1.bf16.msra.mxu0 %v2019_v57  ;;  %2044 = vmatpush1.bf16.msra.mxu1 %v2043_v9  ;;  %v538_v40 = vld [vmem:[#allocation7 + $0x58] sm:$0xff]  ;;  %v592_v42 = vld [vmem:[#allocation7 + $0x208] sm:$0xff]  ;;  %v2057_v45 = vpack.c.bf16 %v573_v37, %v570_v35  ;;  %v569_v46 = vld [vmem:[#allocation7 + $0x150] sm:$0xff] }
  0xa8   : > { %2022 = vmatprep.subr.bf16.mxu0 %v2021_v61  ;;  %2046 = vmatprep.subr.bf16.mxu1 %v2045_v11  ;;  %v383_v43 = vld [vmem:[%s2770_s12 + $0x8] sm:$0xff]  ;;  %v2099_v49 = vpack.c.bf16 %v538_v40, %v535_v39  ;;  %v579_v50 = vld [vmem:[#allocation7 + $0x1a0] sm:$0xff]  ;;  %v2101_v51 = vpack.c.bf16 %v592_v42, %v589_v41  ;;  %v541_v52 = vld [vmem:[#allocation7 + $0x70] sm:$0xff] }
  0xa9   : > { %v572_v47 = vld [vmem:[#allocation7 + $0x168] sm:$0xff]  ;;  %v595_v54 = vld [vmem:[#allocation7 + $0x220] sm:$0xff]  ;;  %v598_v55 = vld [vmem:[#allocation7 + $0x238] sm:$0xff] }
  0xaa   : > { %v576_v48 = vld [vmem:[#allocation7 + $0x188] sm:$0xff]  ;;  %v384_v56 = vld [vmem:[%s2770_s12 + $0x10] sm:$0xff]  ;;  %v2059_v57 = vpack.c.bf16 %v572_v47, %v569_v46  ;;  %v575_v59 = vld [vmem:[#allocation7 + $0x180] sm:$0xff]  ;;  %v2105_v1 = vpack.c.bf16 %v598_v55, %v595_v54 }
  0xab   : > { %2024 = vmatpush1.bf16.msra.mxu0 %v2023_v6  ;;  %2048 = vmatpush1.bf16.msra.mxu1 %v2047_v19  ;;  %v544_v53 = vld [vmem:[#allocation7 + $0x88] sm:$0xff]  ;;  %v2061_v58 = vpack.c.bf16 %v579_v50, %v576_v48  ;;  %v578_v60 = vld [vmem:[#allocation7 + $0x198] sm:$0xff]  ;;  %v585_v63 = vld [vmem:[#allocation7 + $0x1d0] sm:$0xff] }
  0xac   : > { %2026 = vmatprep.subr.bf16.mxu0 %v2025_v10  ;;  %2050 = vmatprep.subr.bf16.mxu1 %v2049_v20  ;;  %v582_v61 = vld [vmem:[#allocation7 + $0x1b8] sm:$0xff]  ;;  %v2103_v62 = vpack.c.bf16 %v544_v53, %v541_v52  ;;  %v547_v2 = vld [vmem:[#allocation7 + $0xa0] sm:$0xff]  ;;  %v601_v4 = vld [vmem:[#allocation7 + $0x250] sm:$0xff]  ;;  %v2063_v7 = vpack.c.bf16 %v578_v60, %v575_v59 }
  0xad   : > { %v550_v3 = vld [vmem:[#allocation7 + $0xb8] sm:$0xff]  ;;  %v604_v5 = vld [vmem:[#allocation7 + $0x268] sm:$0xff]  ;;  %v2065_v8 = vpack.c.bf16 %v585_v63, %v582_v61  ;;  %v581_v9 = vld [vmem:[#allocation7 + $0x1b0] sm:$0xff] }
  0xae   : > { %v385_v6 = vld [vmem:[%s2770_s12 + $0x18] sm:$0xff]  ;;  %v584_v10 = vld [vmem:[#allocation7 + $0x1c8] sm:$0xff]  ;;  %v2107_v12 = vpack.c.bf16 %v550_v3, %v547_v2  ;;  %v591_v13 = vld [vmem:[#allocation7 + $0x200] sm:$0xff]  ;;  %v2109_v14 = vpack.c.bf16 %v604_v5, %v601_v4  ;;  %s2398_s12 = scalar_lea.vmem %s3390_s23, 1536 }
  0xaf   : > { %2028 = vmatpush1.bf16.msra.mxu0 %v2027_v18  ;;  %2052 = vmatpush1.bf16.msra.mxu1 %v2051_v31  ;;  %v588_v11 = vld [vmem:[#allocation7 + $0x1e8] sm:$0xff]  ;;  %v553_v15 = vld [vmem:[#allocation7 + $0xd0] sm:$0xff]  ;;  %v607_v17 = vld [vmem:[#allocation7 + $0x280] sm:$0xff]  ;;  %p2399_p10 = scmp.ne.s32.totalorder %s3390_s23, %s2398_s12  ;;  %p2406_p2 = scmp.lt.s32.totalorder %s2404_s14, %s2398_s12 }
  0xb0   : > { %2094 = vmatprep.subr.bf16.mxu0 %v2093_v24  ;;  %2054 = vmatprep.subr.bf16.mxu1 %v2053_v32  ;;  %v556_v16 = vld [vmem:[#allocation7 + $0xe8] sm:$0xff]  ;;  %v610_v18 = vld [vmem:[#allocation7 + $0x298] sm:$0xff]  ;;  %v2069_v19 = vpack.c.bf16 %v591_v13, %v588_v11  ;;  %v587_v20 = vld [vmem:[#allocation7 + $0x1e0] sm:$0xff] }
  0xb1   : > { %v590_v21 = vld [vmem:[#allocation7 + $0x1f8] sm:$0xff]  ;;  %v2111_v23 = vpack.c.bf16 %v556_v16, %v553_v15  ;;  %v597_v24 = vld [vmem:[#allocation7 + $0x230] sm:$0xff]  ;;  %v2113_v25 = vpack.c.bf16 %v610_v18, %v607_v17  ;;  %v559_v26 = vld [vmem:[#allocation7 + $0x100] sm:$0xff]  ;;  %p2400_p3 = pnand %p2399_p10, %p2713_p5  ;;  %p2407_p1 = por %p2406_p2, %p2405_p12 }
  0xb2   : > { %495 = vmatmul.mubr.f32.vlgmr.msra.gmra.mrb[0].mxu0 %v382_v30  ;;  %v594_v22 = vld [vmem:[#allocation7 + $0x218] sm:$0xff]  ;;  %v613_v28 = vld [vmem:[#allocation7 + $0x2b0] sm:$0xff]  ;;  %v616_v29 = vld [vmem:[#allocation7 + $0x2c8] sm:$0xff]  ;;  %v2071_v30 = vpack.c.bf16 %v590_v21, %v587_v20 }
  0xb3   : > { %500 = vmatprep.mubr.f32.mxu0 %v2516_v0  ;;  %2096 = vmatpush3.bf16.msra.mxu0 %v2095_v36  ;;  %v562_v27 = vld [vmem:[#allocation7 + $0x118] sm:$0xff]  ;;  %v2073_v31 = vpack.c.bf16 %v597_v24, %v594_v22  ;;  %v593_v32 = vld [vmem:[#allocation7 + $0x210] sm:$0xff]  ;;  %v596_v33 = vld [vmem:[#allocation7 + $0x228] sm:$0xff]  ;;  %v2117_v37 = vpack.c.bf16 %v616_v29, %v613_v28  ;;  %p2401_p7 = pneg %p2400_p3 }
  0xb4   : > { %2098 = vmatprep.subr.bf16.mxu0 %v2097_v38  ;;  %2056 = vmatpush1.bf16.msra.mxu1 %v2055_v44  ;;  %v2115_v34 = vpack.c.bf16 %v562_v27, %v559_v26  ;;  %v600_v35 = vld [vmem:[#allocation7 + $0x248] sm:$0xff]  ;;  %v603_v36 = vld [vmem:[#allocation7 + $0x260] sm:$0xff]  ;;  %v2075_v38 = vpack.c.bf16 %v596_v33, %v593_v32  ;;  %v602_v41 = vld [vmem:[#allocation7 + $0x258] sm:$0xff] }
  0xb5   : > { %2058 = vmatprep.subr.bf16.mxu1 %v2057_v45  ;;  %v2077_v39 = vpack.c.bf16 %v603_v36, %v600_v35  ;;  %v599_v40 = vld [vmem:[#allocation7 + $0x240] sm:$0xff]  ;;  %v606_v42 = vld [vmem:[#allocation7 + $0x278] sm:$0xff]  ;;  %v605_v46 = vld [vmem:[#allocation7 + $0x270] sm:$0xff]  ;;  %p2408_p4 = pnand %p2407_p1, %p2401_p7 }
  0xb6   : > { %501 = vmatmul.mubr.f32.gmra.mrb[2].mxu0 %v383_v43  ;;  %v609_v43 = vld [vmem:[#allocation7 + $0x290] sm:$0xff]  ;;  %v2079_v44 = vpack.c.bf16 %v602_v41, %v599_v40  ;;  %v608_v47 = vld [vmem:[#allocation7 + $0x288] sm:$0xff]  ;;  %v611_v52 = vld [vmem:[#allocation7 + $0x2a0] sm:$0xff] }
  0xb7   : > { %506 = vmatprep.mubr.f32.mxu0 %v2516_v0  ;;  %2100 = vmatpush3.bf16.msra.mxu0 %v2099_v49  ;;  %v2081_v45 = vpack.c.bf16 %v609_v43, %v606_v42  ;;  %v612_v48 = vld [vmem:[#allocation7 + $0x2a8] sm:$0xff]  ;;  %v615_v49 = vld [vmem:[#allocation7 + $0x2c0] sm:$0xff]  ;;  %v2083_v50 = vpack.c.bf16 %v608_v47, %v605_v46  ;;  %v614_v53 = vld [vmem:[#allocation7 + $0x2b8] sm:$0xff] }
  0xb8   : > { %2102 = vmatprep.subr.bf16.mxu0 %v2101_v51  ;;  %2060 = vmatpush1.bf16.msra.mxu1 %v2059_v57  ;;  %v2085_v51 = vpack.c.bf16 %v615_v49, %v612_v48  ;;  %v565_v54 = vld [vmem:[#allocation7 + $0x130] sm:$0xff]  ;;  %v2087_v55 = vpack.c.bf16 %v614_v53, %v611_v52  ;;  %v619_v60 = vld [vmem:[#allocation7 + $0x2e0] sm:$0xff]  ;;  %v574_v5 = vld [vmem:[#allocation7 + $0x178] sm:$0xff] }
  0xb9   : > { %2062 = vmatprep.subr.bf16.mxu1 %v2061_v58  ;;  %v618_v58 = vld [vmem:[#allocation7 + $0x2d8] sm:$0xff]  ;;  %v621_v59 = vld [vmem:[#allocation7 + $0x2f0] sm:$0xff]  ;;  %v571_v4 = vld [vmem:[#allocation7 + $0x160] sm:$0xff] }
  0xba   : > { %507 = vmatmul.mubr.f32.gmra.mrb[4].mxu0 %v384_v56  ;;  %v568_v56 = vld [vmem:[#allocation7 + $0x148] sm:$0xff]  ;;  %v2089_v61 = vpack.c.bf16 %v621_v59, %v618_v58  ;;  %v617_v63 = vld [vmem:[#allocation7 + $0x2d0] sm:$0xff] }
  0xbb   : > { %512 = vmatprep.mubr.f32.mxu0 %v2516_v0  ;;  %2104 = vmatpush3.bf16.msra.mxu0 %v2103_v62  ;;  %v2067_v0 = vpack.c.bf16 %v584_v10, %v581_v9  ;;  %v2119_v57 = vpack.c.bf16 %v568_v56, %v565_v54  ;;  %v622_v62 = vld [vmem:[#allocation7 + $0x2f8] sm:$0xff]  ;;  %v418_v10 = vld [vmem:[%s3474_s3] sm:$0x3] }
  0xbc   : > { %2106 = vmatprep.subr.bf16.mxu0 %v2105_v1  ;;  %2064 = vmatpush1.bf16.msra.mxu1 %v2063_v7  ;;  %v620_v1 = vld [vmem:[#allocation7 + $0x2e8] sm:$0xff]  ;;  %v2121_v2 = vpack.c.bf16 %v622_v62, %v619_v60  ;;  %v420_v7 = vlaneseq }
  0xbd   : > { %2066 = vmatprep.subr.bf16.mxu1 %v2065_v8  ;;  %v2091_v3 = vpack.c.bf16 %v620_v1, %v617_v63 }
  0xbe   : > { %513 = vmatmul.mubr.f32.gmra.mrb[6].mxu0 %v385_v6  ;;  %v2123_v6 = vpack.c.bf16 %v574_v5, %v571_v4  ;;  %v421_v8 = vshrl.u32 %v420_v7, 7 }
  0xbf   : > { %2108 = vmatpush3.bf16.msra.mxu0 %v2107_v12 }
  0xc0   : > { %2110 = vmatprep.subr.bf16.mxu0 %v2109_v14  ;;  %2068 = vmatpush1.bf16.msra.mxu1 %v2067_v0  ;;  %v422_v9 = vsub.s32 0, %v421_v8  ;;  %v426_v11 = vsub.s32 1, %v421_v8 }
  0xc1   : > { %2070 = vmatprep.subr.bf16.mxu1 %v2069_v19 }
  0xc2   : > { %v423_v12 = vrot.slane %v418_v10, %v422_v9  ;;  %v427_v13 = vrot.slane %v418_v10, %v426_v11 }
  0xc3   : > { %2112 = vmatpush3.bf16.msra.mxu0 %v2111_v23 }
  0xc4   : > { %2114 = vmatprep.subr.bf16.mxu0 %v2113_v25  ;;  %2072 = vmatpush1.bf16.msra.mxu1 %v2071_v30 }
  0xc5   : > { %2074 = vmatprep.subr.bf16.mxu1 %v2073_v31 }
  0xc7   : > { %2116 = vmatpush3.bf16.msra.mxu0 %v2115_v34 }
  0xc8   : > { %2118 = vmatprep.subr.bf16.mxu0 %v2117_v37  ;;  %2076 = vmatpush1.bf16.msra.mxu1 %v2075_v38  ;;  %v623_v37 = vld [vmem:[%s3476_s5] sm:$0x7]  ;;  %v635_v38 = vsub.s32 2, %v421_v8 }
  0xc9   : > { %2078 = vmatprep.subr.bf16.mxu1 %v2077_v39  ;;  %v628_v39 = vrot.slane %v623_v37, %v422_v9  ;;  %v632_v40 = vrot.slane %v623_v37, %v426_v11 }
  0xca   : > { %v636_v43 = vrot.slane %v623_v37, %v635_v38 }
  0xcb   : > { %2120 = vmatpush3.bf16.msra.mxu0 %v2119_v57 }
  0xcc   : > { %2080 = vmatpush1.bf16.msra.mxu1 %v2079_v44  ;;  %2122 = vmatprep.subr.bf16.mxu0 %v2121_v2 }
  0xcd   : > { %2082 = vmatprep.subr.bf16.mxu1 %v2081_v45 }
  0xcf   : > { %2124 = vmatpush3.bf16.msra.mxu0 %v2123_v6 }
  0xd0   : > { %2084 = vmatpush1.bf16.msra.mxu1 %v2083_v50 }
  0xd1   : > { %2086 = vmatprep.subr.bf16.mxu1 %v2085_v51 }
  0xd4   : > { %2088 = vmatpush1.bf16.msra.mxu1 %v2087_v55 }
  0xd5   : > { %2090 = vmatprep.subr.bf16.mxu1 %v2089_v61 }
  0xd8   : > { %2092 = vmatpush1.bf16.msra.mxu1 %v2091_v3 }
 0x185   : > { %v496_v14 = vpop.f32.mrb[0].mxu0 }
 0x186   : > { %v497_v15 = vadd.f32 %v496_v14, %v423_v12  ;;  %v498_v16 = vpop.f32.mrb[1].mxu0 }
 0x187   : > { %v499_v17 = vadd.f32 %v498_v16, %v427_v13 }
 0x188   : > { %v519_v19 = vmax.f32 %v497_v15, 0.0 }
 0x189   : > { %v520_v18 = vmax.f32 %v499_v17, 0.0  ;;  %v502_v0 = vpop.f32.mrb[2].mxu0 }
 0x18a   : > { %v503_v20 = vadd.f32 %v502_v0, %v423_v12  ;;  %v504_v21 = vpop.f32.mrb[3].mxu0 }
 0x18b   : > { %v505_v22 = vadd.f32 %v504_v21, %v427_v13  ;;  %704 = vmatprep.mubr.f32.mxu1 %v520_v18  ;;  %793 = vmatprep.mubr.f32.mxu0 %v520_v18 }
 0x18c   : > { %705 = vmatmul.mubr.f32.vlgmr.msra.gmra.mrb[0].mxu1 %v519_v19  ;;  %794 = vmatmul.mubr.f32.vlgmr.msra.gmra.mrb[8].mxu0 %v519_v19  ;;  %v521_v25 = vmax.f32 %v503_v20, 0.0  ;;  %v2836_v19 = vand.u32 127, %v420_v7 }
 0x18d   : > { %v522_v23 = vmax.f32 %v505_v22, 0.0  ;;  %v508_v24 = vpop.f32.mrb[4].mxu0 }
 0x18e   : > { %v509_v26 = vadd.f32 %v508_v24, %v423_v12  ;;  %v510_v27 = vpop.f32.mrb[5].mxu0  ;;  %v2839_v20 = vadd.s32 128, %v2836_v19  ;;  %v2848_v22 = vadd.s32 256, %v2836_v19 }
 0x18f   : > { %v511_v28 = vadd.f32 %v510_v27, %v427_v13  ;;  %710 = vmatprep.mubr.f32.mxu1 %v522_v23  ;;  %798 = vmatprep.mubr.f32.mxu0 %v522_v23 }
 0x190   : > { %711 = vmatmul.mubr.f32.gmra.mrb[2].mxu1 %v521_v25  ;;  %799 = vmatmul.mubr.f32.gmra.mrb[10].mxu0 %v521_v25  ;;  %v523_v31 = vmax.f32 %v509_v26, 0.0 }
 0x191   : > { %v524_v29 = vmax.f32 %v511_v28, 0.0  ;;  %v514_v30 = vpop.f32.mrb[6].mxu0 }
 0x192   : > { %v515_v32 = vadd.f32 %v514_v30, %v423_v12  ;;  %v516_v33 = vpop.f32.mrb[7].mxu0 }
 0x193   : > { %v517_v34 = vadd.f32 %v516_v33, %v427_v13  ;;  %716 = vmatprep.mubr.f32.mxu1 %v524_v29  ;;  %803 = vmatprep.mubr.f32.mxu0 %v524_v29 }
 0x194   : > { %717 = vmatmul.mubr.f32.gmra.mrb[4].mxu1 %v523_v31  ;;  %804 = vmatmul.mubr.f32.gmra.mrb[12].mxu0 %v523_v31  ;;  %v525_v36 = vmax.f32 %v515_v32, 0.0 }
 0x195   : > { %v526_v35 = vmax.f32 %v517_v34, 0.0 }
 0x197   : > { %722 = vmatprep.mubr.f32.mxu1 %v526_v35  ;;  %808 = vmatprep.mubr.f32.mxu0 %v526_v35 }
 0x198   : > { %723 = vmatmul.mubr.f32.gmra.mrb[6].mxu1 %v525_v36  ;;  %809 = vmatmul.mubr.f32.gmra.mrb[14].mxu0 %v525_v36 }
 0x25f   : > { %v706_v41 = vpop.f32.mrb[0].mxu1  ;;  %v1883_v42 = vpop.f32.mrb[8].mxu0 }
 0x260   : > { %v2799_v44 = vadd.f32 %v706_v41, %v628_v39  ;;  %v708_v45 = vpop.f32.mrb[1].mxu1  ;;  %v1884_v46 = vpop.f32.mrb[9].mxu0 }
 0x261   : > { %v2801_v47 = vadd.f32 %v708_v45, %v632_v40  ;;  %v1885_v48 = vadd.f32 %v1884_v46, %v1883_v42 }
 0x263   : > { %v2803_v49 = vadd.f32 %v1885_v48, %v636_v43  ;;  %v712_v50 = vpop.f32.mrb[2].mxu1  ;;  %v1886_v51 = vpop.f32.mrb[10].mxu0  ;;  %v818_v52 = vmax.f32 %v2799_v44, %v2801_v47 }
 0x264   : > { %v2807_v53 = vadd.f32 %v712_v50, %v628_v39  ;;  %v714_v54 = vpop.f32.mrb[3].mxu1  ;;  %v1887_v55 = vpop.f32.mrb[11].mxu0 }
 0x265   : > { %v2809_v56 = vadd.f32 %v714_v54, %v632_v40  ;;  %v1888_v57 = vadd.f32 %v1887_v55, %v1886_v51  ;;  %v819_v58 = vmax.f32 %v818_v52, %v2803_v49 }
 0x267   : > { %v2812_v59 = vadd.f32 %v1888_v57, %v636_v43  ;;  %v718_v60 = vpop.f32.mrb[4].mxu1  ;;  %v1889_v61 = vpop.f32.mrb[12].mxu0  ;;  %820 = vmax.xlane.f32.xlu0 %v819_v58  ;;  %v822_v62 = vmax.f32 %v2807_v53, %v2809_v56 }
 0x268   : > { %v2816_v63 = vadd.f32 %v718_v60, %v628_v39  ;;  %v720_v1 = vpop.f32.mrb[5].mxu1  ;;  %v1890_v2 = vpop.f32.mrb[13].mxu0 }
 0x269   : > { %v2818_v3 = vadd.f32 %v720_v1, %v632_v40  ;;  %v1891_v4 = vadd.f32 %v1890_v2, %v1889_v61  ;;  %v823_v5 = vmax.f32 %v822_v62, %v2812_v59 }
 0x26b   : > { %v2821_v6 = vadd.f32 %v1891_v4, %v636_v43  ;;  %v724_v8 = vpop.f32.mrb[6].mxu1  ;;  %v1892_v9 = vpop.f32.mrb[14].mxu0  ;;  %824 = vmax.xlane.f32.xlu0 %v823_v5  ;;  %v826_v10 = vmax.f32 %v2816_v63, %v2818_v3 }
 0x26c   : > { %v2825_v11 = vadd.f32 %v724_v8, %v628_v39  ;;  %v726_v12 = vpop.f32.mrb[7].mxu1  ;;  %v1893_v13 = vpop.f32.mrb[15].mxu0 }
 0x26d   : > { %v2827_v14 = vadd.f32 %v726_v12, %v632_v40  ;;  %v1894_v15 = vadd.f32 %v1893_v13, %v1892_v9  ;;  %v827_v16 = vmax.f32 %v826_v10, %v2821_v6 }
 0x26f   : > { %v2830_v17 = vadd.f32 %v1894_v15, %v636_v43  ;;  %828 = vmax.xlane.f32.xlu1 %v827_v16  ;;  %v830_v18 = vmax.f32 %v2825_v11, %v2827_v14 }
 0x271   : > { %v831_v0 = vmax.f32 %v830_v18, %v2830_v17 }
 0x273   : > { %832 = vmax.xlane.f32.xlu1 %v831_v0 }
 0x2f4   : > { %v2841_v21 = vpop.xlane.xlu0 %820 }
 0x2f5   : > { %vm834_vm0 = vcmp.eq.f32.partialorder %v2799_v44, %v2841_v21  ;;  %vm835_vm1 = vcmp.eq.f32.partialorder %v2801_v47, %v2841_v21  ;;  %vm836_vm2 = vcmp.eq.f32.partialorder %v2803_v49, %v2841_v21 }
 0x2f6   : > { %v846_v7 = vsel %vm834_vm0, %v2836_v19, 384  ;;  %v847_v23 = vsel %vm835_vm1, %v2839_v20, 384  ;;  %v848_v26 = vsel %vm836_vm2, %v2848_v22, 384 }
 0x2f7   : > { %vm858_vm3 = vcmp.lt.s32.totalorder %v846_v7, %v847_v23 }
 0x2f8   : > { %v2854_v24 = vpop.xlane.xlu0 %824  ;;  %v859_v25 = vsel %vm858_vm3, %v846_v7, %v847_v23 }
 0x2f9   : > { %vm837_vm4 = vcmp.eq.f32.partialorder %v2807_v53, %v2854_v24  ;;  %vm838_vm5 = vcmp.eq.f32.partialorder %v2809_v56, %v2854_v24  ;;  %vm839_vm6 = vcmp.eq.f32.partialorder %v2812_v59, %v2854_v24  ;;  %vm860_vm7 = vcmp.lt.s32.totalorder %v859_v25, %v848_v26 }
 0x2fa   : > { %v849_v27 = vsel %vm837_vm4, %v2836_v19, 384  ;;  %v850_v28 = vsel %vm838_vm5, %v2839_v20, 384  ;;  %v861_v29 = vsel %vm860_vm7, %v859_v25, %v848_v26  ;;  %v851_v33 = vsel %vm839_vm6, %v2848_v22, 384 }
 0x2fb   : > { %vm876_vm8 = vcmp.lt.s32.totalorder %v849_v27, %v850_v28  ;;  %v863_v31 = vshra.s32 %v861_v29, 16  ;;  %v862_v58 = vand.u32 65535, %v861_v29 }
 0x2fc   : > { %v2865_v30 = vpop.xlane.xlu1 %828  ;;  %v877_v32 = vsel %vm876_vm8, %v849_v27, %v850_v28  ;;  %v942_v28 = vmax.f32 %v2841_v21, 0.0 }
 0x2fd   : > { %vm840_vm9 = vcmp.eq.f32.partialorder %v2816_v63, %v2865_v30  ;;  %vm841_vm10 = vcmp.eq.f32.partialorder %v2818_v3, %v2865_v30  ;;  %vm842_vm11 = vcmp.eq.f32.partialorder %v2821_v6, %v2865_v30  ;;  %v865_v36 = vcvt.s32.f32 %v863_v31 }
 0x2fe   : > { %v852_v34 = vsel %vm840_vm9, %v2836_v19, 384  ;;  %v853_v35 = vsel %vm841_vm10, %v2839_v20, 384  ;;  %vm878_vm12 = vcmp.lt.s32.totalorder %v877_v32, %v851_v33  ;;  %v854_v41 = vsel %vm842_vm11, %v2848_v22, 384 }
 0x2ff   : > { %v879_v37 = vsel %vm878_vm12, %v877_v32, %v851_v33  ;;  %vm894_vm13 = vcmp.lt.s32.totalorder %v852_v34, %v853_v35  ;;  %866 = vmin.xlane.f32.xlu0 %v865_v36  ;;  %v864_v61 = vcvt.s32.f32 %v862_v58 }
 0x300   : > { %v2876_v38 = vpop.xlane.xlu1 %832  ;;  %v881_v39 = vshra.s32 %v879_v37, 16  ;;  %v895_v40 = vsel %vm894_vm13, %v852_v34, %v853_v35  ;;  %v880_v62 = vand.u32 65535, %v879_v37 }
 0x301   : > { %vm843_vm14 = vcmp.eq.f32.partialorder %v2825_v11, %v2876_v38  ;;  %vm844_vm15 = vcmp.eq.f32.partialorder %v2827_v14, %v2876_v38  ;;  %vm845_vm0 = vcmp.eq.f32.partialorder %v2830_v17, %v2876_v38  ;;  %vm896_vm1 = vcmp.lt.s32.totalorder %v895_v40, %v854_v41 }
 0x302   : > { %v855_v42 = vsel %vm843_vm14, %v2836_v19, 384  ;;  %v856_v43 = vsel %vm844_vm15, %v2839_v20, 384  ;;  %v883_v45 = vcvt.s32.f32 %v881_v39  ;;  %v897_v46 = vsel %vm896_vm1, %v895_v40, %v854_v41 }
 0x303   : > { %vm912_vm2 = vcmp.lt.s32.totalorder %v855_v42, %v856_v43  ;;  %v899_v48 = vshra.s32 %v897_v46, 16  ;;  %v857_v50 = vsel %vm845_vm0, %v2848_v22, 384  ;;  %v882_v4 = vcvt.s32.f32 %v880_v62 }
 0x304   : > { %884 = vmin.xlane.f32.xlu1 %v883_v45  ;;  %v913_v51 = vsel %vm912_vm2, %v855_v42, %v856_v43  ;;  %v898_v5 = vand.u32 65535, %v897_v46 }
 0x305   : > { %vm914_vm3 = vcmp.lt.s32.totalorder %v913_v51, %v857_v50  ;;  %v901_v52 = vcvt.s32.f32 %v899_v48 }
 0x306   : > { %v915_v54 = vsel %vm914_vm3, %v913_v51, %v857_v50  ;;  %v900_v12 = vcvt.s32.f32 %v898_v5 }
 0x307   : > { %v917_v55 = vshra.s32 %v915_v54, 16  ;;  %902 = vmin.xlane.f32.xlu0 %v901_v52  ;;  %v916_v9 = vand.u32 65535, %v915_v54 }
 0x309   : > { %v919_v57 = vcvt.s32.f32 %v917_v55  ;;  %v918_v16 = vcvt.s32.f32 %v916_v9 }
 0x30b   : > { %920 = vmin.xlane.f32.xlu1 %v919_v57 }
 0x38c   : > { %v867_v60 = vpop.xlane.xlu0 %866 }
 0x38d   : > { %vm868_vm4 = vcmp.eq.f32.partialorder %v865_v36, %v867_v60  ;;  %v873_v0 = vcvt.f32.s32 %v867_v60 }
 0x38e   : > { %v869_v1 = vsel %vm868_vm4, %v864_v61, inf }
 0x38f   : > { %870 = vmin.xlane.f32.xlu0 %v869_v1  ;;  %v874_v25 = vshll.u32 %v873_v0, 16 }
 0x391   : > { %v885_v2 = vpop.xlane.xlu1 %884 }
 0x392   : > { %vm886_vm5 = vcmp.eq.f32.partialorder %v883_v45, %v885_v2  ;;  %v891_v7 = vcvt.f32.s32 %v885_v2 }
 0x393   : > { %v887_v8 = vsel %vm886_vm5, %v882_v4, inf }
 0x394   : > { %888 = vmin.xlane.f32.xlu1 %v887_v8  ;;  %v903_v10 = vpop.xlane.xlu0 %902  ;;  %v892_v29 = vshll.u32 %v891_v7, 16 }
 0x395   : > { %vm904_vm6 = vcmp.eq.f32.partialorder %v901_v52, %v903_v10  ;;  %v909_v31 = vcvt.f32.s32 %v903_v10  ;;  %v944_v52 = vmax.f32 %v2865_v30, 0.0 }
 0x396   : > { %v905_v13 = vsel %vm904_vm6, %v900_v12, inf }
 0x397   : > { %906 = vmin.xlane.f32.xlu0 %v905_v13  ;;  %v910_v41 = vshll.u32 %v909_v31, 16 }
 0x398   : > { %v921_v15 = vpop.xlane.xlu1 %920 }
 0x399   : > { %vm922_vm7 = vcmp.eq.f32.partialorder %v919_v57, %v921_v15  ;;  %v927_v42 = vcvt.f32.s32 %v921_v15 }
 0x39a   : > { %v923_v18 = vsel %vm922_vm7, %v918_v16, inf }
 0x39b   : > { %924 = vmin.xlane.f32.xlu1 %v923_v18  ;;  %v928_v54 = vshll.u32 %v927_v42, 16 }
 0x41c   : > { %v871_v23 = vpop.xlane.xlu0 %870 }
 0x41d   : > { %v872_v26 = vcvt.f32.s32 %v871_v23 }
 0x41f   : > { %v875_v27 = vadd.s32 %v874_v25, %v872_v26 }
 0x421   : > { %v889_v32 = vpop.xlane.xlu1 %888  ;;  %vm930_vm8 = vcmp.eq.s32.totalorder %v2836_v19, %v875_v27  ;;  %vm931_vm9 = vcmp.eq.s32.totalorder %v2839_v20, %v875_v27  ;;  %vm932_vm10 = vcmp.eq.s32.totalorder %v2848_v22, %v875_v27 }
 0x422   : > { %v890_v33 = vcvt.f32.s32 %v889_v32  ;;  %v2892_v34 = vsel %vm931_vm9, %v942_v28, 0.0  ;;  %v2894_v35 = vsel %vm932_vm10, %v942_v28, 0.0  ;;  %v2897_v36 = vsel %vm930_vm8, -inf, %v2799_v44 }
 0x423   : > { %v2900_v37 = vsel %vm931_vm9, -inf, %v2801_v47  ;;  %v2906_v40 = vsel %vm930_vm8, %v942_v28, 0.0  ;;  %v2909_v45 = vsel %vm932_vm10, -inf, %v2803_v49 }
 0x424   : > { %v2902_v21 = vadd.s32 %v892_v29, %v890_v33  ;;  %v970_v39 = vmax.f32 %v2897_v36, %v2900_v37  ;;  %v907_v43 = vpop.xlane.xlu0 %906 }
 0x425   : > { %v908_v46 = vcvt.f32.s32 %v907_v43 }
 0x426   : > { %v971_v44 = vmax.f32 %v970_v39, %v2909_v45  ;;  %vm933_vm11 = vcmp.eq.s32.totalorder %v2836_v19, %v2902_v21  ;;  %vm934_vm12 = vcmp.eq.s32.totalorder %v2839_v20, %v2902_v21  ;;  %vm935_vm13 = vcmp.eq.s32.totalorder %v2848_v22, %v2902_v21 }
 0x427   : > { %v2922_v47 = vsel %vm933_vm11, -inf, %v2807_v53  ;;  %v2928_v49 = vsel %vm934_vm12, -inf, %v2809_v56  ;;  %v911_v48 = vadd.s32 %v910_v41, %v908_v46  ;;  %v2937_v53 = vsel %vm935_vm13, -inf, %v2812_v59 }
 0x428   : > { %972 = vmax.xlane.f32.xlu0 %v971_v44  ;;  %v925_v50 = vpop.xlane.xlu1 %924  ;;  %v974_v51 = vmax.f32 %v2922_v47, %v2928_v49 }
 0x429   : > { %v926_v55 = vcvt.f32.s32 %v925_v50  ;;  %vm936_vm14 = vcmp.eq.s32.totalorder %v2836_v19, %v911_v48  ;;  %vm937_vm15 = vcmp.eq.s32.totalorder %v2839_v20, %v911_v48  ;;  %vm938_vm0 = vcmp.eq.s32.totalorder %v2848_v22, %v911_v48 }
 0x42a   : > { %v975_v57 = vmax.f32 %v974_v51, %v2937_v53  ;;  %v2945_v58 = vsel %vm937_vm15, %v944_v52, 0.0  ;;  %v2947_v30 = vsel %vm938_vm0, %v944_v52, 0.0  ;;  %v2950_v60 = vsel %vm936_vm14, -inf, %v2816_v63 }
 0x42b   : > { %v2943_v56 = vadd.s32 %v928_v54, %v926_v55  ;;  %v2953_v59 = vsel %vm937_vm15, -inf, %v2818_v3  ;;  %v2955_v61 = vsel %vm936_vm14, %v944_v52, 0.0  ;;  %v2966_v63 = vsel %vm938_vm0, -inf, %v2821_v6 }
 0x42c   : > { %976 = vmax.xlane.f32.xlu1 %v975_v57  ;;  %v978_v62 = vmax.f32 %v2950_v60, %v2953_v59 }
 0x42d   : > { %vm939_vm1 = vcmp.eq.s32.totalorder %v2836_v19, %v2943_v56  ;;  %vm940_vm2 = vcmp.eq.s32.totalorder %v2839_v20, %v2943_v56  ;;  %vm941_vm3 = vcmp.eq.s32.totalorder %v2848_v22, %v2943_v56 }
 0x42e   : > { %v2972_v3 = vsel %vm939_vm1, -inf, %v2825_v11  ;;  %v2978_v1 = vsel %vm940_vm2, -inf, %v2827_v14  ;;  %v979_v2 = vmax.f32 %v978_v62, %v2966_v63  ;;  %v2987_v6 = vsel %vm941_vm3, -inf, %v2830_v17 }
 0x42f   : > { %v982_v4 = vmax.f32 %v2972_v3, %v2978_v1 }
 0x430   : > { %980 = vmax.xlane.f32.xlu0 %v979_v2 }
 0x431   : > { %v983_v11 = vmax.f32 %v982_v4, %v2987_v6 }
 0x433   : > { %984 = vmax.xlane.f32.xlu1 %v983_v11 }
 0x4b5   : > { %v2990_v5 = vpop.xlane.xlu0 %972 }
 0x4b6   : > { %vm986_vm4 = vcmp.eq.f32.partialorder %v2897_v36, %v2990_v5  ;;  %vm987_vm5 = vcmp.eq.f32.partialorder %v2900_v37, %v2990_v5  ;;  %vm988_vm6 = vcmp.eq.f32.partialorder %v2909_v45, %v2990_v5 }
 0x4b7   : > { %v998_v14 = vsel %vm986_vm4, %v2836_v19, 384  ;;  %v999_v17 = vsel %vm987_vm5, %v2839_v20, 384  ;;  %v1000_v10 = vsel %vm988_vm6, %v2848_v22, 384 }
 0x4b8   : > { %vm1010_vm7 = vcmp.lt.s32.totalorder %v998_v14, %v999_v17 }
 0x4b9   : > { %v3000_v8 = vpop.xlane.xlu1 %976  ;;  %v1011_v9 = vsel %vm1010_vm7, %v998_v14, %v999_v17 }
 0x4ba   : > { %vm989_vm8 = vcmp.eq.f32.partialorder %v2922_v47, %v3000_v8  ;;  %vm990_vm9 = vcmp.eq.f32.partialorder %v2928_v49, %v3000_v8  ;;  %vm991_vm10 = vcmp.eq.f32.partialorder %v2937_v53, %v3000_v8  ;;  %vm1012_vm14 = vcmp.lt.s32.totalorder %v1011_v9, %v1000_v10 }
 0x4bb   : > { %v1001_v12 = vsel %vm989_vm8, %v2836_v19, 384  ;;  %v1002_v13 = vsel %vm990_vm9, %v2839_v20, 384  ;;  %v1013_v15 = vsel %vm1012_vm14, %v1011_v9, %v1000_v10  ;;  %v1003_v18 = vsel %vm991_vm10, %v2848_v22, 384 }
 0x4bc   : > { %vm1028_vm15 = vcmp.lt.s32.totalorder %v1001_v12, %v1002_v13  ;;  %v1015_v16 = vshra.s32 %v1013_v15, 16  ;;  %v1014_v54 = vand.u32 65535, %v1013_v15  ;;  %v1095_v21 = vmax.f32 %v3000_v8, 0.0 }
 0x4bd   : > { %v1029_v0 = vsel %vm1028_vm15, %v1001_v12, %v1002_v13  ;;  %v3012_v7 = vpop.xlane.xlu0 %980 }
 0x4be   : > { %vm1030_vm0 = vcmp.lt.s32.totalorder %v1029_v0, %v1003_v18  ;;  %vm992_vm4 = vcmp.eq.f32.partialorder %v2950_v60, %v3012_v7  ;;  %vm993_vm5 = vcmp.eq.f32.partialorder %v2953_v59, %v3012_v7  ;;  %vm994_vm6 = vcmp.eq.f32.partialorder %v2966_v63, %v3012_v7 }
 0x4bf   : > { %v1004_v23 = vsel %vm992_vm4, %v2836_v19, 384  ;;  %v1005_v25 = vsel %vm993_vm5, %v2839_v20, 384  ;;  %v1017_v26 = vcvt.s32.f32 %v1015_v16  ;;  %v1031_v28 = vsel %vm1030_vm0, %v1029_v0, %v1003_v18 }
 0x4c0   : > { %v3022_v27 = vpop.xlane.xlu1 %984  ;;  %v1033_v32 = vshra.s32 %v1031_v28, 16  ;;  %v1006_v33 = vsel %vm994_vm6, %v2848_v22, 384  ;;  %vm1046_vm10 = vcmp.lt.s32.totalorder %v1004_v23, %v1005_v25  ;;  %v1016_v57 = vcvt.s32.f32 %v1014_v54 }
 0x4c1   : > { %vm995_vm7 = vcmp.eq.f32.partialorder %v2972_v3, %v3022_v27  ;;  %vm996_vm8 = vcmp.eq.f32.partialorder %v2978_v1, %v3022_v27  ;;  %vm997_vm9 = vcmp.eq.f32.partialorder %v2987_v6, %v3022_v27  ;;  %1018 = vmin.xlane.f32.xlu0 %v1017_v26  ;;  %v1047_v41 = vsel %vm1046_vm10, %v1004_v23, %v1005_v25 }
 0x4c2   : > { %v1007_v29 = vsel %vm995_vm7, %v2836_v19, 384  ;;  %v1008_v31 = vsel %vm996_vm8, %v2839_v20, 384  ;;  %v1035_v39 = vcvt.s32.f32 %v1033_v32  ;;  %v1009_v42 = vsel %vm997_vm9, %v2848_v22, 384 }
 0x4c3   : > { %vm1064_vm14 = vcmp.lt.s32.totalorder %v1007_v29, %v1008_v31  ;;  %vm1048_vm15 = vcmp.lt.s32.totalorder %v1047_v41, %v1006_v33  ;;  %v1032_v62 = vand.u32 65535, %v1031_v28 }
 0x4c4   : > { %v1065_v43 = vsel %vm1064_vm14, %v1007_v29, %v1008_v31  ;;  %1036 = vmin.xlane.f32.xlu1 %v1035_v39  ;;  %v1049_v46 = vsel %vm1048_vm15, %v1047_v41, %v1006_v33  ;;  %v945_v31 = vmax.f32 %v2876_v38, 0.0  ;;  %v1094_v41 = vmax.f32 %v2990_v5, 0.0 }
 0x4c5   : > { %vm1066_vm0 = vcmp.lt.s32.totalorder %v1065_v43, %v1009_v42  ;;  %v1051_v48 = vshra.s32 %v1049_v46, 16  ;;  %v1034_v11 = vcvt.s32.f32 %v1032_v62  ;;  %v1050_v14 = vand.u32 65535, %v1049_v46 }
 0x4c6   : > { %v1067_v44 = vsel %vm1066_vm0, %v1065_v43, %v1009_v42 }
 0x4c7   : > { %v1069_v50 = vshra.s32 %v1067_v44, 16  ;;  %v1053_v51 = vcvt.s32.f32 %v1051_v48  ;;  %v1068_v17 = vand.u32 65535, %v1067_v44  ;;  %v1052_v12 = vcvt.s32.f32 %v1050_v14 }
 0x4c9   : > { %v1071_v52 = vcvt.s32.f32 %v1069_v50  ;;  %1054 = vmin.xlane.f32.xlu0 %v1053_v51  ;;  %v1070_v16 = vcvt.s32.f32 %v1068_v17  ;;  %v956_v17 = vsel %vm940_vm2, %v945_v31, 0.0 }
 0x4cb   : > { %1072 = vmin.xlane.f32.xlu1 %v1071_v52 }
 0x54e   : > { %v1019_v55 = vpop.xlane.xlu0 %1018 }
 0x54f   : > { %vm1020_vm4 = vcmp.eq.f32.partialorder %v1017_v26, %v1019_v55  ;;  %v1025_v0 = vcvt.f32.s32 %v1019_v55  ;;  %v943_v26 = vmax.f32 %v2854_v24, 0.0 }
 0x550   : > { %v1021_v2 = vsel %vm1020_vm4, %v1016_v57, inf }
 0x551   : > { %1022 = vmin.xlane.f32.xlu0 %v1021_v2  ;;  %v1037_v4 = vpop.xlane.xlu1 %1036  ;;  %v1026_v28 = vshll.u32 %v1025_v0, 16  ;;  %v950_v32 = vsel %vm934_vm12, %v943_v26, 0.0  ;;  %v951_v33 = vsel %vm935_vm13, %v943_v26, 0.0  ;;  %v949_v38 = vsel %vm933_vm11, %v943_v26, 0.0 }
 0x552   : > { %vm1038_vm5 = vcmp.eq.f32.partialorder %v1035_v39, %v1037_v4  ;;  %v1043_v23 = vcvt.f32.s32 %v1037_v4 }
 0x553   : > { %v1039_v9 = vsel %vm1038_vm5, %v1034_v11, inf }
 0x554   : > { %1040 = vmin.xlane.f32.xlu1 %v1039_v9  ;;  %v1044_v42 = vshll.u32 %v1043_v23, 16 }
 0x556   : > { %v1055_v10 = vpop.xlane.xlu0 %1054 }
 0x557   : > { %vm1056_vm6 = vcmp.eq.f32.partialorder %v1053_v51, %v1055_v10  ;;  %v1061_v43 = vcvt.f32.s32 %v1055_v10 }
 0x558   : > { %v1073_v13 = vpop.xlane.xlu1 %1072  ;;  %v1057_v15 = vsel %vm1056_vm6, %v1052_v12, inf }
 0x559   : > { %vm1074_vm7 = vcmp.eq.f32.partialorder %v1071_v52, %v1073_v13  ;;  %1058 = vmin.xlane.f32.xlu0 %v1057_v15  ;;  %v1079_v46 = vcvt.f32.s32 %v1073_v13  ;;  %v1096_v13 = vmax.f32 %v3012_v7, 0.0 }
 0x55a   : > { %v1075_v18 = vsel %vm1074_vm7, %v1070_v16, inf }
 0x55b   : > { %1076 = vmin.xlane.f32.xlu1 %v1075_v18  ;;  %v1080_v57 = vshll.u32 %v1079_v46, 16  ;;  %v1097_v18 = vmax.f32 %v3022_v27, 0.0 }
 0x5de   : > { %v1023_v25 = vpop.xlane.xlu0 %1022 }
 0x5df   : > { %v1024_v29 = vcvt.f32.s32 %v1023_v25 }
 0x5e1   : > { %v1027_v39 = vadd.s32 %v1026_v28, %v1024_v29  ;;  %v1041_v44 = vpop.xlane.xlu1 %1040 }
 0x5e2   : > { %v1042_v24 = vcvt.f32.s32 %v1041_v44 }
 0x5e3   : > { %vm1082_vm8 = vcmp.eq.s32.totalorder %v2836_v19, %v1027_v39  ;;  %vm1083_vm9 = vcmp.eq.s32.totalorder %v2839_v20, %v1027_v39  ;;  %vm1084_vm10 = vcmp.eq.s32.totalorder %v2848_v22, %v1027_v39 }
 0x5e4   : > { %v3050_v48 = vsel %vm1082_vm8, -inf, %v2897_v36  ;;  %v3053_v5 = vsel %vm1083_vm9, -inf, %v2900_v37  ;;  %v3056_v50 = vsel %vm1082_vm8, %v1094_v41, %v2906_v40  ;;  %v1045_v51 = vadd.s32 %v1044_v42, %v1042_v24 }
 0x5e5   : > { %v1122_v52 = vmax.f32 %v3050_v48, %v3053_v5  ;;  %v3061_v54 = vsel %vm1083_vm9, %v1094_v41, %v2892_v34  ;;  %v3064_v55 = vsel %vm1084_vm10, %v1094_v41, %v2894_v35  ;;  %v1062_v36 = vshll.u32 %v1061_v43, 16 }
 0x5e6   : > { %v3068_v37 = vsel %vm1084_vm10, -inf, %v2909_v45  ;;  %v1059_v62 = vpop.xlane.xlu0 %1058  ;;  %vm1085_vm11 = vcmp.eq.s32.totalorder %v2836_v19, %v1045_v51  ;;  %vm1086_vm12 = vcmp.eq.s32.totalorder %v2839_v20, %v1045_v51  ;;  %vm1087_vm13 = vcmp.eq.s32.totalorder %v2848_v22, %v1045_v51 }
 0x5e7   : > { %v1123_v40 = vmax.f32 %v1122_v52, %v3068_v37  ;;  %v1060_v34 = vcvt.f32.s32 %v1059_v62  ;;  %v3076_v8 = vsel %vm1087_vm13, %v1095_v21, %v951_v33  ;;  %v3079_v4 = vsel %vm1085_vm11, -inf, %v2922_v47 }
 0x5e8   : > { %v1077_v2 = vpop.xlane.xlu1 %1076  ;;  %v3082_v45 = vsel %vm1086_vm12, -inf, %v2928_v49  ;;  %v3084_v11 = vsel %vm1086_vm12, %v1095_v21, %v950_v32  ;;  %v3086_v14 = vsel %vm1085_vm11, %v1095_v21, %v949_v38  ;;  %v957_v47 = vsel %vm941_vm3, %v945_v31, 0.0 }
 0x5e9   : > { %v1078_v35 = vcvt.f32.s32 %v1077_v2  ;;  %1124 = vmax.xlane.f32.xlu0 %v1123_v40  ;;  %v1063_v9 = vadd.s32 %v1062_v36, %v1060_v34  ;;  %v1126_v12 = vmax.f32 %v3079_v4, %v3082_v45  ;;  %v955_v49 = vsel %vm939_vm1, %v945_v31, 0.0 }
 0x5ea   : > { %v3103_v16 = vsel %vm1087_vm13, -inf, %v2937_v53 }
 0x5eb   : > { %v1081_v10 = vadd.s32 %v1080_v57, %v1078_v35  ;;  %v1127_v15 = vmax.f32 %v1126_v12, %v3103_v16  ;;  %vm1088_vm2 = vcmp.eq.s32.totalorder %v2836_v19, %v1063_v9  ;;  %vm1089_vm14 = vcmp.eq.s32.totalorder %v2839_v20, %v1063_v9 }
 0x5ec   : > { %vm1090_vm15 = vcmp.eq.s32.totalorder %v2848_v22, %v1063_v9  ;;  %v3113_v56 = vsel %vm1088_vm2, -inf, %v2950_v60  ;;  %v3116_v7 = vsel %vm1089_vm14, -inf, %v2953_v59  ;;  %v3135_v0 = vsel %vm1089_vm14, %v1096_v13, %v2945_v58 }
 0x5ed   : > { %vm1091_vm1 = vcmp.eq.s32.totalorder %v2836_v19, %v1081_v10  ;;  %1128 = vmax.xlane.f32.xlu1 %v1127_v15  ;;  %v1130_v53 = vmax.f32 %v3113_v56, %v3116_v7  ;;  %vm1092_vm3 = vcmp.eq.s32.totalorder %v2839_v20, %v1081_v10  ;;  %vm1093_vm0 = vcmp.eq.s32.totalorder %v2848_v22, %v1081_v10 }
 0x5ee   : > { %v3126_v27 = vsel %vm1091_vm1, -inf, %v2972_v3  ;;  %v3129_v60 = vsel %vm1090_vm15, -inf, %v2966_v63  ;;  %v3132_v59 = vsel %vm1092_vm3, -inf, %v2978_v1  ;;  %v3138_v23 = vsel %vm1090_vm15, %v1096_v13, %v2947_v30 }
 0x5ef   : > { %v1131_v25 = vmax.f32 %v1130_v53, %v3129_v60  ;;  %v1134_v26 = vmax.f32 %v3126_v27, %v3132_v59  ;;  %v3146_v3 = vsel %vm1088_vm2, %v1096_v13, %v2955_v61  ;;  %v3148_v63 = vsel %vm1092_vm3, %v1097_v18, %v956_v17 }
 0x5f0   : > { %v3151_v1 = vsel %vm1093_vm0, -inf, %v2987_v6  ;;  %v3153_v58 = vsel %vm1093_vm0, %v1097_v18, %v957_v47  ;;  %v3157_v30 = vsel %vm1091_vm1, %v1097_v18, %v955_v49 }
 0x5f1   : > { %1132 = vmax.xlane.f32.xlu0 %v1131_v25  ;;  %v1135_v28 = vmax.f32 %v1134_v26, %v3151_v1 }
 0x5f3   : > { %1136 = vmax.xlane.f32.xlu1 %v1135_v28 }
 0x676   : > { %v3160_v29 = vpop.xlane.xlu0 %1124 }
 0x677   : > { %vm1138_vm4 = vcmp.eq.f32.partialorder %v3050_v48, %v3160_v29  ;;  %vm1139_vm5 = vcmp.eq.f32.partialorder %v3053_v5, %v3160_v29  ;;  %vm1140_vm6 = vcmp.eq.f32.partialorder %v3068_v37, %v3160_v29 }
 0x678   : > { %v1150_v61 = vsel %vm1138_vm4, %v2836_v19, 384  ;;  %v1151_v6 = vsel %vm1139_vm5, %v2839_v20, 384  ;;  %v1152_v31 = vsel %vm1140_vm6, %v2848_v22, 384 }
 0x679   : > { %vm1162_vm7 = vcmp.lt.s32.totalorder %v1150_v61, %v1151_v6 }
 0x67a   : > { %v1163_v32 = vsel %vm1162_vm7, %v1150_v61, %v1151_v6  ;;  %v3171_v33 = vpop.xlane.xlu1 %1128 }
 0x67b   : > { %vm1164_vm8 = vcmp.lt.s32.totalorder %v1163_v32, %v1152_v31  ;;  %vm1141_vm9 = vcmp.eq.f32.partialorder %v3079_v4, %v3171_v33  ;;  %vm1142_vm10 = vcmp.eq.f32.partialorder %v3082_v45, %v3171_v33  ;;  %vm1143_vm11 = vcmp.eq.f32.partialorder %v3103_v16, %v3171_v33 }
 0x67c   : > { %v1153_v39 = vsel %vm1141_vm9, %v2836_v19, 384  ;;  %v1154_v41 = vsel %vm1142_vm10, %v2839_v20, 384  ;;  %v1165_v42 = vsel %vm1164_vm8, %v1163_v32, %v1152_v31  ;;  %v1155_v24 = vsel %vm1143_vm11, %v2848_v22, 384 }
 0x67d   : > { %v1167_v43 = vshra.s32 %v1165_v42, 16  ;;  %vm1180_vm12 = vcmp.lt.s32.totalorder %v1153_v39, %v1154_v41  ;;  %v1166_v18 = vand.u32 65535, %v1165_v42 }
 0x67e   : > { %v3181_v46 = vpop.xlane.xlu0 %1132  ;;  %v1181_v44 = vsel %vm1180_vm12, %v1153_v39, %v1154_v41 }
 0x67f   : > { %vm1144_vm13 = vcmp.eq.f32.partialorder %v3113_v56, %v3181_v46  ;;  %vm1145_vm2 = vcmp.eq.f32.partialorder %v3116_v7, %v3181_v46  ;;  %v1169_v52 = vcvt.s32.f32 %v1167_v43  ;;  %vm1182_vm14 = vcmp.lt.s32.totalorder %v1181_v44, %v1155_v24 }
 0x680   : > { %v1156_v38 = vsel %vm1144_vm13, %v2836_v19, 384  ;;  %v1157_v51 = vsel %vm1145_vm2, %v2839_v20, 384  ;;  %v3190_v21 = vpop.xlane.xlu1 %1136  ;;  %vm1146_vm15 = vcmp.eq.f32.partialorder %v3129_v60, %v3181_v46  ;;  %v1183_v62 = vsel %vm1182_vm14, %v1181_v44, %v1155_v24 }
 0x681   : > { %vm1147_vm1 = vcmp.eq.f32.partialorder %v3126_v27, %v3190_v21  ;;  %vm1148_vm3 = vcmp.eq.f32.partialorder %v3132_v59, %v3190_v21  ;;  %vm1149_vm0 = vcmp.eq.f32.partialorder %v3151_v1, %v3190_v21  ;;  %1170 = vmin.xlane.f32.xlu0 %v1169_v52  ;;  %v1185_v40 = vshra.s32 %v1183_v62, 16 }
 0x682   : > { %v1159_v36 = vsel %vm1147_vm1, %v2836_v19, 384  ;;  %v1160_v57 = vsel %vm1148_vm3, %v2839_v20, 384  ;;  %vm1198_vm4 = vcmp.lt.s32.totalorder %v1156_v38, %v1157_v51  ;;  %v1158_v2 = vsel %vm1146_vm15, %v2848_v22, 384 }
 0x683   : > { %vm1216_vm5 = vcmp.lt.s32.totalorder %v1159_v36, %v1160_v57  ;;  %v1199_v34 = vsel %vm1198_vm4, %v1156_v38, %v1157_v51  ;;  %v1161_v35 = vsel %vm1149_vm0, %v2848_v22, 384  ;;  %v1187_v9 = vcvt.s32.f32 %v1185_v40 }
 0x684   : > { %v1217_v17 = vsel %vm1216_vm5, %v1159_v36, %v1160_v57  ;;  %vm1200_vm6 = vcmp.lt.s32.totalorder %v1199_v34, %v1158_v2  ;;  %v1168_v25 = vcvt.s32.f32 %v1166_v18  ;;  %v1184_v26 = vand.u32 65535, %v1183_v62 }
 0x685   : > { %vm1218_vm7 = vcmp.lt.s32.totalorder %v1217_v17, %v1161_v35  ;;  %v1201_v10 = vsel %vm1200_vm6, %v1199_v34, %v1158_v2  ;;  %1188 = vmin.xlane.f32.xlu1 %v1187_v9  ;;  %v1246_v2 = vmax.f32 %v3160_v29, 0.0 }
 0x686   : > { %v1219_v12 = vsel %vm1218_vm7, %v1217_v17, %v1161_v35  ;;  %v1203_v47 = vshra.s32 %v1201_v10, 16  ;;  %v1186_v6 = vcvt.s32.f32 %v1184_v26  ;;  %v1202_v31 = vand.u32 65535, %v1201_v10 }
 0x687   : > { %v1221_v49 = vshra.s32 %v1219_v12, 16  ;;  %v1220_v32 = vand.u32 65535, %v1219_v12 }
 0x688   : > { %v1205_v13 = vcvt.s32.f32 %v1203_v47  ;;  %v1204_v43 = vcvt.s32.f32 %v1202_v31 }
 0x689   : > { %v1223_v15 = vcvt.s32.f32 %v1221_v49  ;;  %v1222_v24 = vcvt.s32.f32 %v1220_v32 }
 0x68a   : > { %1206 = vmin.xlane.f32.xlu0 %v1205_v13 }
 0x68b   : > { %1224 = vmin.xlane.f32.xlu1 %v1223_v15 }
 0x70e   : > { %v1171_v53 = vpop.xlane.xlu0 %1170 }
 0x70f   : > { %vm1172_vm8 = vcmp.eq.f32.partialorder %v1169_v52, %v1171_v53  ;;  %v1177_v51 = vcvt.f32.s32 %v1171_v53 }
 0x710   : > { %v1173_v28 = vsel %vm1172_vm8, %v1168_v25, inf  ;;  %v1247_v25 = vmax.f32 %v3171_v33, 0.0 }
 0x711   : > { %1174 = vmin.xlane.f32.xlu0 %v1173_v28  ;;  %v1178_v36 = vshll.u32 %v1177_v51, 16 }
 0x712   : > { %v1189_v61 = vpop.xlane.xlu1 %1188 }
 0x713   : > { %vm1190_vm9 = vcmp.eq.f32.partialorder %v1187_v9, %v1189_v61  ;;  %v1195_v62 = vcvt.f32.s32 %v1189_v61 }
 0x714   : > { %v1191_v39 = vsel %vm1190_vm9, %v1186_v6, inf }
 0x715   : > { %1192 = vmin.xlane.f32.xlu1 %v1191_v39  ;;  %v1196_v9 = vshll.u32 %v1195_v62, 16  ;;  %v1248_v39 = vmax.f32 %v3181_v46, 0.0 }
 0x717   : > { %v1207_v41 = vpop.xlane.xlu0 %1206 }
 0x718   : > { %v1225_v44 = vpop.xlane.xlu1 %1224  ;;  %vm1208_vm10 = vcmp.eq.f32.partialorder %v1205_v13, %v1207_v41  ;;  %v1213_v34 = vcvt.f32.s32 %v1207_v41 }
 0x719   : > { %vm1226_vm11 = vcmp.eq.f32.partialorder %v1223_v15, %v1225_v44  ;;  %v1209_v42 = vsel %vm1208_vm10, %v1204_v43, inf  ;;  %v1231_v35 = vcvt.f32.s32 %v1225_v44 }
 0x71a   : > { %v1227_v38 = vsel %vm1226_vm11, %v1222_v24, inf  ;;  %1210 = vmin.xlane.f32.xlu0 %v1209_v42  ;;  %v1214_v26 = vshll.u32 %v1213_v34, 16 }
 0x71b   : > { %1228 = vmin.xlane.f32.xlu1 %v1227_v38  ;;  %v1232_v28 = vshll.u32 %v1231_v35, 16 }
 0x79e   : > { %v1175_v52 = vpop.xlane.xlu0 %1174 }
 0x79f   : > { %v1176_v57 = vcvt.f32.s32 %v1175_v52 }
 0x7a1   : > { %v1179_v40 = vadd.s32 %v1178_v36, %v1176_v57 }
 0x7a2   : > { %v1193_v17 = vpop.xlane.xlu1 %1192 }
 0x7a3   : > { %vm1234_vm12 = vcmp.eq.s32.totalorder %v2836_v19, %v1179_v40  ;;  %vm1235_vm13 = vcmp.eq.s32.totalorder %v2839_v20, %v1179_v40  ;;  %vm1236_vm2 = vcmp.eq.s32.totalorder %v2848_v22, %v1179_v40  ;;  %v1194_v10 = vcvt.f32.s32 %v1193_v17 }
 0x7a4   : > { %v1262_v12 = vsel %vm1234_vm12, -inf, %v3050_v48  ;;  %v1263_v47 = vsel %vm1235_vm13, -inf, %v3053_v5  ;;  %v3211_v13 = vsel %vm1234_vm12, %v1246_v2, %v3056_v50  ;;  %v3214_v29 = vsel %vm1235_vm13, %v1246_v2, %v3061_v54 }
 0x7a5   : > { %v1274_v49 = vmax.f32 %v1262_v12, %v1263_v47  ;;  %v3217_v15 = vsel %vm1236_vm2, %v1246_v2, %v3064_v55  ;;  %v1197_v18 = vadd.s32 %v1196_v9, %v1194_v10  ;;  %v1264_v53 = vsel %vm1236_vm2, -inf, %v3068_v37 }
 0x7a7   : > { %v1211_v48 = vpop.xlane.xlu0 %1210  ;;  %v1275_v61 = vmax.f32 %v1274_v49, %v1264_v53  ;;  %vm1237_vm14 = vcmp.eq.s32.totalorder %v2836_v19, %v1197_v18  ;;  %vm1238_vm15 = vcmp.eq.s32.totalorder %v2839_v20, %v1197_v18  ;;  %vm1239_vm1 = vcmp.eq.s32.totalorder %v2848_v22, %v1197_v18 }
 0x7a8   : > { %v1229_v5 = vpop.xlane.xlu1 %1228  ;;  %v1212_v6 = vcvt.f32.s32 %v1211_v48  ;;  %v1265_v50 = vsel %vm1237_vm14, -inf, %v3079_v4  ;;  %v1266_v54 = vsel %vm1238_vm15, -inf, %v3082_v45  ;;  %v3227_v55 = vsel %vm1238_vm15, %v1247_v25, %v3084_v11 }
 0x7a9   : > { %v1230_v31 = vcvt.f32.s32 %v1229_v5  ;;  %1276 = vmax.xlane.f32.xlu0 %v1275_v61  ;;  %v3230_v32 = vsel %vm1239_vm1, %v1247_v25, %v3076_v8  ;;  %v1267_v41 = vsel %vm1239_vm1, -inf, %v3103_v16  ;;  %v1278_v43 = vmax.f32 %v1265_v50, %v1266_v54 }
 0x7aa   : > { %v1215_v37 = vadd.s32 %v1214_v26, %v1212_v6  ;;  %v3235_v44 = vsel %vm1237_vm14, %v1247_v25, %v3086_v14  ;;  %v1249_v4 = vmax.f32 %v3190_v21, 0.0 }
 0x7ab   : > { %v1233_v33 = vadd.s32 %v1232_v28, %v1230_v31  ;;  %v1279_v8 = vmax.f32 %v1278_v43, %v1267_v41  ;;  %v1427_v43 = vld [vmem:[#allocation8 + $0x8] sm:$0xff] }
 0x7ac   : > { %vm1240_vm3 = vcmp.eq.s32.totalorder %v2836_v19, %v1215_v37  ;;  %vm1241_vm0 = vcmp.eq.s32.totalorder %v2839_v20, %v1215_v37  ;;  %vm1242_vm4 = vcmp.eq.s32.totalorder %v2848_v22, %v1215_v37  ;;  %v1442_v37 = vld [vmem:[#allocation8 + $0x80] sm:$0xff] }
 0x7ad   : > { %vm1243_vm5 = vcmp.eq.s32.totalorder %v2836_v19, %v1233_v33  ;;  %v1268_v45 = vsel %vm1240_vm3, -inf, %v3113_v56  ;;  %v1269_v11 = vsel %vm1241_vm0, -inf, %v3116_v7  ;;  %vm1244_vm6 = vcmp.eq.s32.totalorder %v2839_v20, %v1233_v33  ;;  %1280 = vmax.xlane.f32.xlu1 %v1279_v8  ;;  %v1459_v8 = vld [vmem:[#allocation8 + $0x108] sm:$0xff] }
 0x7ae   : > { %v1282_v16 = vmax.f32 %v1268_v45, %v1269_v11  ;;  %vm1245_vm7 = vcmp.eq.s32.totalorder %v2848_v22, %v1233_v33  ;;  %v1271_v14 = vsel %vm1243_vm5, -inf, %v3126_v27  ;;  %v1270_v46 = vsel %vm1242_vm4, -inf, %v3129_v60  ;;  %v1443_v33 = vld [vmem:[#allocation8 + $0x88] sm:$0xff] }
 0x7af   : > { %v1272_v21 = vsel %vm1244_vm6, -inf, %v3132_v59  ;;  %v3254_v24 = vsel %vm1241_vm0, %v1248_v39, %v3135_v0  ;;  %v3257_v56 = vsel %vm1242_vm4, %v1248_v39, %v3138_v23  ;;  %v3262_v38 = vsel %vm1240_vm3, %v1248_v39, %v3146_v3  ;;  %v1426_v39 = vld [vmem:[#allocation8] sm:$0xff] }
 0x7b0   : > { %v1283_v7 = vmax.f32 %v1282_v16, %v1270_v46  ;;  %v1286_v42 = vmax.f32 %v1271_v14, %v1272_v21  ;;  %v3265_v27 = vsel %vm1244_vm6, %v1249_v4, %v3148_v63  ;;  %v1273_v60 = vsel %vm1245_vm7, -inf, %v3151_v1  ;;  %v1444_v16 = vld [vmem:[#allocation8 + $0x90] sm:$0xff] }
 0x7b1   : > { %v3269_v59 = vsel %vm1245_vm7, %v1249_v4, %v3153_v58  ;;  %v3274_v0 = vsel %vm1243_vm5, %v1249_v4, %v3157_v30  ;;  %v1458_v4 = vld [vmem:[#allocation8 + $0x100] sm:$0xff] }
 0x7b2   : > { %1284 = vmax.xlane.f32.xlu0 %v1283_v7  ;;  %v1287_v23 = vmax.f32 %v1286_v42, %v1273_v60  ;;  %v1429_v7 = vld [vmem:[#allocation8 + $0x18] sm:$0xff]  ;;  %v1460_v42 = vld [vmem:[#allocation8 + $0x110] sm:$0xff] }
 0x7b4   : > { %1288 = vmax.xlane.f32.xlu1 %v1287_v23 }
 0x836   : > { %v3276_v51 = vpop.xlane.xlu0 %1276 }
 0x837   : > { %vm1290_vm8 = vcmp.eq.f32.partialorder %v1262_v12, %v3276_v51  ;;  %vm1291_vm9 = vcmp.eq.f32.partialorder %v1263_v47, %v3276_v51  ;;  %vm1292_vm10 = vcmp.eq.f32.partialorder %v1264_v53, %v3276_v51 }
 0x838   : > { %v1302_v3 = vsel %vm1290_vm8, %v2836_v19, 384  ;;  %v1303_v63 = vsel %vm1291_vm9, %v2839_v20, 384  ;;  %v1304_v1 = vsel %vm1292_vm10, %v2848_v22, 384 }
 0x839   : > { %vm1314_vm11 = vcmp.lt.s32.totalorder %v1302_v3, %v1303_v63 }
 0x83a   : > { %v1315_v58 = vsel %vm1314_vm11, %v1302_v3, %v1303_v63  ;;  %v3284_v30 = vpop.xlane.xlu1 %1280  ;;  %v1446_v63 = vld [vmem:[#allocation8 + $0xa0] sm:$0xff] }
 0x83b   : > { %vm1316_vm12 = vcmp.lt.s32.totalorder %v1315_v58, %v1304_v1  ;;  %vm1293_vm13 = vcmp.eq.f32.partialorder %v1265_v50, %v3284_v30  ;;  %vm1294_vm2 = vcmp.eq.f32.partialorder %v1266_v54, %v3284_v30  ;;  %vm1295_vm14 = vcmp.eq.f32.partialorder %v1267_v41, %v3284_v30 }
 0x83c   : > { %v3286_v52 = vsel %vm1316_vm12, %v1315_v58, %v1304_v1  ;;  %v1305_v36 = vsel %vm1293_vm13, %v2836_v19, 384  ;;  %v1306_v57 = vsel %vm1294_vm2, %v2839_v20, 384  ;;  %v1307_v10 = vsel %vm1295_vm14, %v2848_v22, 384  ;;  %v1447_v1 = vld [vmem:[#allocation8 + $0xa8] sm:$0xff]  ;;  %v1430_v58 = vld [vmem:[#allocation8 + $0x20] sm:$0xff] }
 0x83d   : > { %v1319_v62 = vshra.s32 %v3286_v52, 16  ;;  %vm1332_vm15 = vcmp.lt.s32.totalorder %v1305_v36, %v1306_v57  ;;  %v2125_v41 = vpack.c.bf16 %v1443_v33, %v1442_v37  ;;  %v1466_v37 = vld [vmem:[#allocation8 + $0x140] sm:$0xff]  ;;  %v1467_v33 = vld [vmem:[#allocation8 + $0x148] sm:$0xff] }
 0x83e   : > { %v1333_v9 = vsel %vm1332_vm15, %v1305_v36, %v1306_v57  ;;  %v2133_v36 = vpack.c.bf16 %v1447_v1, %v1446_v63  ;;  %v1431_v57 = vld [vmem:[#allocation8 + $0x28] sm:$0xff] }
 0x83f   : > { %v3294_v40 = vpop.xlane.xlu0 %1284  ;;  %v3301_v35 = vcvt.s32.f32 %v1319_v62  ;;  %vm1334_vm7 = vcmp.lt.s32.totalorder %v1333_v9, %v1307_v10  ;;  %2126 = vmatprep.subr.bf16.mxu0 %v2125_v41  ;;  %v1462_v62 = vld [vmem:[#allocation8 + $0x120] sm:$0xff] }
 0x840   : > { %vm1296_vm1 = vcmp.eq.f32.partialorder %v1268_v45, %v3294_v40  ;;  %vm1297_vm3 = vcmp.eq.f32.partialorder %v1269_v11, %v3294_v40  ;;  %vm1298_vm0 = vcmp.eq.f32.partialorder %v1270_v46, %v3294_v40  ;;  %v3312_v49 = vsel %vm1334_vm7, %v1333_v9, %v1307_v10  ;;  %v1428_v46 = vld [vmem:[#allocation8 + $0x10] sm:$0xff]  ;;  %v1449_v10 = vld [vmem:[#allocation8 + $0xb8] sm:$0xff] }
 0x841   : > { %v1308_v2 = vsel %vm1296_vm1, %v2836_v19, 384  ;;  %v1309_v34 = vsel %vm1297_vm3, %v2839_v20, 384  ;;  %v3303_v17 = vpop.xlane.xlu1 %1288  ;;  %1322 = vmin.xlane.f32.xlu0 %v3301_v35  ;;  %v1310_v18 = vsel %vm1298_vm0, %v2848_v22, 384  ;;  %v1337_v53 = vshra.s32 %v3312_v49, 16  ;;  %v1448_v9 = vld [vmem:[#allocation8 + $0xb0] sm:$0xff] }
 0x842   : > { %vm1299_vm4 = vcmp.eq.f32.partialorder %v1271_v14, %v3303_v17  ;;  %vm1300_vm5 = vcmp.eq.f32.partialorder %v1272_v21, %v3303_v17  ;;  %vm1301_vm6 = vcmp.eq.f32.partialorder %v1273_v60, %v3303_v17  ;;  %vm1350_vm8 = vcmp.lt.s32.totalorder %v1308_v2, %v1309_v34  ;;  %v1445_v14 = vld [vmem:[#allocation8 + $0x98] sm:$0xff] }
 0x843   : > { %v1311_v12 = vsel %vm1299_vm4, %v2836_v19, 384  ;;  %v1312_v47 = vsel %vm1300_vm5, %v2839_v20, 384  ;;  %v1351_v25 = vsel %vm1350_vm8, %v1308_v2, %v1309_v34  ;;  %v1313_v26 = vsel %vm1301_vm6, %v2848_v22, 384  ;;  %v1461_v60 = vld [vmem:[#allocation8 + $0x118] sm:$0xff]  ;;  %v1463_v2 = vld [vmem:[#allocation8 + $0x128] sm:$0xff] }
 0x844   : > { %vm1368_vm9 = vcmp.lt.s32.totalorder %v1311_v12, %v1312_v47  ;;  %vm1352_vm10 = vcmp.lt.s32.totalorder %v1351_v25, %v1310_v18  ;;  %v3317_v48 = vcvt.s32.f32 %v1337_v53  ;;  %v2127_v45 = vpack.c.bf16 %v1427_v43, %v1426_v39  ;;  %v1434_v43 = vld [vmem:[#allocation8 + $0x40] sm:$0xff] }
 0x845   : > { %v1369_v28 = vsel %vm1368_vm9, %v1311_v12, %v1312_v47  ;;  %v3319_v61 = vsel %vm1352_vm10, %v1351_v25, %v1310_v18  ;;  %v2157_v11 = vpack.c.bf16 %v1459_v8, %v1458_v4  ;;  %v2129_v21 = vpack.c.bf16 %v1445_v14, %v1444_v16  ;;  %v1464_v12 = vld [vmem:[#allocation8 + $0x130] sm:$0xff]  ;;  %v1465_v47 = vld [vmem:[#allocation8 + $0x138] sm:$0xff]  ;;  %v1435_v4 = vld [vmem:[#allocation8 + $0x48] sm:$0xff] }
 0x846   : > { %vm1370_vm11 = vcmp.lt.s32.totalorder %v1369_v28, %v1313_v26  ;;  %v1355_v6 = vshra.s32 %v3319_v61, 16  ;;  %1340 = vmin.xlane.f32.xlu1 %v3317_v48  ;;  %2128 = vmatpush3.bf16.msra.mxu0 %v2127_v45  ;;  %v2131_v23 = vpack.c.bf16 %v1429_v7, %v1428_v46  ;;  %v2161_v3 = vpack.c.bf16 %v1461_v60, %v1460_v42  ;;  %v1432_v25 = vld [vmem:[#allocation8 + $0x30] sm:$0xff]  ;;  %v1469_v14 = vld [vmem:[#allocation8 + $0x158] sm:$0xff] }
 0x847   : > { %v3321_v5 = vsel %vm1370_vm11, %v1369_v28, %v1313_v26  ;;  %2158 = vmatprep.subr.bf16.mxu1 %v2157_v11  ;;  %2130 = vmatprep.subr.bf16.mxu0 %v2129_v21  ;;  %v2165_v34 = vpack.c.bf16 %v1463_v2, %v1462_v62  ;;  %v2135_v18 = vpack.c.bf16 %v1431_v57, %v1430_v58  ;;  %v1433_v26 = vld [vmem:[#allocation8 + $0x38] sm:$0xff]  ;;  %v1452_v45 = vld [vmem:[#allocation8 + $0xd0] sm:$0xff]  ;;  %v1318_v58 = vand.u32 65535, %v3286_v52 }
 0x848   : > { %v1373_v31 = vshra.s32 %v3321_v5, 16  ;;  %v3326_v50 = vcvt.s32.f32 %v1355_v6  ;;  %2160 = vmatpush3.bf16.msra.mxu1 %v2157_v11  ;;  %v2137_v53 = vpack.c.bf16 %v1449_v10, %v1448_v9  ;;  %v2169_v28 = vpack.c.bf16 %v1465_v47, %v1464_v12  ;;  %v1450_v6 = vld [vmem:[#allocation8 + $0xc0] sm:$0xff]  ;;  %v1453_v11 = vld [vmem:[#allocation8 + $0xd8] sm:$0xff]  ;;  %v1468_v16 = vld [vmem:[#allocation8 + $0x150] sm:$0xff] }
 0x849   : > { %2162 = vmatprep.subr.bf16.mxu1 %v2161_v3  ;;  %v2139_v39 = vpack.c.bf16 %v1433_v26, %v1432_v25  ;;  %v2173_v8 = vpack.c.bf16 %v1467_v33, %v1466_v37  ;;  %v2143_v46 = vpack.c.bf16 %v1435_v4, %v1434_v43  ;;  %v2145_v21 = vpack.c.bf16 %v1453_v11, %v1452_v45  ;;  %v1436_v7 = vld [vmem:[#allocation8 + $0x50] sm:$0xff]  ;;  %v1437_v42 = vld [vmem:[#allocation8 + $0x58] sm:$0xff]  ;;  %v1439_v26 = vld [vmem:[#allocation8 + $0x68] sm:$0xff] }
 0x84a   : > { %v3328_v54 = vcvt.s32.f32 %v1373_v31  ;;  %1358 = vmin.xlane.f32.xlu0 %v3326_v50  ;;  %2132 = vmatpush3.bf16.msra.mxu0 %v2131_v23  ;;  %v1451_v31 = vld [vmem:[#allocation8 + $0xc8] sm:$0xff]  ;;  %v2177_v60 = vpack.c.bf16 %v1469_v14, %v1468_v16  ;;  %v1454_v23 = vld [vmem:[#allocation8 + $0xe0] sm:$0xff]  ;;  %v2147_v63 = vpack.c.bf16 %v1437_v42, %v1436_v7  ;;  %v1320_v57 = vcvt.s32.f32 %v1318_v58  ;;  %v1457_v37 = vld [vmem:[#allocation8 + $0xf8] sm:$0xff] }
 0x84b   : > { %2134 = vmatprep.subr.bf16.mxu0 %v2133_v36  ;;  %v2141_v41 = vpack.c.bf16 %v1451_v31, %v1450_v6  ;;  %v1336_v2 = vand.u32 65535, %v3312_v49  ;;  %v1372_v12 = vand.u32 65535, %v3321_v5  ;;  %v1470_v5 = vld [vmem:[#allocation8 + $0x160] sm:$0xff]  ;;  %v1471_v6 = vld [vmem:[#allocation8 + $0x168] sm:$0xff]  ;;  %v1456_v31 = vld [vmem:[#allocation8 + $0xf0] sm:$0xff] }
 0x84c   : > { %1376 = vmin.xlane.f32.xlu1 %v3328_v54  ;;  %2164 = vmatpush3.bf16.msra.mxu1 %v2161_v3  ;;  %v1455_v3 = vld [vmem:[#allocation8 + $0xe8] sm:$0xff]  ;;  %v2153_v33 = vpack.c.bf16 %v1457_v37, %v1456_v31  ;;  %v1473_v43 = vld [vmem:[#allocation8 + $0x178] sm:$0xff] }
 0x84d   : > { %2166 = vmatprep.subr.bf16.mxu1 %v2165_v34  ;;  %v2149_v1 = vpack.c.bf16 %v1455_v3, %v1454_v23  ;;  %v1338_v10 = vcvt.s32.f32 %v1336_v2 }
 0x84e   : > { %2136 = vmatpush3.bf16.msra.mxu0 %v2135_v18 }
 0x84f   : > { %2138 = vmatprep.subr.bf16.mxu0 %v2137_v53 }
 0x850   : > { %2168 = vmatpush3.bf16.msra.mxu1 %v2165_v34  ;;  %v1354_v34 = vand.u32 65535, %v3319_v61  ;;  %v1438_v61 = vld [vmem:[#allocation8 + $0x60] sm:$0xff] }
 0x851   : > { %2170 = vmatprep.subr.bf16.mxu1 %v2169_v28 }
 0x852   : > { %2140 = vmatpush3.bf16.msra.mxu0 %v2139_v39  ;;  %v1356_v52 = vcvt.s32.f32 %v1354_v34  ;;  %v1441_v39 = vld [vmem:[#allocation8 + $0x78] sm:$0xff] }
 0x853   : > { %2142 = vmatprep.subr.bf16.mxu0 %v2141_v41 }
 0x854   : > { %2172 = vmatpush3.bf16.msra.mxu1 %v2169_v28  ;;  %v2151_v28 = vpack.c.bf16 %v1439_v26, %v1438_v61 }
 0x855   : > { %2174 = vmatprep.subr.bf16.mxu1 %v2173_v8 }
 0x856   : > { %2144 = vmatpush3.bf16.msra.mxu0 %v2143_v46 }
 0x857   : > { %2146 = vmatprep.subr.bf16.mxu0 %v2145_v21  ;;  %v1398_v21 = vmax.f32 %v3276_v51, 0.0 }
 0x858   : > { %2176 = vmatpush3.bf16.msra.mxu1 %v2173_v8 }
 0x859   : > { %2178 = vmatprep.subr.bf16.mxu1 %v2177_v60 }
 0x85a   : > { %2148 = vmatpush3.bf16.msra.mxu0 %v2147_v63 }
 0x85b   : > { %2150 = vmatprep.subr.bf16.mxu0 %v2149_v1 }
 0x85c   : > { %2180 = vmatpush3.bf16.msra.mxu1 %v2177_v60 }
 0x85e   : > { %2152 = vmatpush3.bf16.msra.mxu0 %v2151_v28 }
 0x85f   : > { %2154 = vmatprep.subr.bf16.mxu0 %v2153_v33 }
 0x8ce   : > { %v1323_v36 = vpop.xlane.xlu0 %1322 }
 0x8cf   : > { %vm1324_vm12 = vcmp.eq.f32.partialorder %v3301_v35, %v1323_v36  ;;  %v1374_v35 = vcvt.s32.f32 %v1372_v12  ;;  %v1329_v8 = vcvt.f32.s32 %v1323_v36  ;;  %v1400_v12 = vmax.f32 %v3294_v40, 0.0 }
 0x8d0   : > { %v1325_v62 = vsel %vm1324_vm12, %v1320_v57, inf }
 0x8d1   : > { %1326 = vmin.xlane.f32.xlu0 %v1325_v62  ;;  %v1330_v11 = vshll.u32 %v1329_v8, 16 }
 0x8d3   : > { %v1341_v9 = vpop.xlane.xlu1 %1340 }
 0x8d4   : > { %vm1342_vm13 = vcmp.eq.f32.partialorder %v3317_v48, %v1341_v9  ;;  %v2181_v48 = vpack.c.bf16 %v1471_v6, %v1470_v5  ;;  %v1347_v14 = vcvt.f32.s32 %v1341_v9 }
 0x8d5   : > { %v1343_v47 = vsel %vm1342_vm13, %v1338_v10, inf }
 0x8d6   : > { %1344 = vmin.xlane.f32.xlu1 %v1343_v47  ;;  %2182 = vmatprep.subr.bf16.mxu1 %v2181_v48  ;;  %v1348_v1 = vshll.u32 %v1347_v14, 16 }
 0x8d7   : > { %v1359_v18 = vpop.xlane.xlu0 %1358  ;;  %2184 = vmatpush3.bf16.msra.mxu1 %v2181_v48 }
 0x8d8   : > { %vm1360_vm2 = vcmp.eq.f32.partialorder %v3326_v50, %v1359_v18  ;;  %v1440_v50 = vld [vmem:[#allocation8 + $0x70] sm:$0xff]  ;;  %v1365_v7 = vcvt.f32.s32 %v1359_v18  ;;  %v1401_v18 = vmax.f32 %v3303_v17, 0.0 }
 0x8d9   : > { %v1377_v53 = vpop.xlane.xlu1 %1376  ;;  %v1361_v25 = vsel %vm1360_vm2, %v1356_v52, inf  ;;  %v2155_v41 = vpack.c.bf16 %v1441_v39, %v1440_v50 }
 0x8da   : > { %vm1378_vm14 = vcmp.eq.f32.partialorder %v3328_v54, %v1377_v53  ;;  %1362 = vmin.xlane.f32.xlu0 %v1361_v25  ;;  %v1472_v54 = vld [vmem:[#allocation8 + $0x170] sm:$0xff]  ;;  %v1383_v42 = vcvt.f32.s32 %v1377_v53 }
 0x8db   : > { %v1379_v49 = vsel %vm1378_vm14, %v1374_v35, inf  ;;  %2156 = vmatpush3.bf16.msra.mxu0 %v2155_v41  ;;  %v2185_v4 = vpack.c.bf16 %v1473_v43, %v1472_v54 }
 0x8dc   : > { %1380 = vmin.xlane.f32.xlu1 %v1379_v49  ;;  %v1384_v36 = vshll.u32 %v1383_v42, 16 }
 0x8dd   : > { %2186 = vmatprep.subr.bf16.mxu1 %v2185_v4 }
 0x8de   : > { %2188 = vmatpush3.bf16.msra.mxu1 %v2185_v4 }
 0x95e   : > { %v1327_v45 = vpop.xlane.xlu0 %1326 }
 0x95f   : > { %v1328_v16 = vcvt.f32.s32 %v1327_v45 }
 0x961   : > { %v1331_v46 = vadd.s32 %v1330_v11, %v1328_v16 }
 0x963   : > { %vm1386_vm15 = vcmp.eq.s32.totalorder %v2836_v19, %v1331_v46  ;;  %vm1387_vm1 = vcmp.eq.s32.totalorder %v2839_v20, %v1331_v46  ;;  %vm1388_vm3 = vcmp.eq.s32.totalorder %v2848_v22, %v1331_v46  ;;  %v1345_v60 = vpop.xlane.xlu1 %1344 }
 0x964   : > { %v1403_v23 = vsel %vm1387_vm1, %v1398_v21, %v3214_v29  ;;  %v1404_v3 = vsel %vm1388_vm3, %v1398_v21, %v3217_v15  ;;  %v1402_v63 = vsel %vm1386_vm15, %v1398_v21, %v3211_v13  ;;  %v1346_v58 = vcvt.f32.s32 %v1345_v60 }
 0x965   : > { %1415 = vst [vmem:[%s3348_s24 + $0x8] sm:$0xff] %v1403_v23  ;;  %1545 = vmatprep.mubr.f32.mxu0 %v1403_v23  ;;  %1416 = vst [vmem:[%s3348_s24 + $0x10] sm:$0xff] %v1404_v3  ;;  %1991 = vmatprep.mubr.f32.mxu1 %v1404_v3  ;;  %v1399_v15 = vmax.f32 %v3284_v30, 0.0  ;;  %v1366_v13 = vshll.u32 %v1365_v7, 16 }
 0x966   : > { %1414 = vst [vmem:[%s3348_s24] sm:$0xff] %v1402_v63  ;;  %1546 = vmatmul.mubr.f32.vlgmr.msra.gmra.mrb[16].mxu0 %v1402_v63  ;;  %v1349_v51 = vadd.s32 %v1348_v1, %v1346_v58 }
 0x967   : > { %v1363_v29 = vpop.xlane.xlu0 %1362 }
 0x968   : > { %v1364_v57 = vcvt.f32.s32 %v1363_v29  ;;  %vm1391_vm0 = vcmp.eq.s32.totalorder %v2848_v22, %v1349_v51  ;;  %vm1390_vm4 = vcmp.eq.s32.totalorder %v2839_v20, %v1349_v51  ;;  %vm1389_vm5 = vcmp.eq.s32.totalorder %v2836_v19, %v1349_v51 }
 0x969   : > { %v1381_v62 = vpop.xlane.xlu1 %1380  ;;  %v1406_v9 = vsel %vm1390_vm4, %v1399_v15, %v3227_v55  ;;  %v1407_v10 = vsel %vm1391_vm0, %v1399_v15, %v3230_v32  ;;  %v1405_v30 = vsel %vm1389_vm5, %v1399_v15, %v3235_v44 }
 0x96a   : > { %v1382_v2 = vcvt.f32.s32 %v1381_v62  ;;  %v1367_v34 = vadd.s32 %v1366_v13, %v1364_v57  ;;  %1418 = vst [vmem:[%s3348_s24 + $0x20] sm:$0xff] %v1406_v9  ;;  %1550 = vmatprep.mubr.f32.mxu0 %v1406_v9  ;;  %1419 = vst [vmem:[%s3348_s24 + $0x28] sm:$0xff] %v1407_v10  ;;  %1992 = vmatmul.mubr.f32.vlgmr.msra.gmra.mrb[8].mxu1 %v1407_v10 }
 0x96b   : > { %1417 = vst [vmem:[%s3348_s24 + $0x18] sm:$0xff] %v1405_v30  ;;  %1551 = vmatmul.mubr.f32.gmra.mrb[18].mxu0 %v1405_v30 }
 0x96c   : > { %v1385_v47 = vadd.s32 %v1384_v36, %v1382_v2  ;;  %vm1393_vm6 = vcmp.eq.s32.totalorder %v2839_v20, %v1367_v34  ;;  %vm1394_vm7 = vcmp.eq.s32.totalorder %v2848_v22, %v1367_v34  ;;  %vm1392_vm8 = vcmp.eq.s32.totalorder %v2836_v19, %v1367_v34 }
 0x96d   : > { %v1409_v55 = vsel %vm1393_vm6, %v1400_v12, %v3254_v24  ;;  %v1410_v32 = vsel %vm1394_vm7, %v1400_v12, %v3257_v56  ;;  %v1408_v44 = vsel %vm1392_vm8, %v1400_v12, %v3262_v38 }
 0x96e   : > { %vm1396_vm9 = vcmp.eq.s32.totalorder %v2839_v20, %v1385_v47  ;;  %1421 = vst [vmem:[%s3348_s24 + $0x38] sm:$0xff] %v1409_v55  ;;  %1555 = vmatprep.mubr.f32.mxu0 %v1409_v55  ;;  %1422 = vst [vmem:[%s3348_s24 + $0x40] sm:$0xff] %v1410_v32  ;;  %1994 = vmatprep.mubr.f32.mxu1 %v1410_v32  ;;  %vm1397_vm10 = vcmp.eq.s32.totalorder %v2848_v22, %v1385_v47 }
 0x96f   : > { %1420 = vst [vmem:[%s3348_s24 + $0x30] sm:$0xff] %v1408_v44  ;;  %v1412_v40 = vsel %vm1396_vm9, %v1401_v18, %v3265_v27  ;;  %vm1395_vm11 = vcmp.eq.s32.totalorder %v2836_v19, %v1385_v47  ;;  %v1413_v24 = vsel %vm1397_vm10, %v1401_v18, %v3269_v59  ;;  %1556 = vmatmul.mubr.f32.gmra.mrb[20].mxu0 %v1408_v44 }
 0x970   : > { %1424 = vst [vmem:[%s3348_s24 + $0x50] sm:$0xff] %v1412_v40  ;;  %v1411_v20 = vsel %vm1395_vm11, %v1401_v18, %v3274_v0  ;;  %1425 = vst [vmem:[%s3348_s24 + $0x58] sm:$0xff] %v1413_v24  ;;  %1995 = vmatmul.mubr.f32.gmra.mrb[10].mxu1 %v1413_v24  ;;  %1560 = vmatprep.mubr.f32.mxu0 %v1412_v40 }
 0x971   : > { %1423 = vst [vmem:[%s3348_s24 + $0x48] sm:$0xff] %v1411_v20 }
 0x973   : > { %1561 = vmatmul.mubr.f32.gmra.mrb[22].mxu0 %v1411_v20 }
 0x974   : > { %2411 = shalt.err (!%p2408_p4)
}
 0x975   : > { %s2412_s2 = scalar_lea.hbm %s3388_s10, 1536  ;;  %s2416_s19 = scalar_lea.hbm %s3478_s7, 3072 }
 0x976   : > { %p2413_p9 = scmp.ne.s32.totalorder %s3388_s10, %s2412_s2  ;;  %p2417_p8 = scmp.lt.u32.totalorder %s3388_s10, %s3478_s7 }
 0x977   : > { %p2418_p13 = scmp.lt.u32.totalorder %s2416_s19, %s2412_s2  ;;  %p2420_p10 = scmp.lt.u32.totalorder %s2412_s2, %s3388_s10 }
 0x978   : > { %p2414_p0 = pnand %p2413_p9, %p2713_p5 }
 0x979   : > { %p2419_p6 = por %p2418_p13, %p2417_p8 }
 0x97a   : > { %p2415_p11 = pneg %p2414_p0 }
 0x97b   : > { %p2421_p3 = por %p2420_p10, %p2419_p6 }
 0x97d   : > { %p2422_p7 = pnand %p2421_p3, %p2415_p11 }
 0x97f   : > { %2425 = shalt.err (!%p2422_p7)
}
 0x980   : > { %s2518_s12 = smov 384   ;;  %s2519_s11 = smov 24   ;;  %v1840_v56 = vld [vmem:[%s3472_s1] ss:$0 sm:$0xff] }
 0x981   : > { %2205 = dma.vmem_to_hbm [thread:$0]  (%p2713_p5), %s3390_s23, 1536, %s3388_s10, %s1656_s18, %s2518_s12, %s2518_s12, %s2519_s11  }
 0x982   : > { %s378_s2 = scalar_lea.vmem [#allocation11], %s1835_s26  ;;  %s1850_s10 = sshll.u32 %s2589_s9, 9 }
 0x983   : > { %s1691_s23 = sshll.u32 %s378_s2, 4  ;;  %s3427_s15 = scalar_lea.hbm %s3479_s8, %s1850_s10  ;;  %s3422_s23 = int_to_ptr.vmem [resolvable:$true] %s1691_s23 }
 0x984   : > { %s1661_s24 = scalar_lea.sflag [#allocation12], %s2764_s20  ;;  %s2426_s19 = scalar_lea.vmem %s3422_s23, 512 }
 0x985   : > { %p2427_p12 = scmp.ne.s32.totalorder %s3422_s23, %s2426_s19  ;;  %s2520_s9 = smov [#allocation11]  }
 0x986   : > { %s2430_s25 = sshll.u32 %s2520_s9, 4  ;;  %s2431_s25 = int_to_ptr.vmem [resolvable:$false] %s2430_s25 }
 0x987   : > { %p2428_p2 = pnand %p2427_p12, %p2713_p5  ;;  %s2432_s21 = scalar_lea.vmem %s2431_s25, 1024 }
 0x988   : > { %p2433_p4 = scmp.lt.s32.totalorder %s3422_s23, %s2431_s25  ;;  %p2434_p9 = scmp.lt.s32.totalorder %s2432_s21, %s2426_s19 }
 0x989   : > { %p2429_p1 = pneg %p2428_p2 }
 0x98a   : > { %p2435_p0 = por %p2434_p9, %p2433_p4 }
 0x98c   : > { %p2436_p11 = pnand %p2435_p0, %p2429_p1 }
 0xa39   : > { %v1927_v19 = vpop.f32.mrb[16].mxu0 }
 0xa3a   : > { %v1928_v22 = vpop.f32.mrb[17].mxu0 }
 0xa3b   : > { %v1929_v38 = vadd.f32 %v1928_v22, %v1927_v19 }
 0xa3d   : > { %v1548_v27 = vadd.f32 %v1929_v38, %v1840_v56  ;;  %v1993_v59 = vpop.f32.mrb[8].mxu1 }
 0xa3e   : > { %v1930_v0 = vpop.f32.mrb[18].mxu0  ;;  %v1632_v17 = vpop.f32.mrb[9].mxu1 }
 0xa3f   : > { %v1633_v52 = vadd.f32 %v1632_v17, %v1548_v27  ;;  %v1931_v53 = vpop.f32.mrb[19].mxu0 }
 0xa40   : > { %v1932_v35 = vadd.f32 %v1931_v53, %v1930_v0 }
 0xa41   : > { %1651 = vst [vmem:[%s378_s2] sm:$0xff] %v1633_v52 }
 0xa42   : > { %v1553_v25 = vadd.f32 %v1932_v35, %v1840_v56  ;;  %v1933_v49 = vpop.f32.mrb[20].mxu0 }
 0xa43   : > { %v1996_v61 = vpop.f32.mrb[10].mxu1  ;;  %v1934_v26 = vpop.f32.mrb[21].mxu0 }
 0xa44   : > { %v1642_v28 = vpop.f32.mrb[11].mxu1  ;;  %v1638_v5 = vadd.f32 %v1993_v59, %v1553_v25  ;;  %v1935_v6 = vadd.f32 %v1934_v26, %v1933_v49 }
 0xa46   : > { %1652 = vst [vmem:[%s378_s2 + $0x8] sm:$0xff] %v1638_v5  ;;  %v1936_v48 = vpop.f32.mrb[22].mxu0  ;;  %v1558_v31 = vadd.f32 %v1935_v6, %v1840_v56 }
 0xa47   : > { %v1937_v37 = vpop.f32.mrb[23].mxu0 }
 0xa48   : > { %v1643_v33 = vadd.f32 %v1642_v28, %v1558_v31  ;;  %v1938_v50 = vadd.f32 %v1937_v37, %v1936_v48 }
 0xa4a   : > { %1653 = vst [vmem:[%s378_s2 + $0x10] sm:$0xff] %v1643_v33  ;;  %v1563_v39 = vadd.f32 %v1938_v50, %v1840_v56 }
 0xa4c   : > { %v1648_v41 = vadd.f32 %v1996_v61, %v1563_v39 }
 0xa4e   : > { %1654 = vst [vmem:[%s378_s2 + $0x18] sm:$0xff] %v1648_v41 }
 0xa4f   : > { %2439 = shalt.err (!%p2436_p11)
}
 0xa50   : > { %s2440_s12 = scalar_lea.hbm %s3427_s15, 512  ;;  %s2444_s14 = scalar_lea.hbm %s3479_s8, 1024 }
 0xa51   : > { %p2441_p8 = scmp.ne.s32.totalorder %s3427_s15, %s2440_s12  ;;  %p2445_p10 = scmp.lt.u32.totalorder %s3427_s15, %s3479_s8 }
 0xa52   : > { %p2446_p3 = scmp.lt.u32.totalorder %s2444_s14, %s2440_s12  ;;  %p2448_p12 = scmp.lt.u32.totalorder %s2440_s12, %s3427_s15 }
 0xa53   : > { %p2442_p13 = pnand %p2441_p8, %p2713_p5 }
 0xa54   : > { %p2447_p7 = por %p2446_p3, %p2445_p10 }
 0xa55   : > { %p2443_p6 = pneg %p2442_p13 }
 0xa56   : > { %p2449_p2 = por %p2448_p12, %p2447_p7 }
 0xa58   : > { %p2450_p1 = pnand %p2449_p2, %p2443_p6 }
 0xa5a   : > { %2453 = shalt.err (!%p2450_p1)
}
 0xa5b   : > { %s2521_s26 = smov 128   ;;  %s2522_s18 = smov 8  }
 0xa5c   : > { %2206 = dma.vmem_to_hbm [thread:$0]  (%p2713_p5), %s3422_s23, 512, %s3427_s15, %s1661_s24, %s2521_s26, %s2521_s26, %s2522_s18  }
 0xa5d PF: > { %s3501_s19 = sld [smem:[#allocation18_spill]]  ;;  %s1706_s9 = sand.u32 1, %s2492_s27  }
 0xa5e   : > { %p3503_p9 = scmp.ge.s32.totalorder %s2504_s30, 2  ;;  %s1707_s25 = scalar_lea.sflag [#allocation4], %s1706_s9 }
 0xa63   : > { %p3502_p4 = scmp.ne.s32.totalorder %s3501_s19, 0 }
 0xa65   : > { %p2224_p0 = pnand %p3503_p9, %p3502_p4 }
 0xa67   : > { %2483 = dma.done.wait (!%p2224_p0), %s1707_s25, 1536  }
 0xa68   : > { %2485 = vsyncadd (!%p2224_p0), %s1707_s25, 4294965760  ;;  %s1716_s21 = scalar_lea.sflag [#allocation12], %s1706_s9 }
 0xa69   : > { %2487 = dma.done.wait (!%p2224_p0), %s1716_s21, 512  }
 0xa6a   : > { %2489 = vsyncadd (!%p2224_p0), %s1716_s21, 4294966784  ;;  %p27_p5 = scmp.ge.s32.totalorder %s2699_s17, 4   ;;  %s3504_s27 = smov %s2496_s28 }
 0xa6b   : > { %s3505_s28 = smov %s2500_s29  ;;  %s3506_s29 = smov %s2709_s22 }
 0xa6c   : > { %s3507_s30 = smov %s2699_s17  ;;  %29 = sbr.rel (!%p27_p5) target bundleno = 11 (0xb), region = 122 }
 0xa73   :  { %1721 = vsyncpa [#allocation3], 1 }
 0xa74   :  { %1723 = vsyncpa [#allocation3 + $0x1], 1 }
 0xa75   :  { %1724 = vsyncpa [#allocation6], 1 }
 0xa76   :  { %1725 = vsyncpa [#allocation9], 1 }
 0xa77   :  { %1726 = vsyncpa [#allocation4], 1 }
 0xa78   :  { %1728 = vsyncpa [#allocation4 + $0x1], 1 }
 0xa79   :  { %1729 = vsyncpa [#allocation12], 1 }
 0xa7a   :  { %1731 = vsyncpa [#allocation12 + $0x1], 1 }

// kernel: tpu_custom_call.1
= control target key start
LH: loop header
LB: loop body
LE: loop exit
PB: predicated region body
PF: predicated region fallthrough
CT: control target
= control target key end

     0   :  { %s3471_s0 = inlined_call_operand.hbm [shape: f32[64,128], index: 0, kind: input, shape index: {}]   ;;  %s3472_s1 = inlined_call_operand.vmem [shape: f32[1,128], index: 1, kind: input, shape index: {}]   ;;  %s3473_s2 = inlined_call_operand.hbm [shape: f32[128,256], index: 2, kind: input, shape index: {}]   ;;  %s3474_s3 = inlined_call_operand.vmem [shape: f32[1,256], index: 3, kind: input, shape index: {}]   ;;  %s3475_s4 = inlined_call_operand.hbm [shape: f32[256,384], index: 4, kind: input, shape index: {}]   ;;  %s3476_s5 = inlined_call_operand.vmem [shape: f32[1,384], index: 5, kind: input, shape index: {}]   ;;  %s3477_s6 = inlined_call_operand.hbm [shape: f32[384,128], index: 6, kind: input, shape index: {}]   ;;  %s3478_s7 = inlined_call_operand.hbm [shape: f32[64,384], index: 7, kind: output, shape index: {0}]   ;;  %s3479_s8 = inlined_call_operand.hbm [shape: f32[64,128], index: 8, kind: output, shape index: {1}]  }
   0x1   :  { %3484 = sst [smem:[#allocation19_spill]] %s3473_s2 }
   0x2   :  { %14 = vsyncpa [#allocation3], 0 }
   0x3   :  { %16 = vsyncpa [#allocation3 + $0x1], 0 }
   0x4   :  { %17 = vsyncpa [#allocation6], 0 }
   0x5   :  { %18 = vsyncpa [#allocation9], 0 }
   0x6   :  { %19 = vsyncpa [#allocation4], 0 }
   0x7   :  { %21 = vsyncpa [#allocation4 + $0x1], 0 }
   0x8   :  { %22 = vsyncpa [#allocation12], 0 }
   0x9   :  { %24 = vsyncpa [#allocation12 + $0x1], 0  ;;  %s2568_s27 = smov 0   ;;  %s2570_s28 = smov 0  }
   0xa   :  { %s2572_s29 = smov 0   ;;  %s2574_s30 = smov 0  }
   0xb LB: > { %s2589_s9 = sadd.s32 4294967295, %s2504_s30   ;;  %s1825_s10 = sadd.s32 4294967294, %s2504_s30   ;;  %s2504_s30 = sphi %s2574_s30, %s3507_s30   ;;  %s2500_s29 = sphi %s2572_s29, %s3506_s29   ;;  %s2496_s28 = sphi %s2570_s28, %s3505_s28   ;;  %s2492_s27 = sphi %s2568_s27, %s3504_s27  }
   0xc   : > { %p50_p0 = scmp.ne.s32.totalorder %s2496_s28, %s2492_s27  ;;  %p3480_p1 = scmp.eq.s32.totalorder %s2589_s9, 0 }
   0xd   : > { %p206_p3 = scmp.eq.s32.totalorder %s1825_s10, 1  ;;  %p1826_p5 = scmp.ge.s32.totalorder %s2504_s30, 1 }
   0xe   : > { %p2598_p4 = por %p3480_p1, %p50_p0  ;;  %p239_p7 = scmp.lt.s32.totalorder %s2504_s30, 3 }
   0xf   : > { %p2603_p6 = por %p206_p3, %p50_p0  ;;  %s2506_s14 = smov [#allocation5]  }
  0x10   : > { %s3485_s11 = scalar_select %p2598_p4, 1, 0 }
  0x11   : > { %s3486_s12 = scalar_select %p2603_p6, 1, 0 }
  0x12   : > { %p2608_p8 = pnand %p1826_p5, %p239_p7  ;;  %s254_s15 = sshll.u32 %s2506_s14, 4  ;;  %s2612_s15 = int_to_ptr.vmem [resolvable:$true] %s254_s15 }
  0x13   : > { %3487 = sst [smem:[#allocation18_spill]] %s3486_s12  ;;  %s2507_s17 = smov [#allocation7]  }
  0x14   : > { %s3488_s13 = scalar_select %p2608_p8, 1, 0 }
  0x15   : > { %p2209_p9 = pneg %p2608_p8  ;;  %s270_s18 = sshll.u32 %s2507_s17, 4  ;;  %s2623_s18 = int_to_ptr.vmem [resolvable:$true] %s270_s18 }
  0x16   : > { %s3490_s2 = sld [smem:[#allocation19_spill]] }
  0x17   : > { %p2619_p11 = pnand %p2209_p9, %p3480_p1 }
  0x19   : > { %p2633_p13 = pneg %p2619_p11 }
  0x1c   : > { %s2284_s21 = scalar_lea.hbm %s3490_s2, 4096 }
  0x1d   : > { %p2285_p12 = scmp.ne.s32.totalorder %s3490_s2, %s2284_s21  ;;  %p2291_p5 = scmp.lt.u32.totalorder %s2284_s21, %s3490_s2 }
  0x1f   : > { %p2287_p0 = pnand %p2633_p13, %p2285_p12 }
  0x21   : > { %p2288_p3 = pneg %p2287_p0 }
  0x23   : > { %p2293_p7 = pnand %p2291_p5, %p2288_p3 }
  0x25   : > { %2296 = shalt.err (!%p2293_p7)
}
  0x26   : > { %s2297_s10 = scalar_lea.vmem %s2612_s15, 4096  ;;  %p2305_p2 = scmp.lt.s32.totalorder %s2612_s15, %s2612_s15 }
  0x27   : > { %p2298_p9 = scmp.ne.s32.totalorder %s2612_s15, %s2297_s10  ;;  %p2306_p6 = scmp.lt.s32.totalorder %s2297_s10, %s2297_s10 }
  0x29   : > { %p2300_p10 = pnand %p2298_p9, %p2633_p13  ;;  %p2307_p12 = por %p2306_p6, %p2305_p2 }
  0x2b   : > { %p2301_p1 = pneg %p2300_p10 }
  0x2d   : > { %p2308_p0 = pnand %p2307_p12, %p2301_p1 }
  0x2f   : > { %2311 = shalt.err (!%p2308_p0)
}
  0x30   : > { %s2508_s14 = smov 256   ;;  %s2509_s17 = smov 16  }
  0x31   : > { %2212 = dma.hbm_to_vmem [thread:$0]  (!%p2619_p11), %s3490_s2, 4096, %s2612_s15, [#allocation6], %s2508_s14, %s2508_s14, %s2509_s17  }
  0x32   : > { %s2312_s23 = scalar_lea.hbm %s3475_s4, 12288 }
  0x33   : > { %p2313_p2 = scmp.ne.s32.totalorder %s3475_s4, %s2312_s23  ;;  %p2319_p10 = scmp.lt.u32.totalorder %s2312_s23, %s3475_s4 }
  0x35   : > { %p2315_p1 = pnand %p2313_p2, %p2633_p13 }
  0x37   : > { %p2316_p6 = pneg %p2315_p1 }
  0x39   : > { %p2321_p3 = pnand %p2319_p10, %p2316_p6 }
  0x3b   : > { %2324 = shalt.err (!%p2321_p3)
}
  0x3c   : > { %s2325_s15 = scalar_lea.vmem %s2623_s18, 12288  ;;  %p2333_p12 = scmp.lt.s32.totalorder %s2623_s18, %s2623_s18 }
  0x3d   : > { %p2326_p5 = scmp.ne.s32.totalorder %s2623_s18, %s2325_s15  ;;  %p2334_p0 = scmp.lt.s32.totalorder %s2325_s15, %s2325_s15 }
  0x3f   : > { %p2328_p7 = pnand %p2326_p5, %p2633_p13  ;;  %p2335_p2 = por %p2334_p0, %p2333_p12 }
  0x41   : > { %p2329_p9 = pneg %p2328_p7 }
  0x43   : > { %p2336_p1 = pnand %p2335_p2, %p2329_p9 }
  0x45   : > { %2339 = shalt.err (!%p2336_p1)
}
  0x46   : > { %s2510_s14 = smov 384   ;;  %s2511_s12 = smov 24  }
  0x47   : > { %2215 = dma.hbm_to_vmem [thread:$0]  (!%p2619_p11), %s3475_s4, 12288, %s2623_s18, [#allocation6], %s2510_s14, %s2510_s14, %s2511_s12  }
  0x48   : > { %s2512_s20 = smov [#allocation8]   ;;  %s2340_s25 = scalar_lea.hbm %s3477_s6, 6144 }
  0x49   : > { %s286_s21 = sshll.u32 %s2512_s20, 4  ;;  %p2341_p6 = scmp.ne.s32.totalorder %s3477_s6, %s2340_s25  ;;  %s287_s21 = int_to_ptr.vmem [resolvable:$true] %s286_s21 }
  0x4a   : > { %p2347_p5 = scmp.lt.u32.totalorder %s2340_s25, %s3477_s6 }
  0x4b   : > { %p2343_p10 = pnand %p2341_p6, %p2633_p13 }
  0x4d   : > { %p2344_p3 = pneg %p2343_p10 }
  0x4f   : > { %p2349_p7 = pnand %p2347_p5, %p2344_p3 }
  0x51   : > { %2352 = shalt.err (!%p2349_p7)
}
  0x52   : > { %s2353_s18 = scalar_lea.vmem %s287_s21, 6144  ;;  %p2361_p2 = scmp.lt.s32.totalorder %s287_s21, %s287_s21 }
  0x53   : > { %p2354_p9 = scmp.ne.s32.totalorder %s287_s21, %s2353_s18  ;;  %p2362_p1 = scmp.lt.s32.totalorder %s2353_s18, %s2353_s18 }
  0x55   : > { %p2356_p12 = pnand %p2354_p9, %p2633_p13  ;;  %p2363_p4 = por %p2362_p1, %p2361_p2 }
  0x57   : > { %p2357_p0 = pneg %p2356_p12 }
  0x59   : > { %p2364_p8 = pnand %p2363_p4, %p2357_p0 }
  0x5b   : > { %2367 = shalt.err (!%p2364_p8)
}
  0x5c   : > { %s2513_s14 = smov 128   ;;  %s2514_s2 = smov 8  }
  0x5d   : > { %2218 = dma.hbm_to_vmem [thread:$0]  (!%p2619_p11), %s3477_s6, 6144, %s287_s21, [#allocation9], %s2513_s14, %s2513_s14, %s2514_s2  }
  0x5e   : > { %s2699_s17 = sadd.s32 1, %s2504_s30   ;;  %s37_s20 = sadd.s32 1, %s2500_s29 }
  0x5f   : > { %s34_s19 = ssub.s32 %s2504_s30, %s2699_s17  ;;  %p44_p8 = scmp.ne.s32.totalorder %s2500_s29, %s2496_s28 }
  0x60   : > { %p35_p4 = scmp.eq.s32.totalorder %s34_s19, 0  ;;  %p45_p13 = scmp.eq.s32.totalorder %s2504_s30, 0 }
  0x61   : > { %p2233_p6 = scmp.lt.s32.totalorder %s2504_s30, 2  ;;  %p3492_p3 = scmp.eq.s32.totalorder %s2589_s9, 1 }
  0x62   : > { %s2709_s22 = scalar_select %p35_p4, %s2500_s29, %s37_s20  }
  0x63   : > { %p46_p10 = por %p45_p13, %p44_p8  ;;  %p2713_p5 = por %p3492_p3, %p44_p8 }
  0x64   : > { %s300_s23 = sand.u32 1, %s2500_s29   ;;  %s1849_s25 = sshll.u32 %s2504_s30, 9 }
  0x65   : > { %s1831_s21 = sshll.u32 %s300_s23, 5  ;;  %s2722_s15 = scalar_lea.hbm %s3471_s0, %s1849_s25 }
  0x66   : > { %s304_s18 = scalar_lea.vmem [#allocation2], %s1831_s21  ;;  %p2724_p11 = pnand %p2233_p6, %p46_p10 }
  0x67   : > { %s311_s24 = sshll.u32 %s304_s18, 4  ;;  %s2730_s19 = scalar_lea.sflag [#allocation3], %s300_s23  ;;  %s2728_s24 = int_to_ptr.vmem [resolvable:$true] %s311_s24 }
  0x68   : > { %s2368_s20 = scalar_lea.hbm %s2722_s15, 512  ;;  %p2370_p9 = pneg %p2724_p11 }
  0x69   : > { %p2369_p7 = scmp.ne.s32.totalorder %s2722_s15, %s2368_s20  ;;  %s2373_s26 = scalar_lea.hbm %s3471_s0, 1024 }
  0x6a   : > { %p2374_p2 = scmp.lt.u32.totalorder %s2722_s15, %s3471_s0  ;;  %p2375_p1 = scmp.lt.u32.totalorder %s2373_s26, %s2368_s20 }
  0x6b   : > { %p2371_p12 = pnand %p2370_p9, %p2369_p7  ;;  %p2377_p8 = scmp.lt.u32.totalorder %s2368_s20, %s2722_s15 }
  0x6c   : > { %p2376_p4 = por %p2375_p1, %p2374_p2 }
  0x6d   : > { %p2372_p0 = pneg %p2371_p12 }
  0x6e   : > { %p2378_p13 = por %p2377_p8, %p2376_p4 }
  0x70   : > { %p2379_p6 = pnand %p2378_p13, %p2372_p0 }
  0x72   : > { %2382 = shalt.err (!%p2379_p6)
}
  0x73   : > { %s2383_s23 = scalar_lea.vmem %s2728_s24, 512  ;;  %s2515_s25 = smov [#allocation2]  }
  0x74   : > { %p2384_p10 = scmp.ne.s32.totalorder %s2728_s24, %s2383_s23  ;;  %s2388_s21 = sshll.u32 %s2515_s25, 4  ;;  %s2389_s21 = int_to_ptr.vmem [resolvable:$false] %s2388_s21 }
  0x75   : > { %s2390_s10 = scalar_lea.vmem %s2389_s21, 1024  ;;  %p2391_p12 = scmp.lt.s32.totalorder %s2728_s24, %s2389_s21 }
  0x76   : > { %p2386_p3 = pnand %p2384_p10, %p2370_p9  ;;  %p2392_p2 = scmp.lt.s32.totalorder %s2390_s10, %s2383_s23 }
  0x78   : > { %p2387_p7 = pneg %p2386_p3  ;;  %p2393_p1 = por %p2392_p2, %p2391_p12 }
  0x7a   : > { %p2394_p4 = pnand %p2393_p1, %p2387_p7 }
  0x7c   : > { %2397 = shalt.err (!%p2394_p4)
}
  0x7d   : > { %2222 = dma.hbm_to_vmem [thread:$0]  (!%p2724_p11), %s2722_s15, 512, %s2728_s24, %s2730_s19, %s2513_s14, %s2513_s14, %s2514_s2  }
  0x7e   : > { %p3495_p9 = scmp.ne.s32.totalorder %s3488_s13, 0 }
  0x7f   : > { %s2764_s20 = sand.u32 (!%p3495_p9), 1, %s2496_s28   ;;  %p3496_p0 = scmp.ne.s32.totalorder (!%p3495_p9), %s3485_s11, 0 }
  0x80   : > { %323 = sbr.rel (%p3495_p9) target bundleno = 2653 (0xa5d), region = 48  ;;  %s1835_s26 = sshll.u32 (!%p3495_p9), %s2764_s20, 5 }
  0x81   : > { %s326_s18 = scalar_lea.sflag (!%p3495_p9), [#allocation3], %s2764_s20  ;;  %s2770_s12 = scalar_lea.vmem (!%p3495_p9), [#allocation2], %s1835_s26 }
  0x87   : > { %2471 = dma.done.wait (%p3496_p0), %s326_s18, 512  }
  0x88   : > { %2473 = vsyncadd (%p3496_p0), %s326_s18, 4294966784  ;;  %p3497_p11 = scmp.eq.s32.totalorder %s2589_s9, 0 }
  0x8a   : > { %2475 = dma.done.wait (%p3497_p11), [#allocation6], 16384   ;;  %p3498_p8 = pmov %p3497_p11 }
  0x8c   : > { %2477 = vsyncadd (%p3498_p8), [#allocation6], 4294950912  ;;  %p3499_p13 = pmov %p3498_p8 }
  0x8d   : > { %p3500_p6 = pmov %p3498_p8 }
  0x8e   : > { %2479 = dma.done.wait (%p3499_p13), [#allocation9], 6144  }
  0x8f   : > { %2481 = vsyncadd (%p3500_p6), [#allocation9], 4294961152  ;;  %v2516_v0 = vmov 0.0   ;;  %v387_v1 = vld [vmem:[#allocation5 + $0x8] sm:$0xff]  ;;  %v389_v2 = vld [vmem:[#allocation5 + $0x18] sm:$0xff]  ;;  %s2189_s15 = smul.u32 96, %s2764_s20 }
  0x90   : > { %494 = vmatprep.mubr.f32.mxu0 %v2516_v0  ;;  %v386_v3 = vld [vmem:[#allocation5] sm:$0xff]  ;;  %v1997_v4 = vpack.c.bf16 %v389_v2, %v387_v1  ;;  %v388_v5 = vld [vmem:[#allocation5 + $0x10] sm:$0xff]  ;;  %v391_v6 = vld [vmem:[#allocation5 + $0x28] sm:$0xff]  ;;  %s2190_s19 = smul.u32 1536, %s2589_s9  ;;  %s1656_s18 = scalar_lea.sflag [#allocation4], %s2764_s20 }
  0x91   : > { %v393_v7 = vld [vmem:[#allocation5 + $0x38] sm:$0xff]  ;;  %v1999_v8 = vpack.c.bf16 %v388_v5, %v386_v3  ;;  %v390_v10 = vld [vmem:[#allocation5 + $0x20] sm:$0xff]  ;;  %v392_v11 = vld [vmem:[#allocation5 + $0x30] sm:$0xff]  ;;  %s3348_s24 = scalar_lea.vmem [#allocation10], %s2189_s15  ;;  %s2517_s11 = smov [#allocation10]  }
  0x92   : > { %v2001_v9 = vpack.c.bf16 %v393_v7, %v391_v6  ;;  %v395_v12 = vld [vmem:[#allocation5 + $0x48] sm:$0xff]  ;;  %1998 = vmatprep.subr.bf16.mxu0 %v1997_v4  ;;  %v397_v13 = vld [vmem:[#allocation5 + $0x58] sm:$0xff]  ;;  %v2003_v14 = vpack.c.bf16 %v392_v11, %v390_v10  ;;  %v394_v16 = vld [vmem:[#allocation5 + $0x40] sm:$0xff]  ;;  %s1675_s23 = sshll.u32 %s3348_s24, 4  ;;  %s3388_s10 = scalar_lea.hbm %s3478_s7, %s2190_s19  ;;  %s3390_s23 = int_to_ptr.vmem [resolvable:$true] %s1675_s23 }
  0x93   : > { %2000 = vmatpush1.bf16.msra.mxu0 %v1999_v8  ;;  %v2005_v15 = vpack.c.bf16 %v397_v13, %v395_v12  ;;  %v396_v17 = vld [vmem:[#allocation5 + $0x50] sm:$0xff]  ;;  %v399_v18 = vld [vmem:[#allocation5 + $0x68] sm:$0xff]  ;;  %v401_v19 = vld [vmem:[#allocation5 + $0x78] sm:$0xff]  ;;  %s2402_s13 = sshll.u32 %s2517_s11, 4  ;;  %s2403_s13 = int_to_ptr.vmem [resolvable:$false] %s2402_s13 }
  0x94   : > { %2002 = vmatprep.subr.bf16.mxu0 %v2001_v9  ;;  %v2007_v20 = vpack.c.bf16 %v396_v17, %v394_v16  ;;  %v2009_v21 = vpack.c.bf16 %v401_v19, %v399_v18  ;;  %v398_v22 = vld [vmem:[#allocation5 + $0x60] sm:$0xff]  ;;  %v400_v23 = vld [vmem:[#allocation5 + $0x70] sm:$0xff]  ;;  %v403_v24 = vld [vmem:[#allocation5 + $0x88] sm:$0xff]  ;;  %s2404_s14 = scalar_lea.vmem %s2403_s13, 3072  ;;  %p2405_p12 = scmp.lt.s32.totalorder %s3390_s23, %s2403_s13 }
  0x95   : > { %v405_v25 = vld [vmem:[#allocation5 + $0x98] sm:$0xff]  ;;  %v402_v26 = vld [vmem:[#allocation5 + $0x80] sm:$0xff]  ;;  %v404_v27 = vld [vmem:[#allocation5 + $0x90] sm:$0xff]  ;;  %v2011_v28 = vpack.c.bf16 %v400_v23, %v398_v22 }
  0x96   : > { %v407_v29 = vld [vmem:[#allocation5 + $0xa8] sm:$0xff]  ;;  %v409_v30 = vld [vmem:[#allocation5 + $0xb8] sm:$0xff]  ;;  %v531_v32 = vld [vmem:[#allocation7 + $0x20] sm:$0xff]  ;;  %v2013_v34 = vpack.c.bf16 %v405_v25, %v403_v24  ;;  %v2015_v45 = vpack.c.bf16 %v404_v27, %v402_v26 }
  0x97   : > { %2004 = vmatpush1.bf16.msra.mxu0 %v2003_v14  ;;  %v528_v31 = vld [vmem:[#allocation7 + $0x8] sm:$0xff]  ;;  %v527_v33 = vld [vmem:[#allocation7] sm:$0xff]  ;;  %v530_v36 = vld [vmem:[#allocation7 + $0x18] sm:$0xff]  ;;  %v2017_v49 = vpack.c.bf16 %v409_v30, %v407_v29 }
  0x98   : > { %2006 = vmatprep.subr.bf16.mxu0 %v2005_v15  ;;  %v2029_v35 = vpack.c.bf16 %v531_v32, %v528_v31  ;;  %v534_v37 = vld [vmem:[#allocation7 + $0x38] sm:$0xff]  ;;  %v537_v38 = vld [vmem:[#allocation7 + $0x50] sm:$0xff]  ;;  %v2031_v39 = vpack.c.bf16 %v530_v36, %v527_v33  ;;  %v536_v42 = vld [vmem:[#allocation7 + $0x48] sm:$0xff] }
  0x99   : > { %v2033_v40 = vpack.c.bf16 %v537_v38, %v534_v37  ;;  %v533_v41 = vld [vmem:[#allocation7 + $0x30] sm:$0xff]  ;;  %v540_v43 = vld [vmem:[#allocation7 + $0x68] sm:$0xff]  ;;  %v543_v44 = vld [vmem:[#allocation7 + $0x80] sm:$0xff] }
  0x9a   : > { %2030 = vmatprep.subr.bf16.mxu1 %v2029_v35  ;;  %v406_v46 = vld [vmem:[#allocation5 + $0xa0] sm:$0xff]  ;;  %v408_v47 = vld [vmem:[#allocation5 + $0xb0] sm:$0xff]  ;;  %v2035_v48 = vpack.c.bf16 %v536_v42, %v533_v41  ;;  %v411_v50 = vld [vmem:[#allocation5 + $0xc8] sm:$0xff]  ;;  %v2037_v51 = vpack.c.bf16 %v543_v44, %v540_v43 }
  0x9b   : > { %2008 = vmatpush1.bf16.msra.mxu0 %v2007_v20  ;;  %2032 = vmatpush1.bf16.msra.mxu1 %v2031_v39  ;;  %v539_v52 = vld [vmem:[#allocation7 + $0x60] sm:$0xff]  ;;  %v542_v53 = vld [vmem:[#allocation7 + $0x78] sm:$0xff]  ;;  %v549_v56 = vld [vmem:[#allocation7 + $0xb0] sm:$0xff]  ;;  %v2019_v57 = vpack.c.bf16 %v408_v47, %v406_v46 }
  0x9c   : > { %2010 = vmatprep.subr.bf16.mxu0 %v2009_v21  ;;  %2034 = vmatprep.subr.bf16.mxu1 %v2033_v40  ;;  %v413_v54 = vld [vmem:[#allocation5 + $0xd8] sm:$0xff]  ;;  %v410_v58 = vld [vmem:[#allocation5 + $0xc0] sm:$0xff]  ;;  %v412_v59 = vld [vmem:[#allocation5 + $0xd0] sm:$0xff]  ;;  %v2039_v60 = vpack.c.bf16 %v542_v53, %v539_v52 }
  0x9d   : > { %v546_v55 = vld [vmem:[#allocation7 + $0x98] sm:$0xff]  ;;  %v2021_v61 = vpack.c.bf16 %v413_v54, %v411_v50  ;;  %v415_v62 = vld [vmem:[#allocation5 + $0xe8] sm:$0xff]  ;;  %v545_v1 = vld [vmem:[#allocation7 + $0x90] sm:$0xff]  ;;  %v2023_v6 = vpack.c.bf16 %v412_v59, %v410_v58 }
  0x9e   : > { %v2041_v63 = vpack.c.bf16 %v549_v56, %v546_v55  ;;  %v548_v2 = vld [vmem:[#allocation7 + $0xa8] sm:$0xff]  ;;  %v417_v3 = vld [vmem:[#allocation5 + $0xf8] sm:$0xff]  ;;  %v555_v5 = vld [vmem:[#allocation7 + $0xe0] sm:$0xff] }
  0x9f   : > { %2012 = vmatpush1.bf16.msra.mxu0 %v2011_v28  ;;  %2036 = vmatpush1.bf16.msra.mxu1 %v2035_v48  ;;  %v552_v4 = vld [vmem:[#allocation7 + $0xc8] sm:$0xff]  ;;  %v414_v7 = vld [vmem:[#allocation5 + $0xe0] sm:$0xff]  ;;  %v416_v8 = vld [vmem:[#allocation5 + $0xf0] sm:$0xff]  ;;  %v2043_v9 = vpack.c.bf16 %v548_v2, %v545_v1  ;;  %v2025_v10 = vpack.c.bf16 %v417_v3, %v415_v62 }
  0xa0   : > { %2014 = vmatprep.subr.bf16.mxu0 %v2013_v34  ;;  %2038 = vmatprep.subr.bf16.mxu1 %v2037_v51  ;;  %v2045_v11 = vpack.c.bf16 %v555_v5, %v552_v4  ;;  %v551_v12 = vld [vmem:[#allocation7 + $0xc0] sm:$0xff]  ;;  %v554_v13 = vld [vmem:[#allocation7 + $0xd8] sm:$0xff]  ;;  %v561_v15 = vld [vmem:[#allocation7 + $0x110] sm:$0xff]  ;;  %v2027_v18 = vpack.c.bf16 %v416_v8, %v414_v7 }
  0xa1   : > { %v558_v14 = vld [vmem:[#allocation7 + $0xf8] sm:$0xff]  ;;  %v577_v16 = vld [vmem:[#allocation7 + $0x190] sm:$0xff]  ;;  %v580_v17 = vld [vmem:[#allocation7 + $0x1a8] sm:$0xff]  ;;  %v2047_v19 = vpack.c.bf16 %v554_v13, %v551_v12 }
  0xa2   : > { %v2049_v20 = vpack.c.bf16 %v561_v15, %v558_v14  ;;  %v557_v21 = vld [vmem:[#allocation7 + $0xf0] sm:$0xff]  ;;  %v560_v22 = vld [vmem:[#allocation7 + $0x108] sm:$0xff]  ;;  %v2093_v24 = vpack.c.bf16 %v580_v17, %v577_v16  ;;  %v567_v25 = vld [vmem:[#allocation7 + $0x140] sm:$0xff] }
  0xa3   : > { %2016 = vmatpush1.bf16.msra.mxu0 %v2015_v45  ;;  %2040 = vmatpush1.bf16.msra.mxu1 %v2039_v60  ;;  %v564_v23 = vld [vmem:[#allocation7 + $0x128] sm:$0xff]  ;;  %v529_v26 = vld [vmem:[#allocation7 + $0x10] sm:$0xff]  ;;  %v583_v28 = vld [vmem:[#allocation7 + $0x1c0] sm:$0xff]  ;;  %v2051_v31 = vpack.c.bf16 %v560_v22, %v557_v21 }
  0xa4   : > { %2018 = vmatprep.subr.bf16.mxu0 %v2017_v49  ;;  %2042 = vmatprep.subr.bf16.mxu1 %v2041_v63  ;;  %v532_v27 = vld [vmem:[#allocation7 + $0x28] sm:$0xff]  ;;  %v586_v29 = vld [vmem:[#allocation7 + $0x1d8] sm:$0xff]  ;;  %v382_v30 = vld [vmem:[%s2770_s12] sm:$0xff]  ;;  %v2053_v32 = vpack.c.bf16 %v567_v25, %v564_v23 }
  0xa5   : > { %v563_v33 = vld [vmem:[#allocation7 + $0x120] sm:$0xff]  ;;  %v566_v34 = vld [vmem:[#allocation7 + $0x138] sm:$0xff]  ;;  %v2095_v36 = vpack.c.bf16 %v532_v27, %v529_v26  ;;  %v573_v37 = vld [vmem:[#allocation7 + $0x170] sm:$0xff]  ;;  %v2097_v38 = vpack.c.bf16 %v586_v29, %v583_v28 }
  0xa6   : > { %v570_v35 = vld [vmem:[#allocation7 + $0x158] sm:$0xff]  ;;  %v535_v39 = vld [vmem:[#allocation7 + $0x40] sm:$0xff]  ;;  %v589_v41 = vld [vmem:[#allocation7 + $0x1f0] sm:$0xff]  ;;  %v2055_v44 = vpack.c.bf16 %v566_v34, %v563_v33 }
  0xa7   : > { %2020 = vmatpush1.bf16.msra.mxu0 %v2019_v57  ;;  %2044 = vmatpush1.bf16.msra.mxu1 %v2043_v9  ;;  %v538_v40 = vld [vmem:[#allocation7 + $0x58] sm:$0xff]  ;;  %v592_v42 = vld [vmem:[#allocation7 + $0x208] sm:$0xff]  ;;  %v2057_v45 = vpack.c.bf16 %v573_v37, %v570_v35  ;;  %v569_v46 = vld [vmem:[#allocation7 + $0x150] sm:$0xff] }
  0xa8   : > { %2022 = vmatprep.subr.bf16.mxu0 %v2021_v61  ;;  %2046 = vmatprep.subr.bf16.mxu1 %v2045_v11  ;;  %v383_v43 = vld [vmem:[%s2770_s12 + $0x8] sm:$0xff]  ;;  %v2099_v49 = vpack.c.bf16 %v538_v40, %v535_v39  ;;  %v579_v50 = vld [vmem:[#allocation7 + $0x1a0] sm:$0xff]  ;;  %v2101_v51 = vpack.c.bf16 %v592_v42, %v589_v41  ;;  %v541_v52 = vld [vmem:[#allocation7 + $0x70] sm:$0xff] }
  0xa9   : > { %v572_v47 = vld [vmem:[#allocation7 + $0x168] sm:$0xff]  ;;  %v595_v54 = vld [vmem:[#allocation7 + $0x220] sm:$0xff]  ;;  %v598_v55 = vld [vmem:[#allocation7 + $0x238] sm:$0xff] }
  0xaa   : > { %v576_v48 = vld [vmem:[#allocation7 + $0x188] sm:$0xff]  ;;  %v384_v56 = vld [vmem:[%s2770_s12 + $0x10] sm:$0xff]  ;;  %v2059_v57 = vpack.c.bf16 %v572_v47, %v569_v46  ;;  %v575_v59 = vld [vmem:[#allocation7 + $0x180] sm:$0xff]  ;;  %v2105_v1 = vpack.c.bf16 %v598_v55, %v595_v54 }
  0xab   : > { %2024 = vmatpush1.bf16.msra.mxu0 %v2023_v6  ;;  %2048 = vmatpush1.bf16.msra.mxu1 %v2047_v19  ;;  %v544_v53 = vld [vmem:[#allocation7 + $0x88] sm:$0xff]  ;;  %v2061_v58 = vpack.c.bf16 %v579_v50, %v576_v48  ;;  %v578_v60 = vld [vmem:[#allocation7 + $0x198] sm:$0xff]  ;;  %v585_v63 = vld [vmem:[#allocation7 + $0x1d0] sm:$0xff] }
  0xac   : > { %2026 = vmatprep.subr.bf16.mxu0 %v2025_v10  ;;  %2050 = vmatprep.subr.bf16.mxu1 %v2049_v20  ;;  %v582_v61 = vld [vmem:[#allocation7 + $0x1b8] sm:$0xff]  ;;  %v2103_v62 = vpack.c.bf16 %v544_v53, %v541_v52  ;;  %v547_v2 = vld [vmem:[#allocation7 + $0xa0] sm:$0xff]  ;;  %v601_v4 = vld [vmem:[#allocation7 + $0x250] sm:$0xff]  ;;  %v2063_v7 = vpack.c.bf16 %v578_v60, %v575_v59 }
  0xad   : > { %v550_v3 = vld [vmem:[#allocation7 + $0xb8] sm:$0xff]  ;;  %v604_v5 = vld [vmem:[#allocation7 + $0x268] sm:$0xff]  ;;  %v2065_v8 = vpack.c.bf16 %v585_v63, %v582_v61  ;;  %v581_v9 = vld [vmem:[#allocation7 + $0x1b0] sm:$0xff] }
  0xae   : > { %v385_v6 = vld [vmem:[%s2770_s12 + $0x18] sm:$0xff]  ;;  %v584_v10 = vld [vmem:[#allocation7 + $0x1c8] sm:$0xff]  ;;  %v2107_v12 = vpack.c.bf16 %v550_v3, %v547_v2  ;;  %v591_v13 = vld [vmem:[#allocation7 + $0x200] sm:$0xff]  ;;  %v2109_v14 = vpack.c.bf16 %v604_v5, %v601_v4  ;;  %s2398_s12 = scalar_lea.vmem %s3390_s23, 1536 }
  0xaf   : > { %2028 = vmatpush1.bf16.msra.mxu0 %v2027_v18  ;;  %2052 = vmatpush1.bf16.msra.mxu1 %v2051_v31  ;;  %v588_v11 = vld [vmem:[#allocation7 + $0x1e8] sm:$0xff]  ;;  %v553_v15 = vld [vmem:[#allocation7 + $0xd0] sm:$0xff]  ;;  %v607_v17 = vld [vmem:[#allocation7 + $0x280] sm:$0xff]  ;;  %p2399_p10 = scmp.ne.s32.totalorder %s3390_s23, %s2398_s12  ;;  %p2406_p2 = scmp.lt.s32.totalorder %s2404_s14, %s2398_s12 }
  0xb0   : > { %2094 = vmatprep.subr.bf16.mxu0 %v2093_v24  ;;  %2054 = vmatprep.subr.bf16.mxu1 %v2053_v32  ;;  %v556_v16 = vld [vmem:[#allocation7 + $0xe8] sm:$0xff]  ;;  %v610_v18 = vld [vmem:[#allocation7 + $0x298] sm:$0xff]  ;;  %v2069_v19 = vpack.c.bf16 %v591_v13, %v588_v11  ;;  %v587_v20 = vld [vmem:[#allocation7 + $0x1e0] sm:$0xff] }
  0xb1   : > { %v590_v21 = vld [vmem:[#allocation7 + $0x1f8] sm:$0xff]  ;;  %v2111_v23 = vpack.c.bf16 %v556_v16, %v553_v15  ;;  %v597_v24 = vld [vmem:[#allocation7 + $0x230] sm:$0xff]  ;;  %v2113_v25 = vpack.c.bf16 %v610_v18, %v607_v17  ;;  %v559_v26 = vld [vmem:[#allocation7 + $0x100] sm:$0xff]  ;;  %p2400_p3 = pnand %p2399_p10, %p2713_p5  ;;  %p2407_p1 = por %p2406_p2, %p2405_p12 }
  0xb2   : > { %495 = vmatmul.mubr.f32.vlgmr.msra.gmra.mrb[0].mxu0 %v382_v30  ;;  %v594_v22 = vld [vmem:[#allocation7 + $0x218] sm:$0xff]  ;;  %v613_v28 = vld [vmem:[#allocation7 + $0x2b0] sm:$0xff]  ;;  %v616_v29 = vld [vmem:[#allocation7 + $0x2c8] sm:$0xff]  ;;  %v2071_v30 = vpack.c.bf16 %v590_v21, %v587_v20 }
  0xb3   : > { %500 = vmatprep.mubr.f32.mxu0 %v2516_v0  ;;  %2096 = vmatpush3.bf16.msra.mxu0 %v2095_v36  ;;  %v562_v27 = vld [vmem:[#allocation7 + $0x118] sm:$0xff]  ;;  %v2073_v31 = vpack.c.bf16 %v597_v24, %v594_v22  ;;  %v593_v32 = vld [vmem:[#allocation7 + $0x210] sm:$0xff]  ;;  %v596_v33 = vld [vmem:[#allocation7 + $0x228] sm:$0xff]  ;;  %v2117_v37 = vpack.c.bf16 %v616_v29, %v613_v28  ;;  %p2401_p7 = pneg %p2400_p3 }
  0xb4   : > { %2098 = vmatprep.subr.bf16.mxu0 %v2097_v38  ;;  %2056 = vmatpush1.bf16.msra.mxu1 %v2055_v44  ;;  %v2115_v34 = vpack.c.bf16 %v562_v27, %v559_v26  ;;  %v600_v35 = vld [vmem:[#allocation7 + $0x248] sm:$0xff]  ;;  %v603_v36 = vld [vmem:[#allocation7 + $0x260] sm:$0xff]  ;;  %v2075_v38 = vpack.c.bf16 %v596_v33, %v593_v32  ;;  %v602_v41 = vld [vmem:[#allocation7 + $0x258] sm:$0xff] }
  0xb5   : > { %2058 = vmatprep.subr.bf16.mxu1 %v2057_v45  ;;  %v2077_v39 = vpack.c.bf16 %v603_v36, %v600_v35  ;;  %v599_v40 = vld [vmem:[#allocation7 + $0x240] sm:$0xff]  ;;  %v606_v42 = vld [vmem:[#allocation7 + $0x278] sm:$0xff]  ;;  %v605_v46 = vld [vmem:[#allocation7 + $0x270] sm:$0xff]  ;;  %p2408_p4 = pnand %p2407_p1, %p2401_p7 }
  0xb6   : > { %501 = vmatmul.mubr.f32.gmra.mrb[2].mxu0 %v383_v43  ;;  %v609_v43 = vld [vmem:[#allocation7 + $0x290] sm:$0xff]  ;;  %v2079_v44 = vpack.c.bf16 %v602_v41, %v599_v40  ;;  %v608_v47 = vld [vmem:[#allocation7 + $0x288] sm:$0xff]  ;;  %v611_v52 = vld [vmem:[#allocation7 + $0x2a0] sm:$0xff] }
  0xb7   : > { %506 = vmatprep.mubr.f32.mxu0 %v2516_v0  ;;  %2100 = vmatpush3.bf16.msra.mxu0 %v2099_v49  ;;  %v2081_v45 = vpack.c.bf16 %v609_v43, %v606_v42  ;;  %v612_v48 = vld [vmem:[#allocation7 + $0x2a8] sm:$0xff]  ;;  %v615_v49 = vld [vmem:[#allocation7 + $0x2c0] sm:$0xff]  ;;  %v2083_v50 = vpack.c.bf16 %v608_v47, %v605_v46  ;;  %v614_v53 = vld [vmem:[#allocation7 + $0x2b8] sm:$0xff] }
  0xb8   : > { %2102 = vmatprep.subr.bf16.mxu0 %v2101_v51  ;;  %2060 = vmatpush1.bf16.msra.mxu1 %v2059_v57  ;;  %v2085_v51 = vpack.c.bf16 %v615_v49, %v612_v48  ;;  %v565_v54 = vld [vmem:[#allocation7 + $0x130] sm:$0xff]  ;;  %v2087_v55 = vpack.c.bf16 %v614_v53, %v611_v52  ;;  %v619_v60 = vld [vmem:[#allocation7 + $0x2e0] sm:$0xff]  ;;  %v574_v5 = vld [vmem:[#allocation7 + $0x178] sm:$0xff] }
  0xb9   : > { %2062 = vmatprep.subr.bf16.mxu1 %v2061_v58  ;;  %v618_v58 = vld [vmem:[#allocation7 + $0x2d8] sm:$0xff]  ;;  %v621_v59 = vld [vmem:[#allocation7 + $0x2f0] sm:$0xff]  ;;  %v571_v4 = vld [vmem:[#allocation7 + $0x160] sm:$0xff] }
  0xba   : > { %507 = vmatmul.mubr.f32.gmra.mrb[4].mxu0 %v384_v56  ;;  %v568_v56 = vld [vmem:[#allocation7 + $0x148] sm:$0xff]  ;;  %v2089_v61 = vpack.c.bf16 %v621_v59, %v618_v58  ;;  %v617_v63 = vld [vmem:[#allocation7 + $0x2d0] sm:$0xff] }
  0xbb   : > { %512 = vmatprep.mubr.f32.mxu0 %v2516_v0  ;;  %2104 = vmatpush3.bf16.msra.mxu0 %v2103_v62  ;;  %v2067_v0 = vpack.c.bf16 %v584_v10, %v581_v9  ;;  %v2119_v57 = vpack.c.bf16 %v568_v56, %v565_v54  ;;  %v622_v62 = vld [vmem:[#allocation7 + $0x2f8] sm:$0xff]  ;;  %v418_v10 = vld [vmem:[%s3474_s3] sm:$0x3] }
  0xbc   : > { %2106 = vmatprep.subr.bf16.mxu0 %v2105_v1  ;;  %2064 = vmatpush1.bf16.msra.mxu1 %v2063_v7  ;;  %v620_v1 = vld [vmem:[#allocation7 + $0x2e8] sm:$0xff]  ;;  %v2121_v2 = vpack.c.bf16 %v622_v62, %v619_v60  ;;  %v420_v7 = vlaneseq }
  0xbd   : > { %2066 = vmatprep.subr.bf16.mxu1 %v2065_v8  ;;  %v2091_v3 = vpack.c.bf16 %v620_v1, %v617_v63 }
  0xbe   : > { %513 = vmatmul.mubr.f32.gmra.mrb[6].mxu0 %v385_v6  ;;  %v2123_v6 = vpack.c.bf16 %v574_v5, %v571_v4  ;;  %v421_v8 = vshrl.u32 %v420_v7, 7 }
  0xbf   : > { %2108 = vmatpush3.bf16.msra.mxu0 %v2107_v12 }
  0xc0   : > { %2110 = vmatprep.subr.bf16.mxu0 %v2109_v14  ;;  %2068 = vmatpush1.bf16.msra.mxu1 %v2067_v0  ;;  %v422_v9 = vsub.s32 0, %v421_v8  ;;  %v426_v11 = vsub.s32 1, %v421_v8 }
  0xc1   : > { %2070 = vmatprep.subr.bf16.mxu1 %v2069_v19 }
  0xc2   : > { %v423_v12 = vrot.slane %v418_v10, %v422_v9  ;;  %v427_v13 = vrot.slane %v418_v10, %v426_v11 }
  0xc3   : > { %2112 = vmatpush3.bf16.msra.mxu0 %v2111_v23 }
  0xc4   : > { %2114 = vmatprep.subr.bf16.mxu0 %v2113_v25  ;;  %2072 = vmatpush1.bf16.msra.mxu1 %v2071_v30 }
  0xc5   : > { %2074 = vmatprep.subr.bf16.mxu1 %v2073_v31 }
  0xc7   : > { %2116 = vmatpush3.bf16.msra.mxu0 %v2115_v34 }
  0xc8   : > { %2118 = vmatprep.subr.bf16.mxu0 %v2117_v37  ;;  %2076 = vmatpush1.bf16.msra.mxu1 %v2075_v38  ;;  %v623_v37 = vld [vmem:[%s3476_s5] sm:$0x7]  ;;  %v635_v38 = vsub.s32 2, %v421_v8 }
  0xc9   : > { %2078 = vmatprep.subr.bf16.mxu1 %v2077_v39  ;;  %v628_v39 = vrot.slane %v623_v37, %v422_v9  ;;  %v632_v40 = vrot.slane %v623_v37, %v426_v11 }
  0xca   : > { %v636_v43 = vrot.slane %v623_v37, %v635_v38 }
  0xcb   : > { %2120 = vmatpush3.bf16.msra.mxu0 %v2119_v57 }
  0xcc   : > { %2080 = vmatpush1.bf16.msra.mxu1 %v2079_v44  ;;  %2122 = vmatprep.subr.bf16.mxu0 %v2121_v2 }
  0xcd   : > { %2082 = vmatprep.subr.bf16.mxu1 %v2081_v45 }
  0xcf   : > { %2124 = vmatpush3.bf16.msra.mxu0 %v2123_v6 }
  0xd0   : > { %2084 = vmatpush1.bf16.msra.mxu1 %v2083_v50 }
  0xd1   : > { %2086 = vmatprep.subr.bf16.mxu1 %v2085_v51 }
  0xd4   : > { %2088 = vmatpush1.bf16.msra.mxu1 %v2087_v55 }
  0xd5   : > { %2090 = vmatprep.subr.bf16.mxu1 %v2089_v61 }
  0xd8   : > { %2092 = vmatpush1.bf16.msra.mxu1 %v2091_v3 }
 0x185   : > { %v496_v14 = vpop.f32.mrb[0].mxu0 }
 0x186   : > { %v497_v15 = vadd.f32 %v496_v14, %v423_v12  ;;  %v498_v16 = vpop.f32.mrb[1].mxu0 }
 0x187   : > { %v499_v17 = vadd.f32 %v498_v16, %v427_v13 }
 0x188   : > { %v519_v19 = vmax.f32 %v497_v15, 0.0 }
 0x189   : > { %v520_v18 = vmax.f32 %v499_v17, 0.0  ;;  %v502_v0 = vpop.f32.mrb[2].mxu0 }
 0x18a   : > { %v503_v20 = vadd.f32 %v502_v0, %v423_v12  ;;  %v504_v21 = vpop.f32.mrb[3].mxu0 }
 0x18b   : > { %v505_v22 = vadd.f32 %v504_v21, %v427_v13  ;;  %704 = vmatprep.mubr.f32.mxu1 %v520_v18  ;;  %793 = vmatprep.mubr.f32.mxu0 %v520_v18 }
 0x18c   : > { %705 = vmatmul.mubr.f32.vlgmr.msra.gmra.mrb[0].mxu1 %v519_v19  ;;  %794 = vmatmul.mubr.f32.vlgmr.msra.gmra.mrb[8].mxu0 %v519_v19  ;;  %v521_v25 = vmax.f32 %v503_v20, 0.0  ;;  %v2836_v19 = vand.u32 127, %v420_v7 }
 0x18d   : > { %v522_v23 = vmax.f32 %v505_v22, 0.0  ;;  %v508_v24 = vpop.f32.mrb[4].mxu0 }
 0x18e   : > { %v509_v26 = vadd.f32 %v508_v24, %v423_v12  ;;  %v510_v27 = vpop.f32.mrb[5].mxu0  ;;  %v2839_v20 = vadd.s32 128, %v2836_v19  ;;  %v2848_v22 = vadd.s32 256, %v2836_v19 }
 0x18f   : > { %v511_v28 = vadd.f32 %v510_v27, %v427_v13  ;;  %710 = vmatprep.mubr.f32.mxu1 %v522_v23  ;;  %798 = vmatprep.mubr.f32.mxu0 %v522_v23 }
 0x190   : > { %711 = vmatmul.mubr.f32.gmra.mrb[2].mxu1 %v521_v25  ;;  %799 = vmatmul.mubr.f32.gmra.mrb[10].mxu0 %v521_v25  ;;  %v523_v31 = vmax.f32 %v509_v26, 0.0 }
 0x191   : > { %v524_v29 = vmax.f32 %v511_v28, 0.0  ;;  %v514_v30 = vpop.f32.mrb[6].mxu0 }
 0x192   : > { %v515_v32 = vadd.f32 %v514_v30, %v423_v12  ;;  %v516_v33 = vpop.f32.mrb[7].mxu0 }
 0x193   : > { %v517_v34 = vadd.f32 %v516_v33, %v427_v13  ;;  %716 = vmatprep.mubr.f32.mxu1 %v524_v29  ;;  %803 = vmatprep.mubr.f32.mxu0 %v524_v29 }
 0x194   : > { %717 = vmatmul.mubr.f32.gmra.mrb[4].mxu1 %v523_v31  ;;  %804 = vmatmul.mubr.f32.gmra.mrb[12].mxu0 %v523_v31  ;;  %v525_v36 = vmax.f32 %v515_v32, 0.0 }
 0x195   : > { %v526_v35 = vmax.f32 %v517_v34, 0.0 }
 0x197   : > { %722 = vmatprep.mubr.f32.mxu1 %v526_v35  ;;  %808 = vmatprep.mubr.f32.mxu0 %v526_v35 }
 0x198   : > { %723 = vmatmul.mubr.f32.gmra.mrb[6].mxu1 %v525_v36  ;;  %809 = vmatmul.mubr.f32.gmra.mrb[14].mxu0 %v525_v36 }
 0x25f   : > { %v706_v41 = vpop.f32.mrb[0].mxu1  ;;  %v1883_v42 = vpop.f32.mrb[8].mxu0 }
 0x260   : > { %v2799_v44 = vadd.f32 %v706_v41, %v628_v39  ;;  %v708_v45 = vpop.f32.mrb[1].mxu1  ;;  %v1884_v46 = vpop.f32.mrb[9].mxu0 }
 0x261   : > { %v2801_v47 = vadd.f32 %v708_v45, %v632_v40  ;;  %v1885_v48 = vadd.f32 %v1884_v46, %v1883_v42 }
 0x263   : > { %v2803_v49 = vadd.f32 %v1885_v48, %v636_v43  ;;  %v712_v50 = vpop.f32.mrb[2].mxu1  ;;  %v1886_v51 = vpop.f32.mrb[10].mxu0  ;;  %v818_v52 = vmax.f32 %v2799_v44, %v2801_v47 }
 0x264   : > { %v2807_v53 = vadd.f32 %v712_v50, %v628_v39  ;;  %v714_v54 = vpop.f32.mrb[3].mxu1  ;;  %v1887_v55 = vpop.f32.mrb[11].mxu0 }
 0x265   : > { %v2809_v56 = vadd.f32 %v714_v54, %v632_v40  ;;  %v1888_v57 = vadd.f32 %v1887_v55, %v1886_v51  ;;  %v819_v58 = vmax.f32 %v818_v52, %v2803_v49 }
 0x267   : > { %v2812_v59 = vadd.f32 %v1888_v57, %v636_v43  ;;  %v718_v60 = vpop.f32.mrb[4].mxu1  ;;  %v1889_v61 = vpop.f32.mrb[12].mxu0  ;;  %820 = vmax.xlane.f32.xlu0 %v819_v58  ;;  %v822_v62 = vmax.f32 %v2807_v53, %v2809_v56 }
 0x268   : > { %v2816_v63 = vadd.f32 %v718_v60, %v628_v39  ;;  %v720_v1 = vpop.f32.mrb[5].mxu1  ;;  %v1890_v2 = vpop.f32.mrb[13].mxu0 }
 0x269   : > { %v2818_v3 = vadd.f32 %v720_v1, %v632_v40  ;;  %v1891_v4 = vadd.f32 %v1890_v2, %v1889_v61  ;;  %v823_v5 = vmax.f32 %v822_v62, %v2812_v59 }
 0x26b   : > { %v2821_v6 = vadd.f32 %v1891_v4, %v636_v43  ;;  %v724_v8 = vpop.f32.mrb[6].mxu1  ;;  %v1892_v9 = vpop.f32.mrb[14].mxu0  ;;  %824 = vmax.xlane.f32.xlu0 %v823_v5  ;;  %v826_v10 = vmax.f32 %v2816_v63, %v2818_v3 }
 0x26c   : > { %v2825_v11 = vadd.f32 %v724_v8, %v628_v39  ;;  %v726_v12 = vpop.f32.mrb[7].mxu1  ;;  %v1893_v13 = vpop.f32.mrb[15].mxu0 }
 0x26d   : > { %v2827_v14 = vadd.f32 %v726_v12, %v632_v40  ;;  %v1894_v15 = vadd.f32 %v1893_v13, %v1892_v9  ;;  %v827_v16 = vmax.f32 %v826_v10, %v2821_v6 }
 0x26f   : > { %v2830_v17 = vadd.f32 %v1894_v15, %v636_v43  ;;  %828 = vmax.xlane.f32.xlu1 %v827_v16  ;;  %v830_v18 = vmax.f32 %v2825_v11, %v2827_v14 }
 0x271   : > { %v831_v0 = vmax.f32 %v830_v18, %v2830_v17 }
 0x273   : > { %832 = vmax.xlane.f32.xlu1 %v831_v0 }
 0x2f4   : > { %v2841_v21 = vpop.xlane.xlu0 %820 }
 0x2f5   : > { %vm834_vm0 = vcmp.eq.f32.partialorder %v2799_v44, %v2841_v21  ;;  %vm835_vm1 = vcmp.eq.f32.partialorder %v2801_v47, %v2841_v21  ;;  %vm836_vm2 = vcmp.eq.f32.partialorder %v2803_v49, %v2841_v21 }
 0x2f6   : > { %v846_v7 = vsel %vm834_vm0, %v2836_v19, 384  ;;  %v847_v23 = vsel %vm835_vm1, %v2839_v20, 384  ;;  %v848_v26 = vsel %vm836_vm2, %v2848_v22, 384 }
 0x2f7   : > { %vm858_vm3 = vcmp.lt.s32.totalorder %v846_v7, %v847_v23 }
 0x2f8   : > { %v2854_v24 = vpop.xlane.xlu0 %824  ;;  %v859_v25 = vsel %vm858_vm3, %v846_v7, %v847_v23 }
 0x2f9   : > { %vm837_vm4 = vcmp.eq.f32.partialorder %v2807_v53, %v2854_v24  ;;  %vm838_vm5 = vcmp.eq.f32.partialorder %v2809_v56, %v2854_v24  ;;  %vm839_vm6 = vcmp.eq.f32.partialorder %v2812_v59, %v2854_v24  ;;  %vm860_vm7 = vcmp.lt.s32.totalorder %v859_v25, %v848_v26 }
 0x2fa   : > { %v849_v27 = vsel %vm837_vm4, %v2836_v19, 384  ;;  %v850_v28 = vsel %vm838_vm5, %v2839_v20, 384  ;;  %v861_v29 = vsel %vm860_vm7, %v859_v25, %v848_v26  ;;  %v851_v33 = vsel %vm839_vm6, %v2848_v22, 384 }
 0x2fb   : > { %vm876_vm8 = vcmp.lt.s32.totalorder %v849_v27, %v850_v28  ;;  %v863_v31 = vshra.s32 %v861_v29, 16  ;;  %v862_v58 = vand.u32 65535, %v861_v29 }
 0x2fc   : > { %v2865_v30 = vpop.xlane.xlu1 %828  ;;  %v877_v32 = vsel %vm876_vm8, %v849_v27, %v850_v28  ;;  %v942_v28 = vmax.f32 %v2841_v21, 0.0 }
 0x2fd   : > { %vm840_vm9 = vcmp.eq.f32.partialorder %v2816_v63, %v2865_v30  ;;  %vm841_vm10 = vcmp.eq.f32.partialorder %v2818_v3, %v2865_v30  ;;  %vm842_vm11 = vcmp.eq.f32.partialorder %v2821_v6, %v2865_v30  ;;  %v865_v36 = vcvt.s32.f32 %v863_v31 }
 0x2fe   : > { %v852_v34 = vsel %vm840_vm9, %v2836_v19, 384  ;;  %v853_v35 = vsel %vm841_vm10, %v2839_v20, 384  ;;  %vm878_vm12 = vcmp.lt.s32.totalorder %v877_v32, %v851_v33  ;;  %v854_v41 = vsel %vm842_vm11, %v2848_v22, 384 }
 0x2ff   : > { %v879_v37 = vsel %vm878_vm12, %v877_v32, %v851_v33  ;;  %vm894_vm13 = vcmp.lt.s32.totalorder %v852_v34, %v853_v35  ;;  %866 = vmin.xlane.f32.xlu0 %v865_v36  ;;  %v864_v61 = vcvt.s32.f32 %v862_v58 }
 0x300   : > { %v2876_v38 = vpop.xlane.xlu1 %832  ;;  %v881_v39 = vshra.s32 %v879_v37, 16  ;;  %v895_v40 = vsel %vm894_vm13, %v852_v34, %v853_v35  ;;  %v880_v62 = vand.u32 65535, %v879_v37 }
 0x301   : > { %vm843_vm14 = vcmp.eq.f32.partialorder %v2825_v11, %v2876_v38  ;;  %vm844_vm15 = vcmp.eq.f32.partialorder %v2827_v14, %v2876_v38  ;;  %vm845_vm0 = vcmp.eq.f32.partialorder %v2830_v17, %v2876_v38  ;;  %vm896_vm1 = vcmp.lt.s32.totalorder %v895_v40, %v854_v41 }
 0x302   : > { %v855_v42 = vsel %vm843_vm14, %v2836_v19, 384  ;;  %v856_v43 = vsel %vm844_vm15, %v2839_v20, 384  ;;  %v883_v45 = vcvt.s32.f32 %v881_v39  ;;  %v897_v46 = vsel %vm896_vm1, %v895_v40, %v854_v41 }
 0x303   : > { %vm912_vm2 = vcmp.lt.s32.totalorder %v855_v42, %v856_v43  ;;  %v899_v48 = vshra.s32 %v897_v46, 16  ;;  %v857_v50 = vsel %vm845_vm0, %v2848_v22, 384  ;;  %v882_v4 = vcvt.s32.f32 %v880_v62 }
 0x304   : > { %884 = vmin.xlane.f32.xlu1 %v883_v45  ;;  %v913_v51 = vsel %vm912_vm2, %v855_v42, %v856_v43  ;;  %v898_v5 = vand.u32 65535, %v897_v46 }
 0x305   : > { %vm914_vm3 = vcmp.lt.s32.totalorder %v913_v51, %v857_v50  ;;  %v901_v52 = vcvt.s32.f32 %v899_v48 }
 0x306   : > { %v915_v54 = vsel %vm914_vm3, %v913_v51, %v857_v50  ;;  %v900_v12 = vcvt.s32.f32 %v898_v5 }
 0x307   : > { %v917_v55 = vshra.s32 %v915_v54, 16  ;;  %902 = vmin.xlane.f32.xlu0 %v901_v52  ;;  %v916_v9 = vand.u32 65535, %v915_v54 }
 0x309   : > { %v919_v57 = vcvt.s32.f32 %v917_v55  ;;  %v918_v16 = vcvt.s32.f32 %v916_v9 }
 0x30b   : > { %920 = vmin.xlane.f32.xlu1 %v919_v57 }
 0x38c   : > { %v867_v60 = vpop.xlane.xlu0 %866 }
 0x38d   : > { %vm868_vm4 = vcmp.eq.f32.partialorder %v865_v36, %v867_v60  ;;  %v873_v0 = vcvt.f32.s32 %v867_v60 }
 0x38e   : > { %v869_v1 = vsel %vm868_vm4, %v864_v61, inf }
 0x38f   : > { %870 = vmin.xlane.f32.xlu0 %v869_v1  ;;  %v874_v25 = vshll.u32 %v873_v0, 16 }
 0x391   : > { %v885_v2 = vpop.xlane.xlu1 %884 }
 0x392   : > { %vm886_vm5 = vcmp.eq.f32.partialorder %v883_v45, %v885_v2  ;;  %v891_v7 = vcvt.f32.s32 %v885_v2 }
 0x393   : > { %v887_v8 = vsel %vm886_vm5, %v882_v4, inf }
 0x394   : > { %888 = vmin.xlane.f32.xlu1 %v887_v8  ;;  %v903_v10 = vpop.xlane.xlu0 %902  ;;  %v892_v29 = vshll.u32 %v891_v7, 16 }
 0x395   : > { %vm904_vm6 = vcmp.eq.f32.partialorder %v901_v52, %v903_v10  ;;  %v909_v31 = vcvt.f32.s32 %v903_v10  ;;  %v944_v52 = vmax.f32 %v2865_v30, 0.0 }
 0x396   : > { %v905_v13 = vsel %vm904_vm6, %v900_v12, inf }
 0x397   : > { %906 = vmin.xlane.f32.xlu0 %v905_v13  ;;  %v910_v41 = vshll.u32 %v909_v31, 16 }
 0x398   : > { %v921_v15 = vpop.xlane.xlu1 %920 }
 0x399   : > { %vm922_vm7 = vcmp.eq.f32.partialorder %v919_v57, %v921_v15  ;;  %v927_v42 = vcvt.f32.s32 %v921_v15 }
 0x39a   : > { %v923_v18 = vsel %vm922_vm7, %v918_v16, inf }
 0x39b   : > { %924 = vmin.xlane.f32.xlu1 %v923_v18  ;;  %v928_v54 = vshll.u32 %v927_v42, 16 }
 0x41c   : > { %v871_v23 = vpop.xlane.xlu0 %870 }
 0x41d   : > { %v872_v26 = vcvt.f32.s32 %v871_v23 }
 0x41f   : > { %v875_v27 = vadd.s32 %v874_v25, %v872_v26 }
 0x421   : > { %v889_v32 = vpop.xlane.xlu1 %888  ;;  %vm930_vm8 = vcmp.eq.s32.totalorder %v2836_v19, %v875_v27  ;;  %vm931_vm9 = vcmp.eq.s32.totalorder %v2839_v20, %v875_v27  ;;  %vm932_vm10 = vcmp.eq.s32.totalorder %v2848_v22, %v875_v27 }
 0x422   : > { %v890_v33 = vcvt.f32.s32 %v889_v32  ;;  %v2892_v34 = vsel %vm931_vm9, %v942_v28, 0.0  ;;  %v2894_v35 = vsel %vm932_vm10, %v942_v28, 0.0  ;;  %v2897_v36 = vsel %vm930_vm8, -inf, %v2799_v44 }
 0x423   : > { %v2900_v37 = vsel %vm931_vm9, -inf, %v2801_v47  ;;  %v2906_v40 = vsel %vm930_vm8, %v942_v28, 0.0  ;;  %v2909_v45 = vsel %vm932_vm10, -inf, %v2803_v49 }
 0x424   : > { %v2902_v21 = vadd.s32 %v892_v29, %v890_v33  ;;  %v970_v39 = vmax.f32 %v2897_v36, %v2900_v37  ;;  %v907_v43 = vpop.xlane.xlu0 %906 }
 0x425   : > { %v908_v46 = vcvt.f32.s32 %v907_v43 }
 0x426   : > { %v971_v44 = vmax.f32 %v970_v39, %v2909_v45  ;;  %vm933_vm11 = vcmp.eq.s32.totalorder %v2836_v19, %v2902_v21  ;;  %vm934_vm12 = vcmp.eq.s32.totalorder %v2839_v20, %v2902_v21  ;;  %vm935_vm13 = vcmp.eq.s32.totalorder %v2848_v22, %v2902_v21 }
 0x427   : > { %v2922_v47 = vsel %vm933_vm11, -inf, %v2807_v53  ;;  %v2928_v49 = vsel %vm934_vm12, -inf, %v2809_v56  ;;  %v911_v48 = vadd.s32 %v910_v41, %v908_v46  ;;  %v2937_v53 = vsel %vm935_vm13, -inf, %v2812_v59 }
 0x428   : > { %972 = vmax.xlane.f32.xlu0 %v971_v44  ;;  %v925_v50 = vpop.xlane.xlu1 %924  ;;  %v974_v51 = vmax.f32 %v2922_v47, %v2928_v49 }
 0x429   : > { %v926_v55 = vcvt.f32.s32 %v925_v50  ;;  %vm936_vm14 = vcmp.eq.s32.totalorder %v2836_v19, %v911_v48  ;;  %vm937_vm15 = vcmp.eq.s32.totalorder %v2839_v20, %v911_v48  ;;  %vm938_vm0 = vcmp.eq.s32.totalorder %v2848_v22, %v911_v48 }
 0x42a   : > { %v975_v57 = vmax.f32 %v974_v51, %v2937_v53  ;;  %v2945_v58 = vsel %vm937_vm15, %v944_v52, 0.0  ;;  %v2947_v30 = vsel %vm938_vm0, %v944_v52, 0.0  ;;  %v2950_v60 = vsel %vm936_vm14, -inf, %v2816_v63 }
 0x42b   : > { %v2943_v56 = vadd.s32 %v928_v54, %v926_v55  ;;  %v2953_v59 = vsel %vm937_vm15, -inf, %v2818_v3  ;;  %v2955_v61 = vsel %vm936_vm14, %v944_v52, 0.0  ;;  %v2966_v63 = vsel %vm938_vm0, -inf, %v2821_v6 }
 0x42c   : > { %976 = vmax.xlane.f32.xlu1 %v975_v57  ;;  %v978_v62 = vmax.f32 %v2950_v60, %v2953_v59 }
 0x42d   : > { %vm939_vm1 = vcmp.eq.s32.totalorder %v2836_v19, %v2943_v56  ;;  %vm940_vm2 = vcmp.eq.s32.totalorder %v2839_v20, %v2943_v56  ;;  %vm941_vm3 = vcmp.eq.s32.totalorder %v2848_v22, %v2943_v56 }
 0x42e   : > { %v2972_v3 = vsel %vm939_vm1, -inf, %v2825_v11  ;;  %v2978_v1 = vsel %vm940_vm2, -inf, %v2827_v14  ;;  %v979_v2 = vmax.f32 %v978_v62, %v2966_v63  ;;  %v2987_v6 = vsel %vm941_vm3, -inf, %v2830_v17 }
 0x42f   : > { %v982_v4 = vmax.f32 %v2972_v3, %v2978_v1 }
 0x430   : > { %980 = vmax.xlane.f32.xlu0 %v979_v2 }
 0x431   : > { %v983_v11 = vmax.f32 %v982_v4, %v2987_v6 }
 0x433   : > { %984 = vmax.xlane.f32.xlu1 %v983_v11 }
 0x4b5   : > { %v2990_v5 = vpop.xlane.xlu0 %972 }
 0x4b6   : > { %vm986_vm4 = vcmp.eq.f32.partialorder %v2897_v36, %v2990_v5  ;;  %vm987_vm5 = vcmp.eq.f32.partialorder %v2900_v37, %v2990_v5  ;;  %vm988_vm6 = vcmp.eq.f32.partialorder %v2909_v45, %v2990_v5 }
 0x4b7   : > { %v998_v14 = vsel %vm986_vm4, %v2836_v19, 384  ;;  %v999_v17 = vsel %vm987_vm5, %v2839_v20, 384  ;;  %v1000_v10 = vsel %vm988_vm6, %v2848_v22, 384 }
 0x4b8   : > { %vm1010_vm7 = vcmp.lt.s32.totalorder %v998_v14, %v999_v17 }
 0x4b9   : > { %v3000_v8 = vpop.xlane.xlu1 %976  ;;  %v1011_v9 = vsel %vm1010_vm7, %v998_v14, %v999_v17 }
 0x4ba   : > { %vm989_vm8 = vcmp.eq.f32.partialorder %v2922_v47, %v3000_v8  ;;  %vm990_vm9 = vcmp.eq.f32.partialorder %v2928_v49, %v3000_v8  ;;  %vm991_vm10 = vcmp.eq.f32.partialorder %v2937_v53, %v3000_v8  ;;  %vm1012_vm14 = vcmp.lt.s32.totalorder %v1011_v9, %v1000_v10 }
 0x4bb   : > { %v1001_v12 = vsel %vm989_vm8, %v2836_v19, 384  ;;  %v1002_v13 = vsel %vm990_vm9, %v2839_v20, 384  ;;  %v1013_v15 = vsel %vm1012_vm14, %v1011_v9, %v1000_v10  ;;  %v1003_v18 = vsel %vm991_vm10, %v2848_v22, 384 }
 0x4bc   : > { %vm1028_vm15 = vcmp.lt.s32.totalorder %v1001_v12, %v1002_v13  ;;  %v1015_v16 = vshra.s32 %v1013_v15, 16  ;;  %v1014_v54 = vand.u32 65535, %v1013_v15  ;;  %v1095_v21 = vmax.f32 %v3000_v8, 0.0 }
 0x4bd   : > { %v1029_v0 = vsel %vm1028_vm15, %v1001_v12, %v1002_v13  ;;  %v3012_v7 = vpop.xlane.xlu0 %980 }
 0x4be   : > { %vm1030_vm0 = vcmp.lt.s32.totalorder %v1029_v0, %v1003_v18  ;;  %vm992_vm4 = vcmp.eq.f32.partialorder %v2950_v60, %v3012_v7  ;;  %vm993_vm5 = vcmp.eq.f32.partialorder %v2953_v59, %v3012_v7  ;;  %vm994_vm6 = vcmp.eq.f32.partialorder %v2966_v63, %v3012_v7 }
 0x4bf   : > { %v1004_v23 = vsel %vm992_vm4, %v2836_v19, 384  ;;  %v1005_v25 = vsel %vm993_vm5, %v2839_v20, 384  ;;  %v1017_v26 = vcvt.s32.f32 %v1015_v16  ;;  %v1031_v28 = vsel %vm1030_vm0, %v1029_v0, %v1003_v18 }
 0x4c0   : > { %v3022_v27 = vpop.xlane.xlu1 %984  ;;  %v1033_v32 = vshra.s32 %v1031_v28, 16  ;;  %v1006_v33 = vsel %vm994_vm6, %v2848_v22, 384  ;;  %vm1046_vm10 = vcmp.lt.s32.totalorder %v1004_v23, %v1005_v25  ;;  %v1016_v57 = vcvt.s32.f32 %v1014_v54 }
 0x4c1   : > { %vm995_vm7 = vcmp.eq.f32.partialorder %v2972_v3, %v3022_v27  ;;  %vm996_vm8 = vcmp.eq.f32.partialorder %v2978_v1, %v3022_v27  ;;  %vm997_vm9 = vcmp.eq.f32.partialorder %v2987_v6, %v3022_v27  ;;  %1018 = vmin.xlane.f32.xlu0 %v1017_v26  ;;  %v1047_v41 = vsel %vm1046_vm10, %v1004_v23, %v1005_v25 }
 0x4c2   : > { %v1007_v29 = vsel %vm995_vm7, %v2836_v19, 384  ;;  %v1008_v31 = vsel %vm996_vm8, %v2839_v20, 384  ;;  %v1035_v39 = vcvt.s32.f32 %v1033_v32  ;;  %v1009_v42 = vsel %vm997_vm9, %v2848_v22, 384 }
 0x4c3   : > { %vm1064_vm14 = vcmp.lt.s32.totalorder %v1007_v29, %v1008_v31  ;;  %vm1048_vm15 = vcmp.lt.s32.totalorder %v1047_v41, %v1006_v33  ;;  %v1032_v62 = vand.u32 65535, %v1031_v28 }
 0x4c4   : > { %v1065_v43 = vsel %vm1064_vm14, %v1007_v29, %v1008_v31  ;;  %1036 = vmin.xlane.f32.xlu1 %v1035_v39  ;;  %v1049_v46 = vsel %vm1048_vm15, %v1047_v41, %v1006_v33  ;;  %v945_v31 = vmax.f32 %v2876_v38, 0.0  ;;  %v1094_v41 = vmax.f32 %v2990_v5, 0.0 }
 0x4c5   : > { %vm1066_vm0 = vcmp.lt.s32.totalorder %v1065_v43, %v1009_v42  ;;  %v1051_v48 = vshra.s32 %v1049_v46, 16  ;;  %v1034_v11 = vcvt.s32.f32 %v1032_v62  ;;  %v1050_v14 = vand.u32 65535, %v1049_v46 }
 0x4c6   : > { %v1067_v44 = vsel %vm1066_vm0, %v1065_v43, %v1009_v42 }
 0x4c7   : > { %v1069_v50 = vshra.s32 %v1067_v44, 16  ;;  %v1053_v51 = vcvt.s32.f32 %v1051_v48  ;;  %v1068_v17 = vand.u32 65535, %v1067_v44  ;;  %v1052_v12 = vcvt.s32.f32 %v1050_v14 }
 0x4c9   : > { %v1071_v52 = vcvt.s32.f32 %v1069_v50  ;;  %1054 = vmin.xlane.f32.xlu0 %v1053_v51  ;;  %v1070_v16 = vcvt.s32.f32 %v1068_v17  ;;  %v956_v17 = vsel %vm940_vm2, %v945_v31, 0.0 }
 0x4cb   : > { %1072 = vmin.xlane.f32.xlu1 %v1071_v52 }
 0x54e   : > { %v1019_v55 = vpop.xlane.xlu0 %1018 }
 0x54f   : > { %vm1020_vm4 = vcmp.eq.f32.partialorder %v1017_v26, %v1019_v55  ;;  %v1025_v0 = vcvt.f32.s32 %v1019_v55  ;;  %v943_v26 = vmax.f32 %v2854_v24, 0.0 }
 0x550   : > { %v1021_v2 = vsel %vm1020_vm4, %v1016_v57, inf }
 0x551   : > { %1022 = vmin.xlane.f32.xlu0 %v1021_v2  ;;  %v1037_v4 = vpop.xlane.xlu1 %1036  ;;  %v1026_v28 = vshll.u32 %v1025_v0, 16  ;;  %v950_v32 = vsel %vm934_vm12, %v943_v26, 0.0  ;;  %v951_v33 = vsel %vm935_vm13, %v943_v26, 0.0  ;;  %v949_v38 = vsel %vm933_vm11, %v943_v26, 0.0 }
 0x552   : > { %vm1038_vm5 = vcmp.eq.f32.partialorder %v1035_v39, %v1037_v4  ;;  %v1043_v23 = vcvt.f32.s32 %v1037_v4 }
 0x553   : > { %v1039_v9 = vsel %vm1038_vm5, %v1034_v11, inf }
 0x554   : > { %1040 = vmin.xlane.f32.xlu1 %v1039_v9  ;;  %v1044_v42 = vshll.u32 %v1043_v23, 16 }
 0x556   : > { %v1055_v10 = vpop.xlane.xlu0 %1054 }
 0x557   : > { %vm1056_vm6 = vcmp.eq.f32.partialorder %v1053_v51, %v1055_v10  ;;  %v1061_v43 = vcvt.f32.s32 %v1055_v10 }
 0x558   : > { %v1073_v13 = vpop.xlane.xlu1 %1072  ;;  %v1057_v15 = vsel %vm1056_vm6, %v1052_v12, inf }
 0x559   : > { %vm1074_vm7 = vcmp.eq.f32.partialorder %v1071_v52, %v1073_v13  ;;  %1058 = vmin.xlane.f32.xlu0 %v1057_v15  ;;  %v1079_v46 = vcvt.f32.s32 %v1073_v13  ;;  %v1096_v13 = vmax.f32 %v3012_v7, 0.0 }
 0x55a   : > { %v1075_v18 = vsel %vm1074_vm7, %v1070_v16, inf }
 0x55b   : > { %1076 = vmin.xlane.f32.xlu1 %v1075_v18  ;;  %v1080_v57 = vshll.u32 %v1079_v46, 16  ;;  %v1097_v18 = vmax.f32 %v3022_v27, 0.0 }
 0x5de   : > { %v1023_v25 = vpop.xlane.xlu0 %1022 }
 0x5df   : > { %v1024_v29 = vcvt.f32.s32 %v1023_v25 }
 0x5e1   : > { %v1027_v39 = vadd.s32 %v1026_v28, %v1024_v29  ;;  %v1041_v44 = vpop.xlane.xlu1 %1040 }
 0x5e2   : > { %v1042_v24 = vcvt.f32.s32 %v1041_v44 }
 0x5e3   : > { %vm1082_vm8 = vcmp.eq.s32.totalorder %v2836_v19, %v1027_v39  ;;  %vm1083_vm9 = vcmp.eq.s32.totalorder %v2839_v20, %v1027_v39  ;;  %vm1084_vm10 = vcmp.eq.s32.totalorder %v2848_v22, %v1027_v39 }
 0x5e4   : > { %v3050_v48 = vsel %vm1082_vm8, -inf, %v2897_v36  ;;  %v3053_v5 = vsel %vm1083_vm9, -inf, %v2900_v37  ;;  %v3056_v50 = vsel %vm1082_vm8, %v1094_v41, %v2906_v40  ;;  %v1045_v51 = vadd.s32 %v1044_v42, %v1042_v24 }
 0x5e5   : > { %v1122_v52 = vmax.f32 %v3050_v48, %v3053_v5  ;;  %v3061_v54 = vsel %vm1083_vm9, %v1094_v41, %v2892_v34  ;;  %v3064_v55 = vsel %vm1084_vm10, %v1094_v41, %v2894_v35  ;;  %v1062_v36 = vshll.u32 %v1061_v43, 16 }
 0x5e6   : > { %v3068_v37 = vsel %vm1084_vm10, -inf, %v2909_v45  ;;  %v1059_v62 = vpop.xlane.xlu0 %1058  ;;  %vm1085_vm11 = vcmp.eq.s32.totalorder %v2836_v19, %v1045_v51  ;;  %vm1086_vm12 = vcmp.eq.s32.totalorder %v2839_v20, %v1045_v51  ;;  %vm1087_vm13 = vcmp.eq.s32.totalorder %v2848_v22, %v1045_v51 }
 0x5e7   : > { %v1123_v40 = vmax.f32 %v1122_v52, %v3068_v37  ;;  %v1060_v34 = vcvt.f32.s32 %v1059_v62  ;;  %v3076_v8 = vsel %vm1087_vm13, %v1095_v21, %v951_v33  ;;  %v3079_v4 = vsel %vm1085_vm11, -inf, %v2922_v47 }
 0x5e8   : > { %v1077_v2 = vpop.xlane.xlu1 %1076  ;;  %v3082_v45 = vsel %vm1086_vm12, -inf, %v2928_v49  ;;  %v3084_v11 = vsel %vm1086_vm12, %v1095_v21, %v950_v32  ;;  %v3086_v14 = vsel %vm1085_vm11, %v1095_v21, %v949_v38  ;;  %v957_v47 = vsel %vm941_vm3, %v945_v31, 0.0 }
 0x5e9   : > { %v1078_v35 = vcvt.f32.s32 %v1077_v2  ;;  %1124 = vmax.xlane.f32.xlu0 %v1123_v40  ;;  %v1063_v9 = vadd.s32 %v1062_v36, %v1060_v34  ;;  %v1126_v12 = vmax.f32 %v3079_v4, %v3082_v45  ;;  %v955_v49 = vsel %vm939_vm1, %v945_v31, 0.0 }
 0x5ea   : > { %v3103_v16 = vsel %vm1087_vm13, -inf, %v2937_v53 }
 0x5eb   : > { %v1081_v10 = vadd.s32 %v1080_v57, %v1078_v35  ;;  %v1127_v15 = vmax.f32 %v1126_v12, %v3103_v16  ;;  %vm1088_vm2 = vcmp.eq.s32.totalorder %v2836_v19, %v1063_v9  ;;  %vm1089_vm14 = vcmp.eq.s32.totalorder %v2839_v20, %v1063_v9 }
 0x5ec   : > { %vm1090_vm15 = vcmp.eq.s32.totalorder %v2848_v22, %v1063_v9  ;;  %v3113_v56 = vsel %vm1088_vm2, -inf, %v2950_v60  ;;  %v3116_v7 = vsel %vm1089_vm14, -inf, %v2953_v59  ;;  %v3135_v0 = vsel %vm1089_vm14, %v1096_v13, %v2945_v58 }
 0x5ed   : > { %vm1091_vm1 = vcmp.eq.s32.totalorder %v2836_v19, %v1081_v10  ;;  %1128 = vmax.xlane.f32.xlu1 %v1127_v15  ;;  %v1130_v53 = vmax.f32 %v3113_v56, %v3116_v7  ;;  %vm1092_vm3 = vcmp.eq.s32.totalorder %v2839_v20, %v1081_v10  ;;  %vm1093_vm0 = vcmp.eq.s32.totalorder %v2848_v22, %v1081_v10 }
 0x5ee   : > { %v3126_v27 = vsel %vm1091_vm1, -inf, %v2972_v3  ;;  %v3129_v60 = vsel %vm1090_vm15, -inf, %v2966_v63  ;;  %v3132_v59 = vsel %vm1092_vm3, -inf, %v2978_v1  ;;  %v3138_v23 = vsel %vm1090_vm15, %v1096_v13, %v2947_v30 }
 0x5ef   : > { %v1131_v25 = vmax.f32 %v1130_v53, %v3129_v60  ;;  %v1134_v26 = vmax.f32 %v3126_v27, %v3132_v59  ;;  %v3146_v3 = vsel %vm1088_vm2, %v1096_v13, %v2955_v61  ;;  %v3148_v63 = vsel %vm1092_vm3, %v1097_v18, %v956_v17 }
 0x5f0   : > { %v3151_v1 = vsel %vm1093_vm0, -inf, %v2987_v6  ;;  %v3153_v58 = vsel %vm1093_vm0, %v1097_v18, %v957_v47  ;;  %v3157_v30 = vsel %vm1091_vm1, %v1097_v18, %v955_v49 }
 0x5f1   : > { %1132 = vmax.xlane.f32.xlu0 %v1131_v25  ;;  %v1135_v28 = vmax.f32 %v1134_v26, %v3151_v1 }
 0x5f3   : > { %1136 = vmax.xlane.f32.xlu1 %v1135_v28 }
 0x676   : > { %v3160_v29 = vpop.xlane.xlu0 %1124 }
 0x677   : > { %vm1138_vm4 = vcmp.eq.f32.partialorder %v3050_v48, %v3160_v29  ;;  %vm1139_vm5 = vcmp.eq.f32.partialorder %v3053_v5, %v3160_v29  ;;  %vm1140_vm6 = vcmp.eq.f32.partialorder %v3068_v37, %v3160_v29 }
 0x678   : > { %v1150_v61 = vsel %vm1138_vm4, %v2836_v19, 384  ;;  %v1151_v6 = vsel %vm1139_vm5, %v2839_v20, 384  ;;  %v1152_v31 = vsel %vm1140_vm6, %v2848_v22, 384 }
 0x679   : > { %vm1162_vm7 = vcmp.lt.s32.totalorder %v1150_v61, %v1151_v6 }
 0x67a   : > { %v1163_v32 = vsel %vm1162_vm7, %v1150_v61, %v1151_v6  ;;  %v3171_v33 = vpop.xlane.xlu1 %1128 }
 0x67b   : > { %vm1164_vm8 = vcmp.lt.s32.totalorder %v1163_v32, %v1152_v31  ;;  %vm1141_vm9 = vcmp.eq.f32.partialorder %v3079_v4, %v3171_v33  ;;  %vm1142_vm10 = vcmp.eq.f32.partialorder %v3082_v45, %v3171_v33  ;;  %vm1143_vm11 = vcmp.eq.f32.partialorder %v3103_v16, %v3171_v33 }
 0x67c   : > { %v1153_v39 = vsel %vm1141_vm9, %v2836_v19, 384  ;;  %v1154_v41 = vsel %vm1142_vm10, %v2839_v20, 384  ;;  %v1165_v42 = vsel %vm1164_vm8, %v1163_v32, %v1152_v31  ;;  %v1155_v24 = vsel %vm1143_vm11, %v2848_v22, 384 }
 0x67d   : > { %v1167_v43 = vshra.s32 %v1165_v42, 16  ;;  %vm1180_vm12 = vcmp.lt.s32.totalorder %v1153_v39, %v1154_v41  ;;  %v1166_v18 = vand.u32 65535, %v1165_v42 }
 0x67e   : > { %v3181_v46 = vpop.xlane.xlu0 %1132  ;;  %v1181_v44 = vsel %vm1180_vm12, %v1153_v39, %v1154_v41 }
 0x67f   : > { %vm1144_vm13 = vcmp.eq.f32.partialorder %v3113_v56, %v3181_v46  ;;  %vm1145_vm2 = vcmp.eq.f32.partialorder %v3116_v7, %v3181_v46  ;;  %v1169_v52 = vcvt.s32.f32 %v1167_v43  ;;  %vm1182_vm14 = vcmp.lt.s32.totalorder %v1181_v44, %v1155_v24 }
 0x680   : > { %v1156_v38 = vsel %vm1144_vm13, %v2836_v19, 384  ;;  %v1157_v51 = vsel %vm1145_vm2, %v2839_v20, 384  ;;  %v3190_v21 = vpop.xlane.xlu1 %1136  ;;  %vm1146_vm15 = vcmp.eq.f32.partialorder %v3129_v60, %v3181_v46  ;;  %v1183_v62 = vsel %vm1182_vm14, %v1181_v44, %v1155_v24 }
 0x681   : > { %vm1147_vm1 = vcmp.eq.f32.partialorder %v3126_v27, %v3190_v21  ;;  %vm1148_vm3 = vcmp.eq.f32.partialorder %v3132_v59, %v3190_v21  ;;  %vm1149_vm0 = vcmp.eq.f32.partialorder %v3151_v1, %v3190_v21  ;;  %1170 = vmin.xlane.f32.xlu0 %v1169_v52  ;;  %v1185_v40 = vshra.s32 %v1183_v62, 16 }
 0x682   : > { %v1159_v36 = vsel %vm1147_vm1, %v2836_v19, 384  ;;  %v1160_v57 = vsel %vm1148_vm3, %v2839_v20, 384  ;;  %vm1198_vm4 = vcmp.lt.s32.totalorder %v1156_v38, %v1157_v51  ;;  %v1158_v2 = vsel %vm1146_vm15, %v2848_v22, 384 }
 0x683   : > { %vm1216_vm5 = vcmp.lt.s32.totalorder %v1159_v36, %v1160_v57  ;;  %v1199_v34 = vsel %vm1198_vm4, %v1156_v38, %v1157_v51  ;;  %v1161_v35 = vsel %vm1149_vm0, %v2848_v22, 384  ;;  %v1187_v9 = vcvt.s32.f32 %v1185_v40 }
 0x684   : > { %v1217_v17 = vsel %vm1216_vm5, %v1159_v36, %v1160_v57  ;;  %vm1200_vm6 = vcmp.lt.s32.totalorder %v1199_v34, %v1158_v2  ;;  %v1168_v25 = vcvt.s32.f32 %v1166_v18  ;;  %v1184_v26 = vand.u32 65535, %v1183_v62 }
 0x685   : > { %vm1218_vm7 = vcmp.lt.s32.totalorder %v1217_v17, %v1161_v35  ;;  %v1201_v10 = vsel %vm1200_vm6, %v1199_v34, %v1158_v2  ;;  %1188 = vmin.xlane.f32.xlu1 %v1187_v9  ;;  %v1246_v2 = vmax.f32 %v3160_v29, 0.0 }
 0x686   : > { %v1219_v12 = vsel %vm1218_vm7, %v1217_v17, %v1161_v35  ;;  %v1203_v47 = vshra.s32 %v1201_v10, 16  ;;  %v1186_v6 = vcvt.s32.f32 %v1184_v26  ;;  %v1202_v31 = vand.u32 65535, %v1201_v10 }
 0x687   : > { %v1221_v49 = vshra.s32 %v1219_v12, 16  ;;  %v1220_v32 = vand.u32 65535, %v1219_v12 }
 0x688   : > { %v1205_v13 = vcvt.s32.f32 %v1203_v47  ;;  %v1204_v43 = vcvt.s32.f32 %v1202_v31 }
 0x689   : > { %v1223_v15 = vcvt.s32.f32 %v1221_v49  ;;  %v1222_v24 = vcvt.s32.f32 %v1220_v32 }
 0x68a   : > { %1206 = vmin.xlane.f32.xlu0 %v1205_v13 }
 0x68b   : > { %1224 = vmin.xlane.f32.xlu1 %v1223_v15 }
 0x70e   : > { %v1171_v53 = vpop.xlane.xlu0 %1170 }
 0x70f   : > { %vm1172_vm8 = vcmp.eq.f32.partialorder %v1169_v52, %v1171_v53  ;;  %v1177_v51 = vcvt.f32.s32 %v1171_v53 }
 0x710   : > { %v1173_v28 = vsel %vm1172_vm8, %v1168_v25, inf  ;;  %v1247_v25 = vmax.f32 %v3171_v33, 0.0 }
 0x711   : > { %1174 = vmin.xlane.f32.xlu0 %v1173_v28  ;;  %v1178_v36 = vshll.u32 %v1177_v51, 16 }
 0x712   : > { %v1189_v61 = vpop.xlane.xlu1 %1188 }
 0x713   : > { %vm1190_vm9 = vcmp.eq.f32.partialorder %v1187_v9, %v1189_v61  ;;  %v1195_v62 = vcvt.f32.s32 %v1189_v61 }
 0x714   : > { %v1191_v39 = vsel %vm1190_vm9, %v1186_v6, inf }
 0x715   : > { %1192 = vmin.xlane.f32.xlu1 %v1191_v39  ;;  %v1196_v9 = vshll.u32 %v1195_v62, 16  ;;  %v1248_v39 = vmax.f32 %v3181_v46, 0.0 }
 0x717   : > { %v1207_v41 = vpop.xlane.xlu0 %1206 }
 0x718   : > { %v1225_v44 = vpop.xlane.xlu1 %1224  ;;  %vm1208_vm10 = vcmp.eq.f32.partialorder %v1205_v13, %v1207_v41  ;;  %v1213_v34 = vcvt.f32.s32 %v1207_v41 }
 0x719   : > { %vm1226_vm11 = vcmp.eq.f32.partialorder %v1223_v15, %v1225_v44  ;;  %v1209_v42 = vsel %vm1208_vm10, %v1204_v43, inf  ;;  %v1231_v35 = vcvt.f32.s32 %v1225_v44 }
 0x71a   : > { %v1227_v38 = vsel %vm1226_vm11, %v1222_v24, inf  ;;  %1210 = vmin.xlane.f32.xlu0 %v1209_v42  ;;  %v1214_v26 = vshll.u32 %v1213_v34, 16 }
 0x71b   : > { %1228 = vmin.xlane.f32.xlu1 %v1227_v38  ;;  %v1232_v28 = vshll.u32 %v1231_v35, 16 }
 0x79e   : > { %v1175_v52 = vpop.xlane.xlu0 %1174 }
 0x79f   : > { %v1176_v57 = vcvt.f32.s32 %v1175_v52 }
 0x7a1   : > { %v1179_v40 = vadd.s32 %v1178_v36, %v1176_v57 }
 0x7a2   : > { %v1193_v17 = vpop.xlane.xlu1 %1192 }
 0x7a3   : > { %vm1234_vm12 = vcmp.eq.s32.totalorder %v2836_v19, %v1179_v40  ;;  %vm1235_vm13 = vcmp.eq.s32.totalorder %v2839_v20, %v1179_v40  ;;  %vm1236_vm2 = vcmp.eq.s32.totalorder %v2848_v22, %v1179_v40  ;;  %v1194_v10 = vcvt.f32.s32 %v1193_v17 }
 0x7a4   : > { %v1262_v12 = vsel %vm1234_vm12, -inf, %v3050_v48  ;;  %v1263_v47 = vsel %vm1235_vm13, -inf, %v3053_v5  ;;  %v3211_v13 = vsel %vm1234_vm12, %v1246_v2, %v3056_v50  ;;  %v3214_v29 = vsel %vm1235_vm13, %v1246_v2, %v3061_v54 }
 0x7a5   : > { %v1274_v49 = vmax.f32 %v1262_v12, %v1263_v47  ;;  %v3217_v15 = vsel %vm1236_vm2, %v1246_v2, %v3064_v55  ;;  %v1197_v18 = vadd.s32 %v1196_v9, %v1194_v10  ;;  %v1264_v53 = vsel %vm1236_vm2, -inf, %v3068_v37 }
 0x7a7   : > { %v1211_v48 = vpop.xlane.xlu0 %1210  ;;  %v1275_v61 = vmax.f32 %v1274_v49, %v1264_v53  ;;  %vm1237_vm14 = vcmp.eq.s32.totalorder %v2836_v19, %v1197_v18  ;;  %vm1238_vm15 = vcmp.eq.s32.totalorder %v2839_v20, %v1197_v18  ;;  %vm1239_vm1 = vcmp.eq.s32.totalorder %v2848_v22, %v1197_v18 }
 0x7a8   : > { %v1229_v5 = vpop.xlane.xlu1 %1228  ;;  %v1212_v6 = vcvt.f32.s32 %v1211_v48  ;;  %v1265_v50 = vsel %vm1237_vm14, -inf, %v3079_v4  ;;  %v1266_v54 = vsel %vm1238_vm15, -inf, %v3082_v45  ;;  %v3227_v55 = vsel %vm1238_vm15, %v1247_v25, %v3084_v11 }
 0x7a9   : > { %v1230_v31 = vcvt.f32.s32 %v1229_v5  ;;  %1276 = vmax.xlane.f32.xlu0 %v1275_v61  ;;  %v3230_v32 = vsel %vm1239_vm1, %v1247_v25, %v3076_v8  ;;  %v1267_v41 = vsel %vm1239_vm1, -inf, %v3103_v16  ;;  %v1278_v43 = vmax.f32 %v1265_v50, %v1266_v54 }
 0x7aa   : > { %v1215_v37 = vadd.s32 %v1214_v26, %v1212_v6  ;;  %v3235_v44 = vsel %vm1237_vm14, %v1247_v25, %v3086_v14  ;;  %v1249_v4 = vmax.f32 %v3190_v21, 0.0 }
 0x7ab   : > { %v1233_v33 = vadd.s32 %v1232_v28, %v1230_v31  ;;  %v1279_v8 = vmax.f32 %v1278_v43, %v1267_v41  ;;  %v1427_v43 = vld [vmem:[#allocation8 + $0x8] sm:$0xff] }
 0x7ac   : > { %vm1240_vm3 = vcmp.eq.s32.totalorder %v2836_v19, %v1215_v37  ;;  %vm1241_vm0 = vcmp.eq.s32.totalorder %v2839_v20, %v1215_v37  ;;  %vm1242_vm4 = vcmp.eq.s32.totalorder %v2848_v22, %v1215_v37  ;;  %v1442_v37 = vld [vmem:[#allocation8 + $0x80] sm:$0xff] }
 0x7ad   : > { %vm1243_vm5 = vcmp.eq.s32.totalorder %v2836_v19, %v1233_v33  ;;  %v1268_v45 = vsel %vm1240_vm3, -inf, %v3113_v56  ;;  %v1269_v11 = vsel %vm1241_vm0, -inf, %v3116_v7  ;;  %vm1244_vm6 = vcmp.eq.s32.totalorder %v2839_v20, %v1233_v33  ;;  %1280 = vmax.xlane.f32.xlu1 %v1279_v8  ;;  %v1459_v8 = vld [vmem:[#allocation8 + $0x108] sm:$0xff] }
 0x7ae   : > { %v1282_v16 = vmax.f32 %v1268_v45, %v1269_v11  ;;  %vm1245_vm7 = vcmp.eq.s32.totalorder %v2848_v22, %v1233_v33  ;;  %v1271_v14 = vsel %vm1243_vm5, -inf, %v3126_v27  ;;  %v1270_v46 = vsel %vm1242_vm4, -inf, %v3129_v60  ;;  %v1443_v33 = vld [vmem:[#allocation8 + $0x88] sm:$0xff] }
 0x7af   : > { %v1272_v21 = vsel %vm1244_vm6, -inf, %v3132_v59  ;;  %v3254_v24 = vsel %vm1241_vm0, %v1248_v39, %v3135_v0  ;;  %v3257_v56 = vsel %vm1242_vm4, %v1248_v39, %v3138_v23  ;;  %v3262_v38 = vsel %vm1240_vm3, %v1248_v39, %v3146_v3  ;;  %v1426_v39 = vld [vmem:[#allocation8] sm:$0xff] }
 0x7b0   : > { %v1283_v7 = vmax.f32 %v1282_v16, %v1270_v46  ;;  %v1286_v42 = vmax.f32 %v1271_v14, %v1272_v21  ;;  %v3265_v27 = vsel %vm1244_vm6, %v1249_v4, %v3148_v63  ;;  %v1273_v60 = vsel %vm1245_vm7, -inf, %v3151_v1  ;;  %v1444_v16 = vld [vmem:[#allocation8 + $0x90] sm:$0xff] }
 0x7b1   : > { %v3269_v59 = vsel %vm1245_vm7, %v1249_v4, %v3153_v58  ;;  %v3274_v0 = vsel %vm1243_vm5, %v1249_v4, %v3157_v30  ;;  %v1458_v4 = vld [vmem:[#allocation8 + $0x100] sm:$0xff] }
 0x7b2   : > { %1284 = vmax.xlane.f32.xlu0 %v1283_v7  ;;  %v1287_v23 = vmax.f32 %v1286_v42, %v1273_v60  ;;  %v1429_v7 = vld [vmem:[#allocation8 + $0x18] sm:$0xff]  ;;  %v1460_v42 = vld [vmem:[#allocation8 + $0x110] sm:$0xff] }
 0x7b4   : > { %1288 = vmax.xlane.f32.xlu1 %v1287_v23 }
 0x836   : > { %v3276_v51 = vpop.xlane.xlu0 %1276 }
 0x837   : > { %vm1290_vm8 = vcmp.eq.f32.partialorder %v1262_v12, %v3276_v51  ;;  %vm1291_vm9 = vcmp.eq.f32.partialorder %v1263_v47, %v3276_v51  ;;  %vm1292_vm10 = vcmp.eq.f32.partialorder %v1264_v53, %v3276_v51 }
 0x838   : > { %v1302_v3 = vsel %vm1290_vm8, %v2836_v19, 384  ;;  %v1303_v63 = vsel %vm1291_vm9, %v2839_v20, 384  ;;  %v1304_v1 = vsel %vm1292_vm10, %v2848_v22, 384 }
 0x839   : > { %vm1314_vm11 = vcmp.lt.s32.totalorder %v1302_v3, %v1303_v63 }
 0x83a   : > { %v1315_v58 = vsel %vm1314_vm11, %v1302_v3, %v1303_v63  ;;  %v3284_v30 = vpop.xlane.xlu1 %1280  ;;  %v1446_v63 = vld [vmem:[#allocation8 + $0xa0] sm:$0xff] }
 0x83b   : > { %vm1316_vm12 = vcmp.lt.s32.totalorder %v1315_v58, %v1304_v1  ;;  %vm1293_vm13 = vcmp.eq.f32.partialorder %v1265_v50, %v3284_v30  ;;  %vm1294_vm2 = vcmp.eq.f32.partialorder %v1266_v54, %v3284_v30  ;;  %vm1295_vm14 = vcmp.eq.f32.partialorder %v1267_v41, %v3284_v30 }
 0x83c   : > { %v3286_v52 = vsel %vm1316_vm12, %v1315_v58, %v1304_v1  ;;  %v1305_v36 = vsel %vm1293_vm13, %v2836_v19, 384  ;;  %v1306_v57 = vsel %vm1294_vm2, %v2839_v20, 384  ;;  %v1307_v10 = vsel %vm1295_vm14, %v2848_v22, 384  ;;  %v1447_v1 = vld [vmem:[#allocation8 + $0xa8] sm:$0xff]  ;;  %v1430_v58 = vld [vmem:[#allocation8 + $0x20] sm:$0xff] }
 0x83d   : > { %v1319_v62 = vshra.s32 %v3286_v52, 16  ;;  %vm1332_vm15 = vcmp.lt.s32.totalorder %v1305_v36, %v1306_v57  ;;  %v2125_v41 = vpack.c.bf16 %v1443_v33, %v1442_v37  ;;  %v1466_v37 = vld [vmem:[#allocation8 + $0x140] sm:$0xff]  ;;  %v1467_v33 = vld [vmem:[#allocation8 + $0x148] sm:$0xff] }
 0x83e   : > { %v1333_v9 = vsel %vm1332_vm15, %v1305_v36, %v1306_v57  ;;  %v2133_v36 = vpack.c.bf16 %v1447_v1, %v1446_v63  ;;  %v1431_v57 = vld [vmem:[#allocation8 + $0x28] sm:$0xff] }
 0x83f   : > { %v3294_v40 = vpop.xlane.xlu0 %1284  ;;  %v3301_v35 = vcvt.s32.f32 %v1319_v62  ;;  %vm1334_vm7 = vcmp.lt.s32.totalorder %v1333_v9, %v1307_v10  ;;  %2126 = vmatprep.subr.bf16.mxu0 %v2125_v41  ;;  %v1462_v62 = vld [vmem:[#allocation8 + $0x120] sm:$0xff] }
 0x840   : > { %vm1296_vm1 = vcmp.eq.f32.partialorder %v1268_v45, %v3294_v40  ;;  %vm1297_vm3 = vcmp.eq.f32.partialorder %v1269_v11, %v3294_v40  ;;  %vm1298_vm0 = vcmp.eq.f32.partialorder %v1270_v46, %v3294_v40  ;;  %v3312_v49 = vsel %vm1334_vm7, %v1333_v9, %v1307_v10  ;;  %v1428_v46 = vld [vmem:[#allocation8 + $0x10] sm:$0xff]  ;;  %v1449_v10 = vld [vmem:[#allocation8 + $0xb8] sm:$0xff] }
 0x841   : > { %v1308_v2 = vsel %vm1296_vm1, %v2836_v19, 384  ;;  %v1309_v34 = vsel %vm1297_vm3, %v2839_v20, 384  ;;  %v3303_v17 = vpop.xlane.xlu1 %1288  ;;  %1322 = vmin.xlane.f32.xlu0 %v3301_v35  ;;  %v1310_v18 = vsel %vm1298_vm0, %v2848_v22, 384  ;;  %v1337_v53 = vshra.s32 %v3312_v49, 16  ;;  %v1448_v9 = vld [vmem:[#allocation8 + $0xb0] sm:$0xff] }
 0x842   : > { %vm1299_vm4 = vcmp.eq.f32.partialorder %v1271_v14, %v3303_v17  ;;  %vm1300_vm5 = vcmp.eq.f32.partialorder %v1272_v21, %v3303_v17  ;;  %vm1301_vm6 = vcmp.eq.f32.partialorder %v1273_v60, %v3303_v17  ;;  %vm1350_vm8 = vcmp.lt.s32.totalorder %v1308_v2, %v1309_v34  ;;  %v1445_v14 = vld [vmem:[#allocation8 + $0x98] sm:$0xff] }
 0x843   : > { %v1311_v12 = vsel %vm1299_vm4, %v2836_v19, 384  ;;  %v1312_v47 = vsel %vm1300_vm5, %v2839_v20, 384  ;;  %v1351_v25 = vsel %vm1350_vm8, %v1308_v2, %v1309_v34  ;;  %v1313_v26 = vsel %vm1301_vm6, %v2848_v22, 384  ;;  %v1461_v60 = vld [vmem:[#allocation8 + $0x118] sm:$0xff]  ;;  %v1463_v2 = vld [vmem:[#allocation8 + $0x128] sm:$0xff] }
 0x844   : > { %vm1368_vm9 = vcmp.lt.s32.totalorder %v1311_v12, %v1312_v47  ;;  %vm1352_vm10 = vcmp.lt.s32.totalorder %v1351_v25, %v1310_v18  ;;  %v3317_v48 = vcvt.s32.f32 %v1337_v53  ;;  %v2127_v45 = vpack.c.bf16 %v1427_v43, %v1426_v39  ;;  %v1434_v43 = vld [vmem:[#allocation8 + $0x40] sm:$0xff] }
 0x845   : > { %v1369_v28 = vsel %vm1368_vm9, %v1311_v12, %v1312_v47  ;;  %v3319_v61 = vsel %vm1352_vm10, %v1351_v25, %v1310_v18  ;;  %v2157_v11 = vpack.c.bf16 %v1459_v8, %v1458_v4  ;;  %v2129_v21 = vpack.c.bf16 %v1445_v14, %v1444_v16  ;;  %v1464_v12 = vld [vmem:[#allocation8 + $0x130] sm:$0xff]  ;;  %v1465_v47 = vld [vmem:[#allocation8 + $0x138] sm:$0xff]  ;;  %v1435_v4 = vld [vmem:[#allocation8 + $0x48] sm:$0xff] }
 0x846   : > { %vm1370_vm11 = vcmp.lt.s32.totalorder %v1369_v28, %v1313_v26  ;;  %v1355_v6 = vshra.s32 %v3319_v61, 16  ;;  %1340 = vmin.xlane.f32.xlu1 %v3317_v48  ;;  %2128 = vmatpush3.bf16.msra.mxu0 %v2127_v45  ;;  %v2131_v23 = vpack.c.bf16 %v1429_v7, %v1428_v46  ;;  %v2161_v3 = vpack.c.bf16 %v1461_v60, %v1460_v42  ;;  %v1432_v25 = vld [vmem:[#allocation8 + $0x30] sm:$0xff]  ;;  %v1469_v14 = vld [vmem:[#allocation8 + $0x158] sm:$0xff] }
 0x847   : > { %v3321_v5 = vsel %vm1370_vm11, %v1369_v28, %v1313_v26  ;;  %2158 = vmatprep.subr.bf16.mxu1 %v2157_v11  ;;  %2130 = vmatprep.subr.bf16.mxu0 %v2129_v21  ;;  %v2165_v34 = vpack.c.bf16 %v1463_v2, %v1462_v62  ;;  %v2135_v18 = vpack.c.bf16 %v1431_v57, %v1430_v58  ;;  %v1433_v26 = vld [vmem:[#allocation8 + $0x38] sm:$0xff]  ;;  %v1452_v45 = vld [vmem:[#allocation8 + $0xd0] sm:$0xff]  ;;  %v1318_v58 = vand.u32 65535, %v3286_v52 }
 0x848   : > { %v1373_v31 = vshra.s32 %v3321_v5, 16  ;;  %v3326_v50 = vcvt.s32.f32 %v1355_v6  ;;  %2160 = vmatpush3.bf16.msra.mxu1 %v2157_v11  ;;  %v2137_v53 = vpack.c.bf16 %v1449_v10, %v1448_v9  ;;  %v2169_v28 = vpack.c.bf16 %v1465_v47, %v1464_v12  ;;  %v1450_v6 = vld [vmem:[#allocation8 + $0xc0] sm:$0xff]  ;;  %v1453_v11 = vld [vmem:[#allocation8 + $0xd8] sm:$0xff]  ;;  %v1468_v16 = vld [vmem:[#allocation8 + $0x150] sm:$0xff] }
 0x849   : > { %2162 = vmatprep.subr.bf16.mxu1 %v2161_v3  ;;  %v2139_v39 = vpack.c.bf16 %v1433_v26, %v1432_v25  ;;  %v2173_v8 = vpack.c.bf16 %v1467_v33, %v1466_v37  ;;  %v2143_v46 = vpack.c.bf16 %v1435_v4, %v1434_v43  ;;  %v2145_v21 = vpack.c.bf16 %v1453_v11, %v1452_v45  ;;  %v1436_v7 = vld [vmem:[#allocation8 + $0x50] sm:$0xff]  ;;  %v1437_v42 = vld [vmem:[#allocation8 + $0x58] sm:$0xff]  ;;  %v1439_v26 = vld [vmem:[#allocation8 + $0x68] sm:$0xff] }
 0x84a   : > { %v3328_v54 = vcvt.s32.f32 %v1373_v31  ;;  %1358 = vmin.xlane.f32.xlu0 %v3326_v50  ;;  %2132 = vmatpush3.bf16.msra.mxu0 %v2131_v23  ;;  %v1451_v31 = vld [vmem:[#allocation8 + $0xc8] sm:$0xff]  ;;  %v2177_v60 = vpack.c.bf16 %v1469_v14, %v1468_v16  ;;  %v1454_v23 = vld [vmem:[#allocation8 + $0xe0] sm:$0xff]  ;;  %v2147_v63 = vpack.c.bf16 %v1437_v42, %v1436_v7  ;;  %v1320_v57 = vcvt.s32.f32 %v1318_v58  ;;  %v1457_v37 = vld [vmem:[#allocation8 + $0xf8] sm:$0xff] }
 0x84b   : > { %2134 = vmatprep.subr.bf16.mxu0 %v2133_v36  ;;  %v2141_v41 = vpack.c.bf16 %v1451_v31, %v1450_v6  ;;  %v1336_v2 = vand.u32 65535, %v3312_v49  ;;  %v1372_v12 = vand.u32 65535, %v3321_v5  ;;  %v1470_v5 = vld [vmem:[#allocation8 + $0x160] sm:$0xff]  ;;  %v1471_v6 = vld [vmem:[#allocation8 + $0x168] sm:$0xff]  ;;  %v1456_v31 = vld [vmem:[#allocation8 + $0xf0] sm:$0xff] }
 0x84c   : > { %1376 = vmin.xlane.f32.xlu1 %v3328_v54  ;;  %2164 = vmatpush3.bf16.msra.mxu1 %v2161_v3  ;;  %v1455_v3 = vld [vmem:[#allocation8 + $0xe8] sm:$0xff]  ;;  %v2153_v33 = vpack.c.bf16 %v1457_v37, %v1456_v31  ;;  %v1473_v43 = vld [vmem:[#allocation8 + $0x178] sm:$0xff] }
 0x84d   : > { %2166 = vmatprep.subr.bf16.mxu1 %v2165_v34  ;;  %v2149_v1 = vpack.c.bf16 %v1455_v3, %v1454_v23  ;;  %v1338_v10 = vcvt.s32.f32 %v1336_v2 }
 0x84e   : > { %2136 = vmatpush3.bf16.msra.mxu0 %v2135_v18 }
 0x84f   : > { %2138 = vmatprep.subr.bf16.mxu0 %v2137_v53 }
 0x850   : > { %2168 = vmatpush3.bf16.msra.mxu1 %v2165_v34  ;;  %v1354_v34 = vand.u32 65535, %v3319_v61  ;;  %v1438_v61 = vld [vmem:[#allocation8 + $0x60] sm:$0xff] }
 0x851   : > { %2170 = vmatprep.subr.bf16.mxu1 %v2169_v28 }
 0x852   : > { %2140 = vmatpush3.bf16.msra.mxu0 %v2139_v39  ;;  %v1356_v52 = vcvt.s32.f32 %v1354_v34  ;;  %v1441_v39 = vld [vmem:[#allocation8 + $0x78] sm:$0xff] }
 0x853   : > { %2142 = vmatprep.subr.bf16.mxu0 %v2141_v41 }
 0x854   : > { %2172 = vmatpush3.bf16.msra.mxu1 %v2169_v28  ;;  %v2151_v28 = vpack.c.bf16 %v1439_v26, %v1438_v61 }
 0x855   : > { %2174 = vmatprep.subr.bf16.mxu1 %v2173_v8 }
 0x856   : > { %2144 = vmatpush3.bf16.msra.mxu0 %v2143_v46 }
 0x857   : > { %2146 = vmatprep.subr.bf16.mxu0 %v2145_v21  ;;  %v1398_v21 = vmax.f32 %v3276_v51, 0.0 }
 0x858   : > { %2176 = vmatpush3.bf16.msra.mxu1 %v2173_v8 }
 0x859   : > { %2178 = vmatprep.subr.bf16.mxu1 %v2177_v60 }
 0x85a   : > { %2148 = vmatpush3.bf16.msra.mxu0 %v2147_v63 }
 0x85b   : > { %2150 = vmatprep.subr.bf16.mxu0 %v2149_v1 }
 0x85c   : > { %2180 = vmatpush3.bf16.msra.mxu1 %v2177_v60 }
 0x85e   : > { %2152 = vmatpush3.bf16.msra.mxu0 %v2151_v28 }
 0x85f   : > { %2154 = vmatprep.subr.bf16.mxu0 %v2153_v33 }
 0x8ce   : > { %v1323_v36 = vpop.xlane.xlu0 %1322 }
 0x8cf   : > { %vm1324_vm12 = vcmp.eq.f32.partialorder %v3301_v35, %v1323_v36  ;;  %v1374_v35 = vcvt.s32.f32 %v1372_v12  ;;  %v1329_v8 = vcvt.f32.s32 %v1323_v36  ;;  %v1400_v12 = vmax.f32 %v3294_v40, 0.0 }
 0x8d0   : > { %v1325_v62 = vsel %vm1324_vm12, %v1320_v57, inf }
 0x8d1   : > { %1326 = vmin.xlane.f32.xlu0 %v1325_v62  ;;  %v1330_v11 = vshll.u32 %v1329_v8, 16 }
 0x8d3   : > { %v1341_v9 = vpop.xlane.xlu1 %1340 }
 0x8d4   : > { %vm1342_vm13 = vcmp.eq.f32.partialorder %v3317_v48, %v1341_v9  ;;  %v2181_v48 = vpack.c.bf16 %v1471_v6, %v1470_v5  ;;  %v1347_v14 = vcvt.f32.s32 %v1341_v9 }
 0x8d5   : > { %v1343_v47 = vsel %vm1342_vm13, %v1338_v10, inf }
 0x8d6   : > { %1344 = vmin.xlane.f32.xlu1 %v1343_v47  ;;  %2182 = vmatprep.subr.bf16.mxu1 %v2181_v48  ;;  %v1348_v1 = vshll.u32 %v1347_v14, 16 }
 0x8d7   : > { %v1359_v18 = vpop.xlane.xlu0 %1358  ;;  %2184 = vmatpush3.bf16.msra.mxu1 %v2181_v48 }
 0x8d8   : > { %vm1360_vm2 = vcmp.eq.f32.partialorder %v3326_v50, %v1359_v18  ;;  %v1440_v50 = vld [vmem:[#allocation8 + $0x70] sm:$0xff]  ;;  %v1365_v7 = vcvt.f32.s32 %v1359_v18  ;;  %v1401_v18 = vmax.f32 %v3303_v17, 0.0 }
 0x8d9   : > { %v1377_v53 = vpop.xlane.xlu1 %1376  ;;  %v1361_v25 = vsel %vm1360_vm2, %v1356_v52, inf  ;;  %v2155_v41 = vpack.c.bf16 %v1441_v39, %v1440_v50 }
 0x8da   : > { %vm1378_vm14 = vcmp.eq.f32.partialorder %v3328_v54, %v1377_v53  ;;  %1362 = vmin.xlane.f32.xlu0 %v1361_v25  ;;  %v1472_v54 = vld [vmem:[#allocation8 + $0x170] sm:$0xff]  ;;  %v1383_v42 = vcvt.f32.s32 %v1377_v53 }
 0x8db   : > { %v1379_v49 = vsel %vm1378_vm14, %v1374_v35, inf  ;;  %2156 = vmatpush3.bf16.msra.mxu0 %v2155_v41  ;;  %v2185_v4 = vpack.c.bf16 %v1473_v43, %v1472_v54 }
 0x8dc   : > { %1380 = vmin.xlane.f32.xlu1 %v1379_v49  ;;  %v1384_v36 = vshll.u32 %v1383_v42, 16 }
 0x8dd   : > { %2186 = vmatprep.subr.bf16.mxu1 %v2185_v4 }
 0x8de   : > { %2188 = vmatpush3.bf16.msra.mxu1 %v2185_v4 }
 0x95e   : > { %v1327_v45 = vpop.xlane.xlu0 %1326 }
 0x95f   : > { %v1328_v16 = vcvt.f32.s32 %v1327_v45 }
 0x961   : > { %v1331_v46 = vadd.s32 %v1330_v11, %v1328_v16 }
 0x963   : > { %vm1386_vm15 = vcmp.eq.s32.totalorder %v2836_v19, %v1331_v46  ;;  %vm1387_vm1 = vcmp.eq.s32.totalorder %v2839_v20, %v1331_v46  ;;  %vm1388_vm3 = vcmp.eq.s32.totalorder %v2848_v22, %v1331_v46  ;;  %v1345_v60 = vpop.xlane.xlu1 %1344 }
 0x964   : > { %v1403_v23 = vsel %vm1387_vm1, %v1398_v21, %v3214_v29  ;;  %v1404_v3 = vsel %vm1388_vm3, %v1398_v21, %v3217_v15  ;;  %v1402_v63 = vsel %vm1386_vm15, %v1398_v21, %v3211_v13  ;;  %v1346_v58 = vcvt.f32.s32 %v1345_v60 }
 0x965   : > { %1415 = vst [vmem:[%s3348_s24 + $0x8] sm:$0xff] %v1403_v23  ;;  %1545 = vmatprep.mubr.f32.mxu0 %v1403_v23  ;;  %1416 = vst [vmem:[%s3348_s24 + $0x10] sm:$0xff] %v1404_v3  ;;  %1991 = vmatprep.mubr.f32.mxu1 %v1404_v3  ;;  %v1399_v15 = vmax.f32 %v3284_v30, 0.0  ;;  %v1366_v13 = vshll.u32 %v1365_v7, 16 }
 0x966   : > { %1414 = vst [vmem:[%s3348_s24] sm:$0xff] %v1402_v63  ;;  %1546 = vmatmul.mubr.f32.vlgmr.msra.gmra.mrb[16].mxu0 %v1402_v63  ;;  %v1349_v51 = vadd.s32 %v1348_v1, %v1346_v58 }
 0x967   : > { %v1363_v29 = vpop.xlane.xlu0 %1362 }
 0x968   : > { %v1364_v57 = vcvt.f32.s32 %v1363_v29  ;;  %vm1391_vm0 = vcmp.eq.s32.totalorder %v2848_v22, %v1349_v51  ;;  %vm1390_vm4 = vcmp.eq.s32.totalorder %v2839_v20, %v1349_v51  ;;  %vm1389_vm5 = vcmp.eq.s32.totalorder %v2836_v19, %v1349_v51 }
 0x969   : > { %v1381_v62 = vpop.xlane.xlu1 %1380  ;;  %v1406_v9 = vsel %vm1390_vm4, %v1399_v15, %v3227_v55  ;;  %v1407_v10 = vsel %vm1391_vm0, %v1399_v15, %v3230_v32  ;;  %v1405_v30 = vsel %vm1389_vm5, %v1399_v15, %v3235_v44 }
 0x96a   : > { %v1382_v2 = vcvt.f32.s32 %v1381_v62  ;;  %v1367_v34 = vadd.s32 %v1366_v13, %v1364_v57  ;;  %1418 = vst [vmem:[%s3348_s24 + $0x20] sm:$0xff] %v1406_v9  ;;  %1550 = vmatprep.mubr.f32.mxu0 %v1406_v9  ;;  %1419 = vst [vmem:[%s3348_s24 + $0x28] sm:$0xff] %v1407_v10  ;;  %1992 = vmatmul.mubr.f32.vlgmr.msra.gmra.mrb[8].mxu1 %v1407_v10 }
 0x96b   : > { %1417 = vst [vmem:[%s3348_s24 + $0x18] sm:$0xff] %v1405_v30  ;;  %1551 = vmatmul.mubr.f32.gmra.mrb[18].mxu0 %v1405_v30 }
 0x96c   : > { %v1385_v47 = vadd.s32 %v1384_v36, %v1382_v2  ;;  %vm1393_vm6 = vcmp.eq.s32.totalorder %v2839_v20, %v1367_v34  ;;  %vm1394_vm7 = vcmp.eq.s32.totalorder %v2848_v22, %v1367_v34  ;;  %vm1392_vm8 = vcmp.eq.s32.totalorder %v2836_v19, %v1367_v34 }
 0x96d   : > { %v1409_v55 = vsel %vm1393_vm6, %v1400_v12, %v3254_v24  ;;  %v1410_v32 = vsel %vm1394_vm7, %v1400_v12, %v3257_v56  ;;  %v1408_v44 = vsel %vm1392_vm8, %v1400_v12, %v3262_v38 }
 0x96e   : > { %vm1396_vm9 = vcmp.eq.s32.totalorder %v2839_v20, %v1385_v47  ;;  %1421 = vst [vmem:[%s3348_s24 + $0x38] sm:$0xff] %v1409_v55  ;;  %1555 = vmatprep.mubr.f32.mxu0 %v1409_v55  ;;  %1422 = vst [vmem:[%s3348_s24 + $0x40] sm:$0xff] %v1410_v32  ;;  %1994 = vmatprep.mubr.f32.mxu1 %v1410_v32  ;;  %vm1397_vm10 = vcmp.eq.s32.totalorder %v2848_v22, %v1385_v47 }
 0x96f   : > { %1420 = vst [vmem:[%s3348_s24 + $0x30] sm:$0xff] %v1408_v44  ;;  %v1412_v40 = vsel %vm1396_vm9, %v1401_v18, %v3265_v27  ;;  %vm1395_vm11 = vcmp.eq.s32.totalorder %v2836_v19, %v1385_v47  ;;  %v1413_v24 = vsel %vm1397_vm10, %v1401_v18, %v3269_v59  ;;  %1556 = vmatmul.mubr.f32.gmra.mrb[20].mxu0 %v1408_v44 }
 0x970   : > { %1424 = vst [vmem:[%s3348_s24 + $0x50] sm:$0xff] %v1412_v40  ;;  %v1411_v20 = vsel %vm1395_vm11, %v1401_v18, %v3274_v0  ;;  %1425 = vst [vmem:[%s3348_s24 + $0x58] sm:$0xff] %v1413_v24  ;;  %1995 = vmatmul.mubr.f32.gmra.mrb[10].mxu1 %v1413_v24  ;;  %1560 = vmatprep.mubr.f32.mxu0 %v1412_v40 }
 0x971   : > { %1423 = vst [vmem:[%s3348_s24 + $0x48] sm:$0xff] %v1411_v20 }
 0x973   : > { %1561 = vmatmul.mubr.f32.gmra.mrb[22].mxu0 %v1411_v20 }
 0x974   : > { %2411 = shalt.err (!%p2408_p4)
}
 0x975   : > { %s2412_s2 = scalar_lea.hbm %s3388_s10, 1536  ;;  %s2416_s19 = scalar_lea.hbm %s3478_s7, 3072 }
 0x976   : > { %p2413_p9 = scmp.ne.s32.totalorder %s3388_s10, %s2412_s2  ;;  %p2417_p8 = scmp.lt.u32.totalorder %s3388_s10, %s3478_s7 }
 0x977   : > { %p2418_p13 = scmp.lt.u32.totalorder %s2416_s19, %s2412_s2  ;;  %p2420_p10 = scmp.lt.u32.totalorder %s2412_s2, %s3388_s10 }
 0x978   : > { %p2414_p0 = pnand %p2413_p9, %p2713_p5 }
 0x979   : > { %p2419_p6 = por %p2418_p13, %p2417_p8 }
 0x97a   : > { %p2415_p11 = pneg %p2414_p0 }
 0x97b   : > { %p2421_p3 = por %p2420_p10, %p2419_p6 }
 0x97d   : > { %p2422_p7 = pnand %p2421_p3, %p2415_p11 }
 0x97f   : > { %2425 = shalt.err (!%p2422_p7)
}
 0x980   : > { %s2518_s12 = smov 384   ;;  %s2519_s11 = smov 24   ;;  %v1840_v56 = vld [vmem:[%s3472_s1] ss:$0 sm:$0xff] }
 0x981   : > { %2205 = dma.vmem_to_hbm [thread:$0]  (%p2713_p5), %s3390_s23, 1536, %s3388_s10, %s1656_s18, %s2518_s12, %s2518_s12, %s2519_s11  }
 0x982   : > { %s378_s2 = scalar_lea.vmem [#allocation11], %s1835_s26  ;;  %s1850_s10 = sshll.u32 %s2589_s9, 9 }
 0x983   : > { %s1691_s23 = sshll.u32 %s378_s2, 4  ;;  %s3427_s15 = scalar_lea.hbm %s3479_s8, %s1850_s10  ;;  %s3422_s23 = int_to_ptr.vmem [resolvable:$true] %s1691_s23 }
 0x984   : > { %s1661_s24 = scalar_lea.sflag [#allocation12], %s2764_s20  ;;  %s2426_s19 = scalar_lea.vmem %s3422_s23, 512 }
 0x985   : > { %p2427_p12 = scmp.ne.s32.totalorder %s3422_s23, %s2426_s19  ;;  %s2520_s9 = smov [#allocation11]  }
 0x986   : > { %s2430_s25 = sshll.u32 %s2520_s9, 4  ;;  %s2431_s25 = int_to_ptr.vmem [resolvable:$false] %s2430_s25 }
 0x987   : > { %p2428_p2 = pnand %p2427_p12, %p2713_p5  ;;  %s2432_s21 = scalar_lea.vmem %s2431_s25, 1024 }
 0x988   : > { %p2433_p4 = scmp.lt.s32.totalorder %s3422_s23, %s2431_s25  ;;  %p2434_p9 = scmp.lt.s32.totalorder %s2432_s21, %s2426_s19 }
 0x989   : > { %p2429_p1 = pneg %p2428_p2 }
 0x98a   : > { %p2435_p0 = por %p2434_p9, %p2433_p4 }
 0x98c   : > { %p2436_p11 = pnand %p2435_p0, %p2429_p1 }
 0xa39   : > { %v1927_v19 = vpop.f32.mrb[16].mxu0 }
 0xa3a   : > { %v1928_v22 = vpop.f32.mrb[17].mxu0 }
 0xa3b   : > { %v1929_v38 = vadd.f32 %v1928_v22, %v1927_v19 }
 0xa3d   : > { %v1548_v27 = vadd.f32 %v1929_v38, %v1840_v56  ;;  %v1993_v59 = vpop.f32.mrb[8].mxu1 }
 0xa3e   : > { %v1930_v0 = vpop.f32.mrb[18].mxu0  ;;  %v1632_v17 = vpop.f32.mrb[9].mxu1 }
 0xa3f   : > { %v1633_v52 = vadd.f32 %v1632_v17, %v1548_v27  ;;  %v1931_v53 = vpop.f32.mrb[19].mxu0 }
 0xa40   : > { %v1932_v35 = vadd.f32 %v1931_v53, %v1930_v0 }
 0xa41   : > { %1651 = vst [vmem:[%s378_s2] sm:$0xff] %v1633_v52 }
 0xa42   : > { %v1553_v25 = vadd.f32 %v1932_v35, %v1840_v56  ;;  %v1933_v49 = vpop.f32.mrb[20].mxu0 }
 0xa43   : > { %v1996_v61 = vpop.f32.mrb[10].mxu1  ;;  %v1934_v26 = vpop.f32.mrb[21].mxu0 }
 0xa44   : > { %v1642_v28 = vpop.f32.mrb[11].mxu1  ;;  %v1638_v5 = vadd.f32 %v1993_v59, %v1553_v25  ;;  %v1935_v6 = vadd.f32 %v1934_v26, %v1933_v49 }
 0xa46   : > { %1652 = vst [vmem:[%s378_s2 + $0x8] sm:$0xff] %v1638_v5  ;;  %v1936_v48 = vpop.f32.mrb[22].mxu0  ;;  %v1558_v31 = vadd.f32 %v1935_v6, %v1840_v56 }
 0xa47   : > { %v1937_v37 = vpop.f32.mrb[23].mxu0 }
 0xa48   : > { %v1643_v33 = vadd.f32 %v1642_v28, %v1558_v31  ;;  %v1938_v50 = vadd.f32 %v1937_v37, %v1936_v48 }
 0xa4a   : > { %1653 = vst [vmem:[%s378_s2 + $0x10] sm:$0xff] %v1643_v33  ;;  %v1563_v39 = vadd.f32 %v1938_v50, %v1840_v56 }
 0xa4c   : > { %v1648_v41 = vadd.f32 %v1996_v61, %v1563_v39 }
 0xa4e   : > { %1654 = vst [vmem:[%s378_s2 + $0x18] sm:$0xff] %v1648_v41 }
 0xa4f   : > { %2439 = shalt.err (!%p2436_p11)
}
 0xa50   : > { %s2440_s12 = scalar_lea.hbm %s3427_s15, 512  ;;  %s2444_s14 = scalar_lea.hbm %s3479_s8, 1024 }
 0xa51   : > { %p2441_p8 = scmp.ne.s32.totalorder %s3427_s15, %s2440_s12  ;;  %p2445_p10 = scmp.lt.u32.totalorder %s3427_s15, %s3479_s8 }
 0xa52   : > { %p2446_p3 = scmp.lt.u32.totalorder %s2444_s14, %s2440_s12  ;;  %p2448_p12 = scmp.lt.u32.totalorder %s2440_s12, %s3427_s15 }
 0xa53   : > { %p2442_p13 = pnand %p2441_p8, %p2713_p5 }
 0xa54   : > { %p2447_p7 = por %p2446_p3, %p2445_p10 }
 0xa55   : > { %p2443_p6 = pneg %p2442_p13 }
 0xa56   : > { %p2449_p2 = por %p2448_p12, %p2447_p7 }
 0xa58   : > { %p2450_p1 = pnand %p2449_p2, %p2443_p6 }
 0xa5a   : > { %2453 = shalt.err (!%p2450_p1)
}
 0xa5b   : > { %s2521_s26 = smov 128   ;;  %s2522_s18 = smov 8  }
 0xa5c   : > { %2206 = dma.vmem_to_hbm [thread:$0]  (%p2713_p5), %s3422_s23, 512, %s3427_s15, %s1661_s24, %s2521_s26, %s2521_s26, %s2522_s18  }
 0xa5d PF: > { %s3501_s19 = sld [smem:[#allocation18_spill]]  ;;  %s1706_s9 = sand.u32 1, %s2492_s27  }
 0xa5e   : > { %p3503_p9 = scmp.ge.s32.totalorder %s2504_s30, 2  ;;  %s1707_s25 = scalar_lea.sflag [#allocation4], %s1706_s9 }
 0xa63   : > { %p3502_p4 = scmp.ne.s32.totalorder %s3501_s19, 0 }
 0xa65   : > { %p2224_p0 = pnand %p3503_p9, %p3502_p4 }
 0xa67   : > { %2483 = dma.done.wait (!%p2224_p0), %s1707_s25, 1536  }
 0xa68   : > { %2485 = vsyncadd (!%p2224_p0), %s1707_s25, 4294965760  ;;  %s1716_s21 = scalar_lea.sflag [#allocation12], %s1706_s9 }
 0xa69   : > { %2487 = dma.done.wait (!%p2224_p0), %s1716_s21, 512  }
 0xa6a   : > { %2489 = vsyncadd (!%p2224_p0), %s1716_s21, 4294966784  ;;  %p27_p5 = scmp.ge.s32.totalorder %s2699_s17, 4   ;;  %s3504_s27 = smov %s2496_s28 }
 0xa6b   : > { %s3505_s28 = smov %s2500_s29  ;;  %s3506_s29 = smov %s2709_s22 }
 0xa6c   : > { %s3507_s30 = smov %s2699_s17  ;;  %29 = sbr.rel (!%p27_p5) target bundleno = 11 (0xb), region = 122 }
 0xa73   :  { %1721 = vsyncpa [#allocation3], 1 }
 0xa74   :  { %1723 = vsyncpa [#allocation3 + $0x1], 1 }
 0xa75   :  { %1724 = vsyncpa [#allocation6], 1 }
 0xa76   :  { %1725 = vsyncpa [#allocation9], 1 }
 0xa77   :  { %1726 = vsyncpa [#allocation4], 1 }
 0xa78   :  { %1728 = vsyncpa [#allocation4 + $0x1], 1 }
 0xa79   :  { %1729 = vsyncpa [#allocation12], 1 }
 0xa7a   :  { %1731 = vsyncpa [#allocation12 + $0x1], 1 }

</bundles_post_ra>
